<compile_context>
chip_gen: v6e
topology: v6e:2x2x1
jax: 0.10.0
libtpu: 0.0.40
codegen_flags: <defaults>
</compile_context>

<pallas_src>
import jax
import jax.numpy as jnp
from jax import lax
from jax.experimental import pallas as pl
from jax.experimental.pallas import tpu as pltpu


def _recurrent_ae_kernel(
    x_flat_ref,            # (T*B, 1) int32, row = t*B + b
    f0_ref,                # (V, 8H)  emb @ [W_ih_f | W_ih_b] + [b_f | b_b]
    w_rec_f_ref,           # (H, 8H)  [W_hh_f | W_ih2 fwd-half]   encoder layer0 fwd (fused)
    w_rec_b_ref,           # (H, 8H)  [W_hh_b | W_ih2 bwd-half]   encoder layer0 bwd (fused)
    w_hh2_ref, b2_ref,     # (H, 4H), (1, 4H)                     encoder layer1 (reverse dir)
    w_dec_ref, b_dec_ref,  # (H, 4H+V), (1, 4H+V)                 decoder [W_hh_d | W_lin] fused
    emb_wih_d_ref,         # (V, 4H)  emb @ W_ih_d (re-embed + decoder input projection fold)
    logits_ref,            # out: (B, T*V) lane-dense; wrapper reshapes to (B, T, V)
    hlast_ref,             # out: (B, H)
    xproj_s,               # scratch (T*B, 8H): layer-0 input projections, both directions
    p2f_s,                 # scratch (T, B, 4H): layer-1 input proj from layer-0 fwd hidden
    p2b_s,                 # scratch (T, B, 4H): layer-1 input proj from layer-0 bwd hidden
):
    TB = x_flat_ref.shape[0]
    B, H = hlast_ref.shape
    T = TB // B
    V = emb_wih_d_ref.shape[0]
    G = 4 * H
    f32 = jnp.float32

    def sigmoid(z):
        # 1/(1+exp(-z)) == 0.5*tanh(0.5*z)+0.5: one EUP op instead of exp + full-precision divide.
        return 0.5 * jnp.tanh(0.5 * z) + 0.5

    def gates_to_hc(g, c):                       # PyTorch LSTM gate order: i, f, g, o
        i = sigmoid(g[:, 0 * H:1 * H])
        f = sigmoid(g[:, 1 * H:2 * H])
        gg = jnp.tanh(g[:, 2 * H:3 * H])
        o = sigmoid(g[:, 3 * H:4 * H])
        c_new = f * c + i * gg
        return o * jnp.tanh(c_new), c_new

    # ---- preamble: embed + BOTH layer-0 input projections (+ folded biases) in ONE matmul ----
    ids = x_flat_ref[...]                                        # (T*B, 1) int32
    iota_tv = lax.broadcasted_iota(jnp.int32, (TB, V), 1)
    onehot_x = (ids == iota_tv).astype(f32)                      # rows sum to 1 -> bias fold exact
    xproj_s[...] = jnp.dot(onehot_x, f0_ref[...], preferred_element_type=f32)   # (T*B, 8H)

    # ---- encoder layer 0: forward + backward chains fused, fully unrolled ----
    w_rec_f = w_rec_f_ref[...]
    w_rec_b = w_rec_b_ref[...]
    zeros_bh = jnp.zeros((B, H), f32)
    zeros_bg = jnp.zeros((B, G), f32)
    hf, cf, hb, cb = zeros_bh, zeros_bh, zeros_bh, zeros_bh
    rec_f, rec_b = zeros_bg, zeros_bg      # h_{t-1} @ W_hh carried from previous step (0 at t=0)
    for i in range(T):
        tf, tb = i, T - 1 - i
        gf = xproj_s[tf * B:(tf + 1) * B, 0:G] + rec_f
        hf, cf = gates_to_hc(gf, cf)
        pf = jnp.dot(hf, w_rec_f, preferred_element_type=f32)    # [next-step gates | p2f(tf)]
        rec_f = pf[:, 0:G]
        p2f_s[tf] = pf[:, G:]

        gb = xproj_s[tb * B:(tb + 1) * B, G:] + rec_b
        hb, cb = gates_to_hc(gb, cb)
        pb = jnp.dot(hb, w_rec_b, preferred_element_type=f32)    # [next-step gates | p2b(tb)]
        rec_b = pb[:, 0:G]
        p2b_s[tb] = pb[:, G:]

    # ---- encoder layer 1, reverse direction only (produces h[-1]/c[-1]; fwd dir never used) ----
    w_hh2 = w_hh2_ref[...]
    b2 = b2_ref[...]
    h1, c1 = zeros_bh, zeros_bh
    for t in range(T - 1, -1, -1):
        g1 = p2f_s[t] + p2b_s[t] + b2 + jnp.dot(h1, w_hh2, preferred_element_type=f32)
        h1, c1 = gates_to_hc(g1, c1)
    hlast_ref[...] = h1

    # ---- greedy decoder, fully unrolled; one fused MXU call per step on the serial chain ----
    w_dec = w_dec_ref[...]
    b_dec = b_dec_ref[...]
    emb_wih_d = emb_wih_d_ref[...]
    iota_bv = lax.broadcasted_iota(jnp.int32, (B, V), 1)

    h, c = h1, c1
    hproj = jnp.dot(h, w_dec, preferred_element_type=f32) + b_dec   # [gates(step 0) | unused]
    xgate = None                       # first decoder input is zeros -> zero input projection
    logits_parts = []
    for di in range(T):
        g = hproj[:, 0:G]
        if xgate is not None:
            g = g + xgate
        h, c = gates_to_hc(g, c)
        # fused: gate contribution for the NEXT step + logits of THIS step, single matmul.
        hproj = jnp.dot(h, w_dec, preferred_element_type=f32) + b_dec
        logits = hproj[:, G:]                                       # (B, V), bias included
        logits_parts.append(logits)
        if di + 1 < T:
            # greedy argmax (first occurrence, matches torch.topk(1)) -> fused re-embed+project.
            m = jnp.max(logits, axis=-1, keepdims=True)
            idx = jnp.min(jnp.where(logits == m, iota_bv, V), axis=-1, keepdims=True)
            onehot = (iota_bv == idx).astype(f32)
            xgate = jnp.dot(onehot, emb_wih_d, preferred_element_type=f32)   # (B, 4H)

    # single lane-dense store of all logits (replaces T masked lane-sparse stores).
    logits_ref[...] = jnp.concatenate(logits_parts, axis=1)            # (B, T*V)


def recurrent_autoencoder_forward(x, params):
    """x: (B, T) int32 token ids. Returns (logits (B,T,V), h_last (B,H))."""
    B, T = x.shape
    H = params["w_hh2"].shape[0]
    V = params["emb_wih_d"].shape[0]
    x_flat = jnp.transpose(x).reshape(T * B, 1).astype(jnp.int32)    # glue: row = t*B + b

    vmem = pl.BlockSpec(memory_space=pltpu.MemorySpace.VMEM)
    logits_flat, h_last = pl.pallas_call(
        _recurrent_ae_kernel,
        out_shape=(jax.ShapeDtypeStruct((B, T * V), jnp.float32),
                   jax.ShapeDtypeStruct((B, H), jnp.float32)),
        in_specs=[vmem] * 9,
        out_specs=(vmem, vmem),
        scratch_shapes=[
            pltpu.VMEM((T * B, 8 * H), jnp.float32),   # layer-0 input projections (both dirs)
            pltpu.VMEM((T, B, 4 * H), jnp.float32),    # p2f
            pltpu.VMEM((T, B, 4 * H), jnp.float32),    # p2b
        ],
    )(x_flat, params["f0"], params["w_rec_f"], params["w_rec_b"],
      params["w_hh2"], params["b2"],
      params["w_dec"], params["b_dec"], params["emb_wih_d"])

    logits = logits_flat.reshape(B, T, V)              # glue back to PyTorch (B, T, V)
    return logits, h_last


def init_params(key, vocab_size, hidden_dim, char_dim=4):
    """PyTorch-shaped init, then packed into the fused kernel layout (all exact rearrangements)."""
    H, C, V = hidden_dim, char_dim, vocab_size
    ks = iter(jax.random.split(key, 24))
    sh = 1.0 / float(H) ** 0.5

    def u(shape):
        return jax.random.uniform(next(ks), shape, jnp.float32, -sh, sh)

    emb = jax.random.normal(next(ks), (V, C), jnp.float32)           # nn.Embedding ~ N(0,1)

    def lstm_layer(in_dim):                                          # PyTorch (4H,in),(4H,H),(4H,),(4H,)
        return u((4 * H, in_dim)), u((4 * H, H)), u((4 * H,)), u((4 * H,))

    W_ih_f, W_hh_f, bih_f, bhh_f = lstm_layer(C)                     # encoder layer0 fwd
    W_ih_b, W_hh_b, bih_b, bhh_b = lstm_layer(C)                     # encoder layer0 bwd
    W_ih2, W_hh2, bih2, bhh2 = lstm_layer(2 * H)                     # encoder layer1 reverse
    W_ih_d, W_hh_d, bih_d, bhh_d = lstm_layer(C)                     # decoder
    W_lin, b_lin = u((V, H)), u((V,))                                # nn.Linear(H, V)

    b_f = (bih_f + bhh_f).reshape(1, 4 * H)
    b_b = (bih_b + bhh_b).reshape(1, 4 * H)
    # Fused embed + layer-0 input projection (+bias) table, both directions: (V, 8H).
    f0 = jnp.concatenate([emb @ W_ih_f.T + b_f, emb @ W_ih_b.T + b_b], axis=1)
    # Fused per-step layer-0 weights: [W_hh | W_ih2 direction-half]  -> (H, 8H).
    w_rec_f = jnp.concatenate([W_hh_f.T, W_ih2[:, :H].T], axis=1)
    w_rec_b = jnp.concatenate([W_hh_b.T, W_ih2[:, H:].T], axis=1)
    # Fused decoder weights/bias: [W_hh_d | W_lin] -> (H, 4H+V), [b_d | b_lin] -> (1, 4H+V).
    w_dec = jnp.concatenate([W_hh_d.T, W_lin.T], axis=1)
    b_dec = jnp.concatenate([(bih_d + bhh_d).reshape(1, 4 * H), b_lin.reshape(1, V)], axis=1)
    # Fused decoder re-embed + input projection table: (V, 4H).
    emb_wih_d = emb @ W_ih_d.T

    return {
        "f0": f0,
        "w_rec_f": w_rec_f, "w_rec_b": w_rec_b,
        "w_hh2": W_hh2.T, "b2": (bih2 + bhh2).reshape(1, 4 * H),
        "w_dec": w_dec, "b_dec": b_dec,
        "emb_wih_d": emb_wih_d,
    }


if __name__ == "__main__":
    # batch=8 fills one f32 sublane tile (perf review); seq_len=8, vocab=16, hidden=32, char_dim=4.
    B, T, V, H = 8, 8, 16, 32
    key = jax.random.PRNGKey(0)
    kx, kp = jax.random.split(key)
    x = jax.random.randint(kx, (B, T), 0, V, dtype=jnp.int32)
    params = init_params(kp, V, H)

    fwd = jax.jit(recurrent_autoencoder_forward)
    logits, h_last = fwd(x, params)
    jax.block_until_ready((logits, h_last))

    assert logits.shape == (B, T, V), logits.shape
    assert h_last.shape == (B, H), h_last.shape
    assert bool(jnp.isfinite(logits).all()) and bool(jnp.isfinite(h_last).all())
    print("KERNEL_OK")
</pallas_src>

<mosaic_0001>
module attributes {stable_mosaic.version = 11 : i64} {
  func.func @_recurrent_ae_kernel(%arg0: memref<64x1xi32, #tpu.memory_space<vmem>>, %arg1: memref<16x256xf32, #tpu.memory_space<vmem>>, %arg2: memref<32x256xf32, #tpu.memory_space<vmem>>, %arg3: memref<32x256xf32, #tpu.memory_space<vmem>>, %arg4: memref<32x128xf32, #tpu.memory_space<vmem>>, %arg5: memref<1x128xf32, #tpu.memory_space<vmem>>, %arg6: memref<32x144xf32, #tpu.memory_space<vmem>>, %arg7: memref<1x144xf32, #tpu.memory_space<vmem>>, %arg8: memref<16x128xf32, #tpu.memory_space<vmem>>, %arg9: memref<8x128xf32, #tpu.memory_space<vmem>>, %arg10: memref<8x32xf32, #tpu.memory_space<vmem>>, %arg11: memref<64x256xf32, #tpu.memory_space<vmem>>, %arg12: memref<8x8x128xf32, #tpu.memory_space<vmem>>, %arg13: memref<8x8x128xf32, #tpu.memory_space<vmem>>) attributes {dimension_semantics = [], scalar_prefetch = 0 : i64, scratch_operands = 3 : i64, tpu.core_type = #tpu.core_type<tc>} {
    %c0 = arith.constant 0 : index
    %c0_0 = arith.constant 0 : index
    %0 = vector.load %arg0[%c0, %c0_0] : memref<64x1xi32, #tpu.memory_space<vmem>>, vector<64x1xi32>
    %1 = tpu.iota {dimensions = array<i32: 1>} : vector<64x16xi32>
    %2 = vector.broadcast %0 : vector<64x1xi32> to vector<64x16xi32>
    %3 = arith.cmpi eq, %2, %1 : vector<64x16xi32>
    %4 = arith.extui %3 : vector<64x16xi1> to vector<64x16xi32>
    %5 = arith.sitofp %4 : vector<64x16xi32> to vector<64x16xf32>
    %c0_1 = arith.constant 0 : index
    %c0_2 = arith.constant 0 : index
    %6 = vector.load %arg1[%c0_1, %c0_2] : memref<16x256xf32, #tpu.memory_space<vmem>>, vector<16x256xf32>
    %cst = arith.constant dense<0.000000e+00> : vector<64x256xf32>
    %7 = tpu.matmul %5, %6, %cst {dimension_numbers = #tpu.dot_dimension_numbers<[1], [0], [0], [1], [0, 0, 1, 1], [], []>} : vector<64x16xf32>, vector<16x256xf32>, vector<64x256xf32> -> vector<64x256xf32>
    %c0_3 = arith.constant 0 : index
    %c0_4 = arith.constant 0 : index
    %8 = vector.load %arg11[%c0_3, %c0_4] : memref<64x256xf32, #tpu.memory_space<vmem>>, vector<64x256xf32>
    tpu.vector_store %arg11[%c0_3, %c0_4], %7 {strides = array<i32>} : memref<64x256xf32, #tpu.memory_space<vmem>>, vector<64x256xf32>,
    %c0_5 = arith.constant 0 : index
    %c0_6 = arith.constant 0 : index
    %9 = vector.load %arg2[%c0_5, %c0_6] : memref<32x256xf32, #tpu.memory_space<vmem>>, vector<32x256xf32>
    %c0_7 = arith.constant 0 : index
    %c0_8 = arith.constant 0 : index
    %10 = vector.load %arg3[%c0_7, %c0_8] : memref<32x256xf32, #tpu.memory_space<vmem>>, vector<32x256xf32>
    %cst_9 = arith.constant 0.000000e+00 : f32
    %11 = vector.broadcast %cst_9 : f32 to vector<8x32xf32>
    %cst_10 = arith.constant 0.000000e+00 : f32
    %12 = vector.broadcast %cst_10 : f32 to vector<8x128xf32>
    %c0_11 = arith.constant 0 : index
    %c0_12 = arith.constant 0 : index
    %13 = vector.load %arg11[%c0_11, %c0_12] : memref<64x256xf32, #tpu.memory_space<vmem>>, vector<8x128xf32>
    %14 = arith.addf %13, %12 : vector<8x128xf32>
    %15 = vector.extract_strided_slice %14 {offsets = [0, 0], sizes = [8, 32], strides = [1, 1]} : vector<8x128xf32> to vector<8x32xf32>
    %cst_13 = arith.constant 5.000000e-01 : f32
    %16 = vector.broadcast %cst_13 : f32 to vector<8x32xf32>
    %17 = arith.mulf %16, %15 : vector<8x32xf32>
    %18 = math.tanh %17 : vector<8x32xf32>
    %cst_14 = arith.constant 5.000000e-01 : f32
    %19 = vector.broadcast %cst_14 : f32 to vector<8x32xf32>
    %20 = arith.mulf %19, %18 : vector<8x32xf32>
    %cst_15 = arith.constant 5.000000e-01 : f32
    %21 = vector.broadcast %cst_15 : f32 to vector<8x32xf32>
    %22 = arith.addf %20, %21 : vector<8x32xf32>
    %23 = vector.extract_strided_slice %14 {offsets = [0, 32], sizes = [8, 32], strides = [1, 1]} : vector<8x128xf32> to vector<8x32xf32>
    %cst_16 = arith.constant 5.000000e-01 : f32
    %24 = vector.broadcast %cst_16 : f32 to vector<8x32xf32>
    %25 = arith.mulf %24, %23 : vector<8x32xf32>
    %26 = math.tanh %25 : vector<8x32xf32>
    %cst_17 = arith.constant 5.000000e-01 : f32
    %27 = vector.broadcast %cst_17 : f32 to vector<8x32xf32>
    %28 = arith.mulf %27, %26 : vector<8x32xf32>
    %cst_18 = arith.constant 5.000000e-01 : f32
    %29 = vector.broadcast %cst_18 : f32 to vector<8x32xf32>
    %30 = arith.addf %28, %29 : vector<8x32xf32>
    %31 = vector.extract_strided_slice %14 {offsets = [0, 64], sizes = [8, 32], strides = [1, 1]} : vector<8x128xf32> to vector<8x32xf32>
    %32 = math.tanh %31 : vector<8x32xf32>
    %33 = vector.extract_strided_slice %14 {offsets = [0, 96], sizes = [8, 32], strides = [1, 1]} : vector<8x128xf32> to vector<8x32xf32>
    %cst_19 = arith.constant 5.000000e-01 : f32
    %34 = vector.broadcast %cst_19 : f32 to vector<8x32xf32>
    %35 = arith.mulf %34, %33 : vector<8x32xf32>
    %36 = math.tanh %35 : vector<8x32xf32>
    %cst_20 = arith.constant 5.000000e-01 : f32
    %37 = vector.broadcast %cst_20 : f32 to vector<8x32xf32>
    %38 = arith.mulf %37, %36 : vector<8x32xf32>
    %cst_21 = arith.constant 5.000000e-01 : f32
    %39 = vector.broadcast %cst_21 : f32 to vector<8x32xf32>
    %40 = arith.addf %38, %39 : vector<8x32xf32>
    %41 = arith.mulf %30, %11 : vector<8x32xf32>
    %42 = arith.mulf %22, %32 : vector<8x32xf32>
    %43 = arith.addf %41, %42 : vector<8x32xf32>
    %44 = math.tanh %43 : vector<8x32xf32>
    %45 = arith.mulf %40, %44 : vector<8x32xf32>
    %cst_22 = arith.constant dense<0.000000e+00> : vector<8x256xf32>
    %46 = tpu.matmul %45, %9, %cst_22 {dimension_numbers = #tpu.dot_dimension_numbers<[1], [0], [0], [1], [0, 0, 1, 1], [], []>} : vector<8x32xf32>, vector<32x256xf32>, vector<8x256xf32> -> vector<8x256xf32>
    %47 = vector.extract_strided_slice %46 {offsets = [0, 0], sizes = [8, 128], strides = [1, 1]} : vector<8x256xf32> to vector<8x128xf32>
    %48 = vector.extract_strided_slice %46 {offsets = [0, 128], sizes = [8, 128], strides = [1, 1]} : vector<8x256xf32> to vector<8x128xf32>
    %c0_23 = arith.constant 0 : index
    %c0_24 = arith.constant 0 : index
    %c0_25 = arith.constant 0 : index
    %49 = vector.load %arg12[%c0_23, %c0_24, %c0_25] : memref<8x8x128xf32, #tpu.memory_space<vmem>>, vector<1x8x128xf32>
    %50 = vector.shape_cast %49 : vector<1x8x128xf32> to vector<8x128xf32>
    %51 = vector.shape_cast %48 : vector<8x128xf32> to vector<1x8x128xf32>
    tpu.vector_store %arg12[%c0_23, %c0_24, %c0_25], %51 {strides = array<i32>} : memref<8x8x128xf32, #tpu.memory_space<vmem>>, vector<1x8x128xf32>,
    %c56 = arith.constant 56 : index
    %c128 = arith.constant 128 : index
    %52 = vector.load %arg11[%c56, %c128] : memref<64x256xf32, #tpu.memory_space<vmem>>, vector<8x128xf32>
    %53 = arith.addf %52, %12 : vector<8x128xf32>
    %54 = vector.extract_strided_slice %53 {offsets = [0, 0], sizes = [8, 32], strides = [1, 1]} : vector<8x128xf32> to vector<8x32xf32>
    %cst_26 = arith.constant 5.000000e-01 : f32
    %55 = vector.broadcast %cst_26 : f32 to vector<8x32xf32>
    %56 = arith.mulf %55, %54 : vector<8x32xf32>
    %57 = math.tanh %56 : vector<8x32xf32>
    %cst_27 = arith.constant 5.000000e-01 : f32
    %58 = vector.broadcast %cst_27 : f32 to vector<8x32xf32>
    %59 = arith.mulf %58, %57 : vector<8x32xf32>
    %cst_28 = arith.constant 5.000000e-01 : f32
    %60 = vector.broadcast %cst_28 : f32 to vector<8x32xf32>
    %61 = arith.addf %59, %60 : vector<8x32xf32>
    %62 = vector.extract_strided_slice %53 {offsets = [0, 32], sizes = [8, 32], strides = [1, 1]} : vector<8x128xf32> to vector<8x32xf32>
    %cst_29 = arith.constant 5.000000e-01 : f32
    %63 = vector.broadcast %cst_29 : f32 to vector<8x32xf32>
    %64 = arith.mulf %63, %62 : vector<8x32xf32>
    %65 = math.tanh %64 : vector<8x32xf32>
    %cst_30 = arith.constant 5.000000e-01 : f32
    %66 = vector.broadcast %cst_30 : f32 to vector<8x32xf32>
    %67 = arith.mulf %66, %65 : vector<8x32xf32>
    %cst_31 = arith.constant 5.000000e-01 : f32
    %68 = vector.broadcast %cst_31 : f32 to vector<8x32xf32>
    %69 = arith.addf %67, %68 : vector<8x32xf32>
    %70 = vector.extract_strided_slice %53 {offsets = [0, 64], sizes = [8, 32], strides = [1, 1]} : vector<8x128xf32> to vector<8x32xf32>
    %71 = math.tanh %70 : vector<8x32xf32>
    %72 = vector.extract_strided_slice %53 {offsets = [0, 96], sizes = [8, 32], strides = [1, 1]} : vector<8x128xf32> to vector<8x32xf32>
    %cst_32 = arith.constant 5.000000e-01 : f32
    %73 = vector.broadcast %cst_32 : f32 to vector<8x32xf32>
    %74 = arith.mulf %73, %72 : vector<8x32xf32>
    %75 = math.tanh %74 : vector<8x32xf32>
    %cst_33 = arith.constant 5.000000e-01 : f32
    %76 = vector.broadcast %cst_33 : f32 to vector<8x32xf32>
    %77 = arith.mulf %76, %75 : vector<8x32xf32>
    %cst_34 = arith.constant 5.000000e-01 : f32
    %78 = vector.broadcast %cst_34 : f32 to vector<8x32xf32>
    %79 = arith.addf %77, %78 : vector<8x32xf32>
    %80 = arith.mulf %69, %11 : vector<8x32xf32>
    %81 = arith.mulf %61, %71 : vector<8x32xf32>
    %82 = arith.addf %80, %81 : vector<8x32xf32>
    %83 = math.tanh %82 : vector<8x32xf32>
    %84 = arith.mulf %79, %83 : vector<8x32xf32>
    %cst_35 = arith.constant dense<0.000000e+00> : vector<8x256xf32>
    %85 = tpu.matmul %84, %10, %cst_35 {dimension_numbers = #tpu.dot_dimension_numbers<[1], [0], [0], [1], [0, 0, 1, 1], [], []>} : vector<8x32xf32>, vector<32x256xf32>, vector<8x256xf32> -> vector<8x256xf32>
    %86 = vector.extract_strided_slice %85 {offsets = [0, 0], sizes = [8, 128], strides = [1, 1]} : vector<8x256xf32> to vector<8x128xf32>
    %87 = vector.extract_strided_slice %85 {offsets = [0, 128], sizes = [8, 128], strides = [1, 1]} : vector<8x256xf32> to vector<8x128xf32>
    %c7 = arith.constant 7 : index
    %c0_36 = arith.constant 0 : index
    %c0_37 = arith.constant 0 : index
    %88 = vector.load %arg13[%c7, %c0_36, %c0_37] : memref<8x8x128xf32, #tpu.memory_space<vmem>>, vector<1x8x128xf32>
    %89 = vector.shape_cast %88 : vector<1x8x128xf32> to vector<8x128xf32>
    %90 = vector.shape_cast %87 : vector<8x128xf32> to vector<1x8x128xf32>
    tpu.vector_store %arg13[%c7, %c0_36, %c0_37], %90 {strides = array<i32>} : memref<8x8x128xf32, #tpu.memory_space<vmem>>, vector<1x8x128xf32>,
    %c8 = arith.constant 8 : index
    %c0_38 = arith.constant 0 : index
    %91 = vector.load %arg11[%c8, %c0_38] : memref<64x256xf32, #tpu.memory_space<vmem>>, vector<8x128xf32>
    %92 = arith.addf %91, %47 : vector<8x128xf32>
    %93 = vector.extract_strided_slice %92 {offsets = [0, 0], sizes = [8, 32], strides = [1, 1]} : vector<8x128xf32> to vector<8x32xf32>
    %cst_39 = arith.constant 5.000000e-01 : f32
    %94 = vector.broadcast %cst_39 : f32 to vector<8x32xf32>
    %95 = arith.mulf %94, %93 : vector<8x32xf32>
    %96 = math.tanh %95 : vector<8x32xf32>
    %cst_40 = arith.constant 5.000000e-01 : f32
    %97 = vector.broadcast %cst_40 : f32 to vector<8x32xf32>
    %98 = arith.mulf %97, %96 : vector<8x32xf32>
    %cst_41 = arith.constant 5.000000e-01 : f32
    %99 = vector.broadcast %cst_41 : f32 to vector<8x32xf32>
    %100 = arith.addf %98, %99 : vector<8x32xf32>
    %101 = vector.extract_strided_slice %92 {offsets = [0, 32], sizes = [8, 32], strides = [1, 1]} : vector<8x128xf32> to vector<8x32xf32>
    %cst_42 = arith.constant 5.000000e-01 : f32
    %102 = vector.broadcast %cst_42 : f32 to vector<8x32xf32>
    %103 = arith.mulf %102, %101 : vector<8x32xf32>
    %104 = math.tanh %103 : vector<8x32xf32>
    %cst_43 = arith.constant 5.000000e-01 : f32
    %105 = vector.broadcast %cst_43 : f32 to vector<8x32xf32>
    %106 = arith.mulf %105, %104 : vector<8x32xf32>
    %cst_44 = arith.constant 5.000000e-01 : f32
    %107 = vector.broadcast %cst_44 : f32 to vector<8x32xf32>
    %108 = arith.addf %106, %107 : vector<8x32xf32>
    %109 = vector.extract_strided_slice %92 {offsets = [0, 64], sizes = [8, 32], strides = [1, 1]} : vector<8x128xf32> to vector<8x32xf32>
    %110 = math.tanh %109 : vector<8x32xf32>
    %111 = vector.extract_strided_slice %92 {offsets = [0, 96], sizes = [8, 32], strides = [1, 1]} : vector<8x128xf32> to vector<8x32xf32>
    %cst_45 = arith.constant 5.000000e-01 : f32
    %112 = vector.broadcast %cst_45 : f32 to vector<8x32xf32>
    %113 = arith.mulf %112, %111 : vector<8x32xf32>
    %114 = math.tanh %113 : vector<8x32xf32>
    %cst_46 = arith.constant 5.000000e-01 : f32
    %115 = vector.broadcast %cst_46 : f32 to vector<8x32xf32>
    %116 = arith.mulf %115, %114 : vector<8x32xf32>
    %cst_47 = arith.constant 5.000000e-01 : f32
    %117 = vector.broadcast %cst_47 : f32 to vector<8x32xf32>
    %118 = arith.addf %116, %117 : vector<8x32xf32>
    %119 = arith.mulf %108, %43 : vector<8x32xf32>
    %120 = arith.mulf %100, %110 : vector<8x32xf32>
    %121 = arith.addf %119, %120 : vector<8x32xf32>
    %122 = math.tanh %121 : vector<8x32xf32>
    %123 = arith.mulf %118, %122 : vector<8x32xf32>
    %cst_48 = arith.constant dense<0.000000e+00> : vector<8x256xf32>
    %124 = tpu.matmul %123, %9, %cst_48 {dimension_numbers = #tpu.dot_dimension_numbers<[1], [0], [0], [1], [0, 0, 1, 1], [], []>} : vector<8x32xf32>, vector<32x256xf32>, vector<8x256xf32> -> vector<8x256xf32>
    %125 = vector.extract_strided_slice %124 {offsets = [0, 0], sizes = [8, 128], strides = [1, 1]} : vector<8x256xf32> to vector<8x128xf32>
    %126 = vector.extract_strided_slice %124 {offsets = [0, 128], sizes = [8, 128], strides = [1, 1]} : vector<8x256xf32> to vector<8x128xf32>
    %c1 = arith.constant 1 : index
    %c0_49 = arith.constant 0 : index
    %c0_50 = arith.constant 0 : index
    %127 = vector.load %arg12[%c1, %c0_49, %c0_50] : memref<8x8x128xf32, #tpu.memory_space<vmem>>, vector<1x8x128xf32>
    %128 = vector.shape_cast %127 : vector<1x8x128xf32> to vector<8x128xf32>
    %129 = vector.shape_cast %126 : vector<8x128xf32> to vector<1x8x128xf32>
    tpu.vector_store %arg12[%c1, %c0_49, %c0_50], %129 {strides = array<i32>} : memref<8x8x128xf32, #tpu.memory_space<vmem>>, vector<1x8x128xf32>,
    %c48 = arith.constant 48 : index
    %c128_51 = arith.constant 128 : index
    %130 = vector.load %arg11[%c48, %c128_51] : memref<64x256xf32, #tpu.memory_space<vmem>>, vector<8x128xf32>
    %131 = arith.addf %130, %86 : vector<8x128xf32>
    %132 = vector.extract_strided_slice %131 {offsets = [0, 0], sizes = [8, 32], strides = [1, 1]} : vector<8x128xf32> to vector<8x32xf32>
    %cst_52 = arith.constant 5.000000e-01 : f32
    %133 = vector.broadcast %cst_52 : f32 to vector<8x32xf32>
    %134 = arith.mulf %133, %132 : vector<8x32xf32>
    %135 = math.tanh %134 : vector<8x32xf32>
    %cst_53 = arith.constant 5.000000e-01 : f32
    %136 = vector.broadcast %cst_53 : f32 to vector<8x32xf32>
    %137 = arith.mulf %136, %135 : vector<8x32xf32>
    %cst_54 = arith.constant 5.000000e-01 : f32
    %138 = vector.broadcast %cst_54 : f32 to vector<8x32xf32>
    %139 = arith.addf %137, %138 : vector<8x32xf32>
    %140 = vector.extract_strided_slice %131 {offsets = [0, 32], sizes = [8, 32], strides = [1, 1]} : vector<8x128xf32> to vector<8x32xf32>
    %cst_55 = arith.constant 5.000000e-01 : f32
    %141 = vector.broadcast %cst_55 : f32 to vector<8x32xf32>
    %142 = arith.mulf %141, %140 : vector<8x32xf32>
    %143 = math.tanh %142 : vector<8x32xf32>
    %cst_56 = arith.constant 5.000000e-01 : f32
    %144 = vector.broadcast %cst_56 : f32 to vector<8x32xf32>
    %145 = arith.mulf %144, %143 : vector<8x32xf32>
    %cst_57 = arith.constant 5.000000e-01 : f32
    %146 = vector.broadcast %cst_57 : f32 to vector<8x32xf32>
    %147 = arith.addf %145, %146 : vector<8x32xf32>
    %148 = vector.extract_strided_slice %131 {offsets = [0, 64], sizes = [8, 32], strides = [1, 1]} : vector<8x128xf32> to vector<8x32xf32>
    %149 = math.tanh %148 : vector<8x32xf32>
    %150 = vector.extract_strided_slice %131 {offsets = [0, 96], sizes = [8, 32], strides = [1, 1]} : vector<8x128xf32> to vector<8x32xf32>
    %cst_58 = arith.constant 5.000000e-01 : f32
    %151 = vector.broadcast %cst_58 : f32 to vector<8x32xf32>
    %152 = arith.mulf %151, %150 : vector<8x32xf32>
    %153 = math.tanh %152 : vector<8x32xf32>
    %cst_59 = arith.constant 5.000000e-01 : f32
    %154 = vector.broadcast %cst_59 : f32 to vector<8x32xf32>
    %155 = arith.mulf %154, %153 : vector<8x32xf32>
    %cst_60 = arith.constant 5.000000e-01 : f32
    %156 = vector.broadcast %cst_60 : f32 to vector<8x32xf32>
    %157 = arith.addf %155, %156 : vector<8x32xf32>
    %158 = arith.mulf %147, %82 : vector<8x32xf32>
    %159 = arith.mulf %139, %149 : vector<8x32xf32>
    %160 = arith.addf %158, %159 : vector<8x32xf32>
    %161 = math.tanh %160 : vector<8x32xf32>
    %162 = arith.mulf %157, %161 : vector<8x32xf32>
    %cst_61 = arith.constant dense<0.000000e+00> : vector<8x256xf32>
    %163 = tpu.matmul %162, %10, %cst_61 {dimension_numbers = #tpu.dot_dimension_numbers<[1], [0], [0], [1], [0, 0, 1, 1], [], []>} : vector<8x32xf32>, vector<32x256xf32>, vector<8x256xf32> -> vector<8x256xf32>
    %164 = vector.extract_strided_slice %163 {offsets = [0, 0], sizes = [8, 128], strides = [1, 1]} : vector<8x256xf32> to vector<8x128xf32>
    %165 = vector.extract_strided_slice %163 {offsets = [0, 128], sizes = [8, 128], strides = [1, 1]} : vector<8x256xf32> to vector<8x128xf32>
    %c6 = arith.constant 6 : index
    %c0_62 = arith.constant 0 : index
    %c0_63 = arith.constant 0 : index
    %166 = vector.load %arg13[%c6, %c0_62, %c0_63] : memref<8x8x128xf32, #tpu.memory_space<vmem>>, vector<1x8x128xf32>
    %167 = vector.shape_cast %166 : vector<1x8x128xf32> to vector<8x128xf32>
    %168 = vector.shape_cast %165 : vector<8x128xf32> to vector<1x8x128xf32>
    tpu.vector_store %arg13[%c6, %c0_62, %c0_63], %168 {strides = array<i32>} : memref<8x8x128xf32, #tpu.memory_space<vmem>>, vector<1x8x128xf32>,
    %c16 = arith.constant 16 : index
    %c0_64 = arith.constant 0 : index
    %169 = vector.load %arg11[%c16, %c0_64] : memref<64x256xf32, #tpu.memory_space<vmem>>, vector<8x128xf32>
    %170 = arith.addf %169, %125 : vector<8x128xf32>
    %171 = vector.extract_strided_slice %170 {offsets = [0, 0], sizes = [8, 32], strides = [1, 1]} : vector<8x128xf32> to vector<8x32xf32>
    %cst_65 = arith.constant 5.000000e-01 : f32
    %172 = vector.broadcast %cst_65 : f32 to vector<8x32xf32>
    %173 = arith.mulf %172, %171 : vector<8x32xf32>
    %174 = math.tanh %173 : vector<8x32xf32>
    %cst_66 = arith.constant 5.000000e-01 : f32
    %175 = vector.broadcast %cst_66 : f32 to vector<8x32xf32>
    %176 = arith.mulf %175, %174 : vector<8x32xf32>
    %cst_67 = arith.constant 5.000000e-01 : f32
    %177 = vector.broadcast %cst_67 : f32 to vector<8x32xf32>
    %178 = arith.addf %176, %177 : vector<8x32xf32>
    %179 = vector.extract_strided_slice %170 {offsets = [0, 32], sizes = [8, 32], strides = [1, 1]} : vector<8x128xf32> to vector<8x32xf32>
    %cst_68 = arith.constant 5.000000e-01 : f32
    %180 = vector.broadcast %cst_68 : f32 to vector<8x32xf32>
    %181 = arith.mulf %180, %179 : vector<8x32xf32>
    %182 = math.tanh %181 : vector<8x32xf32>
    %cst_69 = arith.constant 5.000000e-01 : f32
    %183 = vector.broadcast %cst_69 : f32 to vector<8x32xf32>
    %184 = arith.mulf %183, %182 : vector<8x32xf32>
    %cst_70 = arith.constant 5.000000e-01 : f32
    %185 = vector.broadcast %cst_70 : f32 to vector<8x32xf32>
    %186 = arith.addf %184, %185 : vector<8x32xf32>
    %187 = vector.extract_strided_slice %170 {offsets = [0, 64], sizes = [8, 32], strides = [1, 1]} : vector<8x128xf32> to vector<8x32xf32>
    %188 = math.tanh %187 : vector<8x32xf32>
    %189 = vector.extract_strided_slice %170 {offsets = [0, 96], sizes = [8, 32], strides = [1, 1]} : vector<8x128xf32> to vector<8x32xf32>
    %cst_71 = arith.constant 5.000000e-01 : f32
    %190 = vector.broadcast %cst_71 : f32 to vector<8x32xf32>
    %191 = arith.mulf %190, %189 : vector<8x32xf32>
    %192 = math.tanh %191 : vector<8x32xf32>
    %cst_72 = arith.constant 5.000000e-01 : f32
    %193 = vector.broadcast %cst_72 : f32 to vector<8x32xf32>
    %194 = arith.mulf %193, %192 : vector<8x32xf32>
    %cst_73 = arith.constant 5.000000e-01 : f32
    %195 = vector.broadcast %cst_73 : f32 to vector<8x32xf32>
    %196 = arith.addf %194, %195 : vector<8x32xf32>
    %197 = arith.mulf %186, %121 : vector<8x32xf32>
    %198 = arith.mulf %178, %188 : vector<8x32xf32>
    %199 = arith.addf %197, %198 : vector<8x32xf32>
    %200 = math.tanh %199 : vector<8x32xf32>
    %201 = arith.mulf %196, %200 : vector<8x32xf32>
    %cst_74 = arith.constant dense<0.000000e+00> : vector<8x256xf32>
    %202 = tpu.matmul %201, %9, %cst_74 {dimension_numbers = #tpu.dot_dimension_numbers<[1], [0], [0], [1], [0, 0, 1, 1], [], []>} : vector<8x32xf32>, vector<32x256xf32>, vector<8x256xf32> -> vector<8x256xf32>
    %203 = vector.extract_strided_slice %202 {offsets = [0, 0], sizes = [8, 128], strides = [1, 1]} : vector<8x256xf32> to vector<8x128xf32>
    %204 = vector.extract_strided_slice %202 {offsets = [0, 128], sizes = [8, 128], strides = [1, 1]} : vector<8x256xf32> to vector<8x128xf32>
    %c2 = arith.constant 2 : index
    %c0_75 = arith.constant 0 : index
    %c0_76 = arith.constant 0 : index
    %205 = vector.load %arg12[%c2, %c0_75, %c0_76] : memref<8x8x128xf32, #tpu.memory_space<vmem>>, vector<1x8x128xf32>
    %206 = vector.shape_cast %205 : vector<1x8x128xf32> to vector<8x128xf32>
    %207 = vector.shape_cast %204 : vector<8x128xf32> to vector<1x8x128xf32>
    tpu.vector_store %arg12[%c2, %c0_75, %c0_76], %207 {strides = array<i32>} : memref<8x8x128xf32, #tpu.memory_space<vmem>>, vector<1x8x128xf32>,
    %c40 = arith.constant 40 : index
    %c128_77 = arith.constant 128 : index
    %208 = vector.load %arg11[%c40, %c128_77] : memref<64x256xf32, #tpu.memory_space<vmem>>, vector<8x128xf32>
    %209 = arith.addf %208, %164 : vector<8x128xf32>
    %210 = vector.extract_strided_slice %209 {offsets = [0, 0], sizes = [8, 32], strides = [1, 1]} : vector<8x128xf32> to vector<8x32xf32>
    %cst_78 = arith.constant 5.000000e-01 : f32
    %211 = vector.broadcast %cst_78 : f32 to vector<8x32xf32>
    %212 = arith.mulf %211, %210 : vector<8x32xf32>
    %213 = math.tanh %212 : vector<8x32xf32>
    %cst_79 = arith.constant 5.000000e-01 : f32
    %214 = vector.broadcast %cst_79 : f32 to vector<8x32xf32>
    %215 = arith.mulf %214, %213 : vector<8x32xf32>
    %cst_80 = arith.constant 5.000000e-01 : f32
    %216 = vector.broadcast %cst_80 : f32 to vector<8x32xf32>
    %217 = arith.addf %215, %216 : vector<8x32xf32>
    %218 = vector.extract_strided_slice %209 {offsets = [0, 32], sizes = [8, 32], strides = [1, 1]} : vector<8x128xf32> to vector<8x32xf32>
    %cst_81 = arith.constant 5.000000e-01 : f32
    %219 = vector.broadcast %cst_81 : f32 to vector<8x32xf32>
    %220 = arith.mulf %219, %218 : vector<8x32xf32>
    %221 = math.tanh %220 : vector<8x32xf32>
    %cst_82 = arith.constant 5.000000e-01 : f32
    %222 = vector.broadcast %cst_82 : f32 to vector<8x32xf32>
    %223 = arith.mulf %222, %221 : vector<8x32xf32>
    %cst_83 = arith.constant 5.000000e-01 : f32
    %224 = vector.broadcast %cst_83 : f32 to vector<8x32xf32>
    %225 = arith.addf %223, %224 : vector<8x32xf32>
    %226 = vector.extract_strided_slice %209 {offsets = [0, 64], sizes = [8, 32], strides = [1, 1]} : vector<8x128xf32> to vector<8x32xf32>
    %227 = math.tanh %226 : vector<8x32xf32>
    %228 = vector.extract_strided_slice %209 {offsets = [0, 96], sizes = [8, 32], strides = [1, 1]} : vector<8x128xf32> to vector<8x32xf32>
    %cst_84 = arith.constant 5.000000e-01 : f32
    %229 = vector.broadcast %cst_84 : f32 to vector<8x32xf32>
    %230 = arith.mulf %229, %228 : vector<8x32xf32>
    %231 = math.tanh %230 : vector<8x32xf32>
    %cst_85 = arith.constant 5.000000e-01 : f32
    %232 = vector.broadcast %cst_85 : f32 to vector<8x32xf32>
    %233 = arith.mulf %232, %231 : vector<8x32xf32>
    %cst_86 = arith.constant 5.000000e-01 : f32
    %234 = vector.broadcast %cst_86 : f32 to vector<8x32xf32>
    %235 = arith.addf %233, %234 : vector<8x32xf32>
    %236 = arith.mulf %225, %160 : vector<8x32xf32>
    %237 = arith.mulf %217, %227 : vector<8x32xf32>
    %238 = arith.addf %236, %237 : vector<8x32xf32>
    %239 = math.tanh %238 : vector<8x32xf32>
    %240 = arith.mulf %235, %239 : vector<8x32xf32>
    %cst_87 = arith.constant dense<0.000000e+00> : vector<8x256xf32>
    %241 = tpu.matmul %240, %10, %cst_87 {dimension_numbers = #tpu.dot_dimension_numbers<[1], [0], [0], [1], [0, 0, 1, 1], [], []>} : vector<8x32xf32>, vector<32x256xf32>, vector<8x256xf32> -> vector<8x256xf32>
    %242 = vector.extract_strided_slice %241 {offsets = [0, 0], sizes = [8, 128], strides = [1, 1]} : vector<8x256xf32> to vector<8x128xf32>
    %243 = vector.extract_strided_slice %241 {offsets = [0, 128], sizes = [8, 128], strides = [1, 1]} : vector<8x256xf32> to vector<8x128xf32>
    %c5 = arith.constant 5 : index
    %c0_88 = arith.constant 0 : index
    %c0_89 = arith.constant 0 : index
    %244 = vector.load %arg13[%c5, %c0_88, %c0_89] : memref<8x8x128xf32, #tpu.memory_space<vmem>>, vector<1x8x128xf32>
    %245 = vector.shape_cast %244 : vector<1x8x128xf32> to vector<8x128xf32>
    %246 = vector.shape_cast %243 : vector<8x128xf32> to vector<1x8x128xf32>
    tpu.vector_store %arg13[%c5, %c0_88, %c0_89], %246 {strides = array<i32>} : memref<8x8x128xf32, #tpu.memory_space<vmem>>, vector<1x8x128xf32>,
    %c24 = arith.constant 24 : index
    %c0_90 = arith.constant 0 : index
    %247 = vector.load %arg11[%c24, %c0_90] : memref<64x256xf32, #tpu.memory_space<vmem>>, vector<8x128xf32>
    %248 = arith.addf %247, %203 : vector<8x128xf32>
    %249 = vector.extract_strided_slice %248 {offsets = [0, 0], sizes = [8, 32], strides = [1, 1]} : vector<8x128xf32> to vector<8x32xf32>
    %cst_91 = arith.constant 5.000000e-01 : f32
    %250 = vector.broadcast %cst_91 : f32 to vector<8x32xf32>
    %251 = arith.mulf %250, %249 : vector<8x32xf32>
    %252 = math.tanh %251 : vector<8x32xf32>
    %cst_92 = arith.constant 5.000000e-01 : f32
    %253 = vector.broadcast %cst_92 : f32 to vector<8x32xf32>
    %254 = arith.mulf %253, %252 : vector<8x32xf32>
    %cst_93 = arith.constant 5.000000e-01 : f32
    %255 = vector.broadcast %cst_93 : f32 to vector<8x32xf32>
    %256 = arith.addf %254, %255 : vector<8x32xf32>
    %257 = vector.extract_strided_slice %248 {offsets = [0, 32], sizes = [8, 32], strides = [1, 1]} : vector<8x128xf32> to vector<8x32xf32>
    %cst_94 = arith.constant 5.000000e-01 : f32
    %258 = vector.broadcast %cst_94 : f32 to vector<8x32xf32>
    %259 = arith.mulf %258, %257 : vector<8x32xf32>
    %260 = math.tanh %259 : vector<8x32xf32>
    %cst_95 = arith.constant 5.000000e-01 : f32
    %261 = vector.broadcast %cst_95 : f32 to vector<8x32xf32>
    %262 = arith.mulf %261, %260 : vector<8x32xf32>
    %cst_96 = arith.constant 5.000000e-01 : f32
    %263 = vector.broadcast %cst_96 : f32 to vector<8x32xf32>
    %264 = arith.addf %262, %263 : vector<8x32xf32>
    %265 = vector.extract_strided_slice %248 {offsets = [0, 64], sizes = [8, 32], strides = [1, 1]} : vector<8x128xf32> to vector<8x32xf32>
    %266 = math.tanh %265 : vector<8x32xf32>
    %267 = vector.extract_strided_slice %248 {offsets = [0, 96], sizes = [8, 32], strides = [1, 1]} : vector<8x128xf32> to vector<8x32xf32>
    %cst_97 = arith.constant 5.000000e-01 : f32
    %268 = vector.broadcast %cst_97 : f32 to vector<8x32xf32>
    %269 = arith.mulf %268, %267 : vector<8x32xf32>
    %270 = math.tanh %269 : vector<8x32xf32>
    %cst_98 = arith.constant 5.000000e-01 : f32
    %271 = vector.broadcast %cst_98 : f32 to vector<8x32xf32>
    %272 = arith.mulf %271, %270 : vector<8x32xf32>
    %cst_99 = arith.constant 5.000000e-01 : f32
    %273 = vector.broadcast %cst_99 : f32 to vector<8x32xf32>
    %274 = arith.addf %272, %273 : vector<8x32xf32>
    %275 = arith.mulf %264, %199 : vector<8x32xf32>
    %276 = arith.mulf %256, %266 : vector<8x32xf32>
    %277 = arith.addf %275, %276 : vector<8x32xf32>
    %278 = math.tanh %277 : vector<8x32xf32>
    %279 = arith.mulf %274, %278 : vector<8x32xf32>
    %cst_100 = arith.constant dense<0.000000e+00> : vector<8x256xf32>
    %280 = tpu.matmul %279, %9, %cst_100 {dimension_numbers = #tpu.dot_dimension_numbers<[1], [0], [0], [1], [0, 0, 1, 1], [], []>} : vector<8x32xf32>, vector<32x256xf32>, vector<8x256xf32> -> vector<8x256xf32>
    %281 = vector.extract_strided_slice %280 {offsets = [0, 0], sizes = [8, 128], strides = [1, 1]} : vector<8x256xf32> to vector<8x128xf32>
    %282 = vector.extract_strided_slice %280 {offsets = [0, 128], sizes = [8, 128], strides = [1, 1]} : vector<8x256xf32> to vector<8x128xf32>
    %c3 = arith.constant 3 : index
    %c0_101 = arith.constant 0 : index
    %c0_102 = arith.constant 0 : index
    %283 = vector.load %arg12[%c3, %c0_101, %c0_102] : memref<8x8x128xf32, #tpu.memory_space<vmem>>, vector<1x8x128xf32>
    %284 = vector.shape_cast %283 : vector<1x8x128xf32> to vector<8x128xf32>
    %285 = vector.shape_cast %282 : vector<8x128xf32> to vector<1x8x128xf32>
    tpu.vector_store %arg12[%c3, %c0_101, %c0_102], %285 {strides = array<i32>} : memref<8x8x128xf32, #tpu.memory_space<vmem>>, vector<1x8x128xf32>,
    %c32 = arith.constant 32 : index
    %c128_103 = arith.constant 128 : index
    %286 = vector.load %arg11[%c32, %c128_103] : memref<64x256xf32, #tpu.memory_space<vmem>>, vector<8x128xf32>
    %287 = arith.addf %286, %242 : vector<8x128xf32>
    %288 = vector.extract_strided_slice %287 {offsets = [0, 0], sizes = [8, 32], strides = [1, 1]} : vector<8x128xf32> to vector<8x32xf32>
    %cst_104 = arith.constant 5.000000e-01 : f32
    %289 = vector.broadcast %cst_104 : f32 to vector<8x32xf32>
    %290 = arith.mulf %289, %288 : vector<8x32xf32>
    %291 = math.tanh %290 : vector<8x32xf32>
    %cst_105 = arith.constant 5.000000e-01 : f32
    %292 = vector.broadcast %cst_105 : f32 to vector<8x32xf32>
    %293 = arith.mulf %292, %291 : vector<8x32xf32>
    %cst_106 = arith.constant 5.000000e-01 : f32
    %294 = vector.broadcast %cst_106 : f32 to vector<8x32xf32>
    %295 = arith.addf %293, %294 : vector<8x32xf32>
    %296 = vector.extract_strided_slice %287 {offsets = [0, 32], sizes = [8, 32], strides = [1, 1]} : vector<8x128xf32> to vector<8x32xf32>
    %cst_107 = arith.constant 5.000000e-01 : f32
    %297 = vector.broadcast %cst_107 : f32 to vector<8x32xf32>
    %298 = arith.mulf %297, %296 : vector<8x32xf32>
    %299 = math.tanh %298 : vector<8x32xf32>
    %cst_108 = arith.constant 5.000000e-01 : f32
    %300 = vector.broadcast %cst_108 : f32 to vector<8x32xf32>
    %301 = arith.mulf %300, %299 : vector<8x32xf32>
    %cst_109 = arith.constant 5.000000e-01 : f32
    %302 = vector.broadcast %cst_109 : f32 to vector<8x32xf32>
    %303 = arith.addf %301, %302 : vector<8x32xf32>
    %304 = vector.extract_strided_slice %287 {offsets = [0, 64], sizes = [8, 32], strides = [1, 1]} : vector<8x128xf32> to vector<8x32xf32>
    %305 = math.tanh %304 : vector<8x32xf32>
    %306 = vector.extract_strided_slice %287 {offsets = [0, 96], sizes = [8, 32], strides = [1, 1]} : vector<8x128xf32> to vector<8x32xf32>
    %cst_110 = arith.constant 5.000000e-01 : f32
    %307 = vector.broadcast %cst_110 : f32 to vector<8x32xf32>
    %308 = arith.mulf %307, %306 : vector<8x32xf32>
    %309 = math.tanh %308 : vector<8x32xf32>
    %cst_111 = arith.constant 5.000000e-01 : f32
    %310 = vector.broadcast %cst_111 : f32 to vector<8x32xf32>
    %311 = arith.mulf %310, %309 : vector<8x32xf32>
    %cst_112 = arith.constant 5.000000e-01 : f32
    %312 = vector.broadcast %cst_112 : f32 to vector<8x32xf32>
    %313 = arith.addf %311, %312 : vector<8x32xf32>
    %314 = arith.mulf %303, %238 : vector<8x32xf32>
    %315 = arith.mulf %295, %305 : vector<8x32xf32>
    %316 = arith.addf %314, %315 : vector<8x32xf32>
    %317 = math.tanh %316 : vector<8x32xf32>
    %318 = arith.mulf %313, %317 : vector<8x32xf32>
    %cst_113 = arith.constant dense<0.000000e+00> : vector<8x256xf32>
    %319 = tpu.matmul %318, %10, %cst_113 {dimension_numbers = #tpu.dot_dimension_numbers<[1], [0], [0], [1], [0, 0, 1, 1], [], []>} : vector<8x32xf32>, vector<32x256xf32>, vector<8x256xf32> -> vector<8x256xf32>
    %320 = vector.extract_strided_slice %319 {offsets = [0, 0], sizes = [8, 128], strides = [1, 1]} : vector<8x256xf32> to vector<8x128xf32>
    %321 = vector.extract_strided_slice %319 {offsets = [0, 128], sizes = [8, 128], strides = [1, 1]} : vector<8x256xf32> to vector<8x128xf32>
    %c4 = arith.constant 4 : index
    %c0_114 = arith.constant 0 : index
    %c0_115 = arith.constant 0 : index
    %322 = vector.load %arg13[%c4, %c0_114, %c0_115] : memref<8x8x128xf32, #tpu.memory_space<vmem>>, vector<1x8x128xf32>
    %323 = vector.shape_cast %322 : vector<1x8x128xf32> to vector<8x128xf32>
    %324 = vector.shape_cast %321 : vector<8x128xf32> to vector<1x8x128xf32>
    tpu.vector_store %arg13[%c4, %c0_114, %c0_115], %324 {strides = array<i32>} : memref<8x8x128xf32, #tpu.memory_space<vmem>>, vector<1x8x128xf32>,
    %c32_116 = arith.constant 32 : index
    %c0_117 = arith.constant 0 : index
    %325 = vector.load %arg11[%c32_116, %c0_117] : memref<64x256xf32, #tpu.memory_space<vmem>>, vector<8x128xf32>
    %326 = arith.addf %325, %281 : vector<8x128xf32>
    %327 = vector.extract_strided_slice %326 {offsets = [0, 0], sizes = [8, 32], strides = [1, 1]} : vector<8x128xf32> to vector<8x32xf32>
    %cst_118 = arith.constant 5.000000e-01 : f32
    %328 = vector.broadcast %cst_118 : f32 to vector<8x32xf32>
    %329 = arith.mulf %328, %327 : vector<8x32xf32>
    %330 = math.tanh %329 : vector<8x32xf32>
    %cst_119 = arith.constant 5.000000e-01 : f32
    %331 = vector.broadcast %cst_119 : f32 to vector<8x32xf32>
    %332 = arith.mulf %331, %330 : vector<8x32xf32>
    %cst_120 = arith.constant 5.000000e-01 : f32
    %333 = vector.broadcast %cst_120 : f32 to vector<8x32xf32>
    %334 = arith.addf %332, %333 : vector<8x32xf32>
    %335 = vector.extract_strided_slice %326 {offsets = [0, 32], sizes = [8, 32], strides = [1, 1]} : vector<8x128xf32> to vector<8x32xf32>
    %cst_121 = arith.constant 5.000000e-01 : f32
    %336 = vector.broadcast %cst_121 : f32 to vector<8x32xf32>
    %337 = arith.mulf %336, %335 : vector<8x32xf32>
    %338 = math.tanh %337 : vector<8x32xf32>
    %cst_122 = arith.constant 5.000000e-01 : f32
    %339 = vector.broadcast %cst_122 : f32 to vector<8x32xf32>
    %340 = arith.mulf %339, %338 : vector<8x32xf32>
    %cst_123 = arith.constant 5.000000e-01 : f32
    %341 = vector.broadcast %cst_123 : f32 to vector<8x32xf32>
    %342 = arith.addf %340, %341 : vector<8x32xf32>
    %343 = vector.extract_strided_slice %326 {offsets = [0, 64], sizes = [8, 32], strides = [1, 1]} : vector<8x128xf32> to vector<8x32xf32>
    %344 = math.tanh %343 : vector<8x32xf32>
    %345 = vector.extract_strided_slice %326 {offsets = [0, 96], sizes = [8, 32], strides = [1, 1]} : vector<8x128xf32> to vector<8x32xf32>
    %cst_124 = arith.constant 5.000000e-01 : f32
    %346 = vector.broadcast %cst_124 : f32 to vector<8x32xf32>
    %347 = arith.mulf %346, %345 : vector<8x32xf32>
    %348 = math.tanh %347 : vector<8x32xf32>
    %cst_125 = arith.constant 5.000000e-01 : f32
    %349 = vector.broadcast %cst_125 : f32 to vector<8x32xf32>
    %350 = arith.mulf %349, %348 : vector<8x32xf32>
    %cst_126 = arith.constant 5.000000e-01 : f32
    %351 = vector.broadcast %cst_126 : f32 to vector<8x32xf32>
    %352 = arith.addf %350, %351 : vector<8x32xf32>
    %353 = arith.mulf %342, %277 : vector<8x32xf32>
    %354 = arith.mulf %334, %344 : vector<8x32xf32>
    %355 = arith.addf %353, %354 : vector<8x32xf32>
    %356 = math.tanh %355 : vector<8x32xf32>
    %357 = arith.mulf %352, %356 : vector<8x32xf32>
    %cst_127 = arith.constant dense<0.000000e+00> : vector<8x256xf32>
    %358 = tpu.matmul %357, %9, %cst_127 {dimension_numbers = #tpu.dot_dimension_numbers<[1], [0], [0], [1], [0, 0, 1, 1], [], []>} : vector<8x32xf32>, vector<32x256xf32>, vector<8x256xf32> -> vector<8x256xf32>
    %359 = vector.extract_strided_slice %358 {offsets = [0, 0], sizes = [8, 128], strides = [1, 1]} : vector<8x256xf32> to vector<8x128xf32>
    %360 = vector.extract_strided_slice %358 {offsets = [0, 128], sizes = [8, 128], strides = [1, 1]} : vector<8x256xf32> to vector<8x128xf32>
    %c4_128 = arith.constant 4 : index
    %c0_129 = arith.constant 0 : index
    %c0_130 = arith.constant 0 : index
    %361 = vector.load %arg12[%c4_128, %c0_129, %c0_130] : memref<8x8x128xf32, #tpu.memory_space<vmem>>, vector<1x8x128xf32>
    %362 = vector.shape_cast %361 : vector<1x8x128xf32> to vector<8x128xf32>
    %363 = vector.shape_cast %360 : vector<8x128xf32> to vector<1x8x128xf32>
    tpu.vector_store %arg12[%c4_128, %c0_129, %c0_130], %363 {strides = array<i32>} : memref<8x8x128xf32, #tpu.memory_space<vmem>>, vector<1x8x128xf32>,
    %c24_131 = arith.constant 24 : index
    %c128_132 = arith.constant 128 : index
    %364 = vector.load %arg11[%c24_131, %c128_132] : memref<64x256xf32, #tpu.memory_space<vmem>>, vector<8x128xf32>
    %365 = arith.addf %364, %320 : vector<8x128xf32>
    %366 = vector.extract_strided_slice %365 {offsets = [0, 0], sizes = [8, 32], strides = [1, 1]} : vector<8x128xf32> to vector<8x32xf32>
    %cst_133 = arith.constant 5.000000e-01 : f32
    %367 = vector.broadcast %cst_133 : f32 to vector<8x32xf32>
    %368 = arith.mulf %367, %366 : vector<8x32xf32>
    %369 = math.tanh %368 : vector<8x32xf32>
    %cst_134 = arith.constant 5.000000e-01 : f32
    %370 = vector.broadcast %cst_134 : f32 to vector<8x32xf32>
    %371 = arith.mulf %370, %369 : vector<8x32xf32>
    %cst_135 = arith.constant 5.000000e-01 : f32
    %372 = vector.broadcast %cst_135 : f32 to vector<8x32xf32>
    %373 = arith.addf %371, %372 : vector<8x32xf32>
    %374 = vector.extract_strided_slice %365 {offsets = [0, 32], sizes = [8, 32], strides = [1, 1]} : vector<8x128xf32> to vector<8x32xf32>
    %cst_136 = arith.constant 5.000000e-01 : f32
    %375 = vector.broadcast %cst_136 : f32 to vector<8x32xf32>
    %376 = arith.mulf %375, %374 : vector<8x32xf32>
    %377 = math.tanh %376 : vector<8x32xf32>
    %cst_137 = arith.constant 5.000000e-01 : f32
    %378 = vector.broadcast %cst_137 : f32 to vector<8x32xf32>
    %379 = arith.mulf %378, %377 : vector<8x32xf32>
    %cst_138 = arith.constant 5.000000e-01 : f32
    %380 = vector.broadcast %cst_138 : f32 to vector<8x32xf32>
    %381 = arith.addf %379, %380 : vector<8x32xf32>
    %382 = vector.extract_strided_slice %365 {offsets = [0, 64], sizes = [8, 32], strides = [1, 1]} : vector<8x128xf32> to vector<8x32xf32>
    %383 = math.tanh %382 : vector<8x32xf32>
    %384 = vector.extract_strided_slice %365 {offsets = [0, 96], sizes = [8, 32], strides = [1, 1]} : vector<8x128xf32> to vector<8x32xf32>
    %cst_139 = arith.constant 5.000000e-01 : f32
    %385 = vector.broadcast %cst_139 : f32 to vector<8x32xf32>
    %386 = arith.mulf %385, %384 : vector<8x32xf32>
    %387 = math.tanh %386 : vector<8x32xf32>
    %cst_140 = arith.constant 5.000000e-01 : f32
    %388 = vector.broadcast %cst_140 : f32 to vector<8x32xf32>
    %389 = arith.mulf %388, %387 : vector<8x32xf32>
    %cst_141 = arith.constant 5.000000e-01 : f32
    %390 = vector.broadcast %cst_141 : f32 to vector<8x32xf32>
    %391 = arith.addf %389, %390 : vector<8x32xf32>
    %392 = arith.mulf %381, %316 : vector<8x32xf32>
    %393 = arith.mulf %373, %383 : vector<8x32xf32>
    %394 = arith.addf %392, %393 : vector<8x32xf32>
    %395 = math.tanh %394 : vector<8x32xf32>
    %396 = arith.mulf %391, %395 : vector<8x32xf32>
    %cst_142 = arith.constant dense<0.000000e+00> : vector<8x256xf32>
    %397 = tpu.matmul %396, %10, %cst_142 {dimension_numbers = #tpu.dot_dimension_numbers<[1], [0], [0], [1], [0, 0, 1, 1], [], []>} : vector<8x32xf32>, vector<32x256xf32>, vector<8x256xf32> -> vector<8x256xf32>
    %398 = vector.extract_strided_slice %397 {offsets = [0, 0], sizes = [8, 128], strides = [1, 1]} : vector<8x256xf32> to vector<8x128xf32>
    %399 = vector.extract_strided_slice %397 {offsets = [0, 128], sizes = [8, 128], strides = [1, 1]} : vector<8x256xf32> to vector<8x128xf32>
    %c3_143 = arith.constant 3 : index
    %c0_144 = arith.constant 0 : index
    %c0_145 = arith.constant 0 : index
    %400 = vector.load %arg13[%c3_143, %c0_144, %c0_145] : memref<8x8x128xf32, #tpu.memory_space<vmem>>, vector<1x8x128xf32>
    %401 = vector.shape_cast %400 : vector<1x8x128xf32> to vector<8x128xf32>
    %402 = vector.shape_cast %399 : vector<8x128xf32> to vector<1x8x128xf32>
    tpu.vector_store %arg13[%c3_143, %c0_144, %c0_145], %402 {strides = array<i32>} : memref<8x8x128xf32, #tpu.memory_space<vmem>>, vector<1x8x128xf32>,
    %c40_146 = arith.constant 40 : index
    %c0_147 = arith.constant 0 : index
    %403 = vector.load %arg11[%c40_146, %c0_147] : memref<64x256xf32, #tpu.memory_space<vmem>>, vector<8x128xf32>
    %404 = arith.addf %403, %359 : vector<8x128xf32>
    %405 = vector.extract_strided_slice %404 {offsets = [0, 0], sizes = [8, 32], strides = [1, 1]} : vector<8x128xf32> to vector<8x32xf32>
    %cst_148 = arith.constant 5.000000e-01 : f32
    %406 = vector.broadcast %cst_148 : f32 to vector<8x32xf32>
    %407 = arith.mulf %406, %405 : vector<8x32xf32>
    %408 = math.tanh %407 : vector<8x32xf32>
    %cst_149 = arith.constant 5.000000e-01 : f32
    %409 = vector.broadcast %cst_149 : f32 to vector<8x32xf32>
    %410 = arith.mulf %409, %408 : vector<8x32xf32>
    %cst_150 = arith.constant 5.000000e-01 : f32
    %411 = vector.broadcast %cst_150 : f32 to vector<8x32xf32>
    %412 = arith.addf %410, %411 : vector<8x32xf32>
    %413 = vector.extract_strided_slice %404 {offsets = [0, 32], sizes = [8, 32], strides = [1, 1]} : vector<8x128xf32> to vector<8x32xf32>
    %cst_151 = arith.constant 5.000000e-01 : f32
    %414 = vector.broadcast %cst_151 : f32 to vector<8x32xf32>
    %415 = arith.mulf %414, %413 : vector<8x32xf32>
    %416 = math.tanh %415 : vector<8x32xf32>
    %cst_152 = arith.constant 5.000000e-01 : f32
    %417 = vector.broadcast %cst_152 : f32 to vector<8x32xf32>
    %418 = arith.mulf %417, %416 : vector<8x32xf32>
    %cst_153 = arith.constant 5.000000e-01 : f32
    %419 = vector.broadcast %cst_153 : f32 to vector<8x32xf32>
    %420 = arith.addf %418, %419 : vector<8x32xf32>
    %421 = vector.extract_strided_slice %404 {offsets = [0, 64], sizes = [8, 32], strides = [1, 1]} : vector<8x128xf32> to vector<8x32xf32>
    %422 = math.tanh %421 : vector<8x32xf32>
    %423 = vector.extract_strided_slice %404 {offsets = [0, 96], sizes = [8, 32], strides = [1, 1]} : vector<8x128xf32> to vector<8x32xf32>
    %cst_154 = arith.constant 5.000000e-01 : f32
    %424 = vector.broadcast %cst_154 : f32 to vector<8x32xf32>
    %425 = arith.mulf %424, %423 : vector<8x32xf32>
    %426 = math.tanh %425 : vector<8x32xf32>
    %cst_155 = arith.constant 5.000000e-01 : f32
    %427 = vector.broadcast %cst_155 : f32 to vector<8x32xf32>
    %428 = arith.mulf %427, %426 : vector<8x32xf32>
    %cst_156 = arith.constant 5.000000e-01 : f32
    %429 = vector.broadcast %cst_156 : f32 to vector<8x32xf32>
    %430 = arith.addf %428, %429 : vector<8x32xf32>
    %431 = arith.mulf %420, %355 : vector<8x32xf32>
    %432 = arith.mulf %412, %422 : vector<8x32xf32>
    %433 = arith.addf %431, %432 : vector<8x32xf32>
    %434 = math.tanh %433 : vector<8x32xf32>
    %435 = arith.mulf %430, %434 : vector<8x32xf32>
    %cst_157 = arith.constant dense<0.000000e+00> : vector<8x256xf32>
    %436 = tpu.matmul %435, %9, %cst_157 {dimension_numbers = #tpu.dot_dimension_numbers<[1], [0], [0], [1], [0, 0, 1, 1], [], []>} : vector<8x32xf32>, vector<32x256xf32>, vector<8x256xf32> -> vector<8x256xf32>
    %437 = vector.extract_strided_slice %436 {offsets = [0, 0], sizes = [8, 128], strides = [1, 1]} : vector<8x256xf32> to vector<8x128xf32>
    %438 = vector.extract_strided_slice %436 {offsets = [0, 128], sizes = [8, 128], strides = [1, 1]} : vector<8x256xf32> to vector<8x128xf32>
    %c5_158 = arith.constant 5 : index
    %c0_159 = arith.constant 0 : index
    %c0_160 = arith.constant 0 : index
    %439 = vector.load %arg12[%c5_158, %c0_159, %c0_160] : memref<8x8x128xf32, #tpu.memory_space<vmem>>, vector<1x8x128xf32>
    %440 = vector.shape_cast %439 : vector<1x8x128xf32> to vector<8x128xf32>
    %441 = vector.shape_cast %438 : vector<8x128xf32> to vector<1x8x128xf32>
    tpu.vector_store %arg12[%c5_158, %c0_159, %c0_160], %441 {strides = array<i32>} : memref<8x8x128xf32, #tpu.memory_space<vmem>>, vector<1x8x128xf32>,
    %c16_161 = arith.constant 16 : index
    %c128_162 = arith.constant 128 : index
    %442 = vector.load %arg11[%c16_161, %c128_162] : memref<64x256xf32, #tpu.memory_space<vmem>>, vector<8x128xf32>
    %443 = arith.addf %442, %398 : vector<8x128xf32>
    %444 = vector.extract_strided_slice %443 {offsets = [0, 0], sizes = [8, 32], strides = [1, 1]} : vector<8x128xf32> to vector<8x32xf32>
    %cst_163 = arith.constant 5.000000e-01 : f32
    %445 = vector.broadcast %cst_163 : f32 to vector<8x32xf32>
    %446 = arith.mulf %445, %444 : vector<8x32xf32>
    %447 = math.tanh %446 : vector<8x32xf32>
    %cst_164 = arith.constant 5.000000e-01 : f32
    %448 = vector.broadcast %cst_164 : f32 to vector<8x32xf32>
    %449 = arith.mulf %448, %447 : vector<8x32xf32>
    %cst_165 = arith.constant 5.000000e-01 : f32
    %450 = vector.broadcast %cst_165 : f32 to vector<8x32xf32>
    %451 = arith.addf %449, %450 : vector<8x32xf32>
    %452 = vector.extract_strided_slice %443 {offsets = [0, 32], sizes = [8, 32], strides = [1, 1]} : vector<8x128xf32> to vector<8x32xf32>
    %cst_166 = arith.constant 5.000000e-01 : f32
    %453 = vector.broadcast %cst_166 : f32 to vector<8x32xf32>
    %454 = arith.mulf %453, %452 : vector<8x32xf32>
    %455 = math.tanh %454 : vector<8x32xf32>
    %cst_167 = arith.constant 5.000000e-01 : f32
    %456 = vector.broadcast %cst_167 : f32 to vector<8x32xf32>
    %457 = arith.mulf %456, %455 : vector<8x32xf32>
    %cst_168 = arith.constant 5.000000e-01 : f32
    %458 = vector.broadcast %cst_168 : f32 to vector<8x32xf32>
    %459 = arith.addf %457, %458 : vector<8x32xf32>
    %460 = vector.extract_strided_slice %443 {offsets = [0, 64], sizes = [8, 32], strides = [1, 1]} : vector<8x128xf32> to vector<8x32xf32>
    %461 = math.tanh %460 : vector<8x32xf32>
    %462 = vector.extract_strided_slice %443 {offsets = [0, 96], sizes = [8, 32], strides = [1, 1]} : vector<8x128xf32> to vector<8x32xf32>
    %cst_169 = arith.constant 5.000000e-01 : f32
    %463 = vector.broadcast %cst_169 : f32 to vector<8x32xf32>
    %464 = arith.mulf %463, %462 : vector<8x32xf32>
    %465 = math.tanh %464 : vector<8x32xf32>
    %cst_170 = arith.constant 5.000000e-01 : f32
    %466 = vector.broadcast %cst_170 : f32 to vector<8x32xf32>
    %467 = arith.mulf %466, %465 : vector<8x32xf32>
    %cst_171 = arith.constant 5.000000e-01 : f32
    %468 = vector.broadcast %cst_171 : f32 to vector<8x32xf32>
    %469 = arith.addf %467, %468 : vector<8x32xf32>
    %470 = arith.mulf %459, %394 : vector<8x32xf32>
    %471 = arith.mulf %451, %461 : vector<8x32xf32>
    %472 = arith.addf %470, %471 : vector<8x32xf32>
    %473 = math.tanh %472 : vector<8x32xf32>
    %474 = arith.mulf %469, %473 : vector<8x32xf32>
    %cst_172 = arith.constant dense<0.000000e+00> : vector<8x256xf32>
    %475 = tpu.matmul %474, %10, %cst_172 {dimension_numbers = #tpu.dot_dimension_numbers<[1], [0], [0], [1], [0, 0, 1, 1], [], []>} : vector<8x32xf32>, vector<32x256xf32>, vector<8x256xf32> -> vector<8x256xf32>
    %476 = vector.extract_strided_slice %475 {offsets = [0, 0], sizes = [8, 128], strides = [1, 1]} : vector<8x256xf32> to vector<8x128xf32>
    %477 = vector.extract_strided_slice %475 {offsets = [0, 128], sizes = [8, 128], strides = [1, 1]} : vector<8x256xf32> to vector<8x128xf32>
    %c2_173 = arith.constant 2 : index
    %c0_174 = arith.constant 0 : index
    %c0_175 = arith.constant 0 : index
    %478 = vector.load %arg13[%c2_173, %c0_174, %c0_175] : memref<8x8x128xf32, #tpu.memory_space<vmem>>, vector<1x8x128xf32>
    %479 = vector.shape_cast %478 : vector<1x8x128xf32> to vector<8x128xf32>
    %480 = vector.shape_cast %477 : vector<8x128xf32> to vector<1x8x128xf32>
    tpu.vector_store %arg13[%c2_173, %c0_174, %c0_175], %480 {strides = array<i32>} : memref<8x8x128xf32, #tpu.memory_space<vmem>>, vector<1x8x128xf32>,
    %c48_176 = arith.constant 48 : index
    %c0_177 = arith.constant 0 : index
    %481 = vector.load %arg11[%c48_176, %c0_177] : memref<64x256xf32, #tpu.memory_space<vmem>>, vector<8x128xf32>
    %482 = arith.addf %481, %437 : vector<8x128xf32>
    %483 = vector.extract_strided_slice %482 {offsets = [0, 0], sizes = [8, 32], strides = [1, 1]} : vector<8x128xf32> to vector<8x32xf32>
    %cst_178 = arith.constant 5.000000e-01 : f32
    %484 = vector.broadcast %cst_178 : f32 to vector<8x32xf32>
    %485 = arith.mulf %484, %483 : vector<8x32xf32>
    %486 = math.tanh %485 : vector<8x32xf32>
    %cst_179 = arith.constant 5.000000e-01 : f32
    %487 = vector.broadcast %cst_179 : f32 to vector<8x32xf32>
    %488 = arith.mulf %487, %486 : vector<8x32xf32>
    %cst_180 = arith.constant 5.000000e-01 : f32
    %489 = vector.broadcast %cst_180 : f32 to vector<8x32xf32>
    %490 = arith.addf %488, %489 : vector<8x32xf32>
    %491 = vector.extract_strided_slice %482 {offsets = [0, 32], sizes = [8, 32], strides = [1, 1]} : vector<8x128xf32> to vector<8x32xf32>
    %cst_181 = arith.constant 5.000000e-01 : f32
    %492 = vector.broadcast %cst_181 : f32 to vector<8x32xf32>
    %493 = arith.mulf %492, %491 : vector<8x32xf32>
    %494 = math.tanh %493 : vector<8x32xf32>
    %cst_182 = arith.constant 5.000000e-01 : f32
    %495 = vector.broadcast %cst_182 : f32 to vector<8x32xf32>
    %496 = arith.mulf %495, %494 : vector<8x32xf32>
    %cst_183 = arith.constant 5.000000e-01 : f32
    %497 = vector.broadcast %cst_183 : f32 to vector<8x32xf32>
    %498 = arith.addf %496, %497 : vector<8x32xf32>
    %499 = vector.extract_strided_slice %482 {offsets = [0, 64], sizes = [8, 32], strides = [1, 1]} : vector<8x128xf32> to vector<8x32xf32>
    %500 = math.tanh %499 : vector<8x32xf32>
    %501 = vector.extract_strided_slice %482 {offsets = [0, 96], sizes = [8, 32], strides = [1, 1]} : vector<8x128xf32> to vector<8x32xf32>
    %cst_184 = arith.constant 5.000000e-01 : f32
    %502 = vector.broadcast %cst_184 : f32 to vector<8x32xf32>
    %503 = arith.mulf %502, %501 : vector<8x32xf32>
    %504 = math.tanh %503 : vector<8x32xf32>
    %cst_185 = arith.constant 5.000000e-01 : f32
    %505 = vector.broadcast %cst_185 : f32 to vector<8x32xf32>
    %506 = arith.mulf %505, %504 : vector<8x32xf32>
    %cst_186 = arith.constant 5.000000e-01 : f32
    %507 = vector.broadcast %cst_186 : f32 to vector<8x32xf32>
    %508 = arith.addf %506, %507 : vector<8x32xf32>
    %509 = arith.mulf %498, %433 : vector<8x32xf32>
    %510 = arith.mulf %490, %500 : vector<8x32xf32>
    %511 = arith.addf %509, %510 : vector<8x32xf32>
    %512 = math.tanh %511 : vector<8x32xf32>
    %513 = arith.mulf %508, %512 : vector<8x32xf32>
    %cst_187 = arith.constant dense<0.000000e+00> : vector<8x256xf32>
    %514 = tpu.matmul %513, %9, %cst_187 {dimension_numbers = #tpu.dot_dimension_numbers<[1], [0], [0], [1], [0, 0, 1, 1], [], []>} : vector<8x32xf32>, vector<32x256xf32>, vector<8x256xf32> -> vector<8x256xf32>
    %515 = vector.extract_strided_slice %514 {offsets = [0, 0], sizes = [8, 128], strides = [1, 1]} : vector<8x256xf32> to vector<8x128xf32>
    %516 = vector.extract_strided_slice %514 {offsets = [0, 128], sizes = [8, 128], strides = [1, 1]} : vector<8x256xf32> to vector<8x128xf32>
    %c6_188 = arith.constant 6 : index
    %c0_189 = arith.constant 0 : index
    %c0_190 = arith.constant 0 : index
    %517 = vector.load %arg12[%c6_188, %c0_189, %c0_190] : memref<8x8x128xf32, #tpu.memory_space<vmem>>, vector<1x8x128xf32>
    %518 = vector.shape_cast %517 : vector<1x8x128xf32> to vector<8x128xf32>
    %519 = vector.shape_cast %516 : vector<8x128xf32> to vector<1x8x128xf32>
    tpu.vector_store %arg12[%c6_188, %c0_189, %c0_190], %519 {strides = array<i32>} : memref<8x8x128xf32, #tpu.memory_space<vmem>>, vector<1x8x128xf32>,
    %c8_191 = arith.constant 8 : index
    %c128_192 = arith.constant 128 : index
    %520 = vector.load %arg11[%c8_191, %c128_192] : memref<64x256xf32, #tpu.memory_space<vmem>>, vector<8x128xf32>
    %521 = arith.addf %520, %476 : vector<8x128xf32>
    %522 = vector.extract_strided_slice %521 {offsets = [0, 0], sizes = [8, 32], strides = [1, 1]} : vector<8x128xf32> to vector<8x32xf32>
    %cst_193 = arith.constant 5.000000e-01 : f32
    %523 = vector.broadcast %cst_193 : f32 to vector<8x32xf32>
    %524 = arith.mulf %523, %522 : vector<8x32xf32>
    %525 = math.tanh %524 : vector<8x32xf32>
    %cst_194 = arith.constant 5.000000e-01 : f32
    %526 = vector.broadcast %cst_194 : f32 to vector<8x32xf32>
    %527 = arith.mulf %526, %525 : vector<8x32xf32>
    %cst_195 = arith.constant 5.000000e-01 : f32
    %528 = vector.broadcast %cst_195 : f32 to vector<8x32xf32>
    %529 = arith.addf %527, %528 : vector<8x32xf32>
    %530 = vector.extract_strided_slice %521 {offsets = [0, 32], sizes = [8, 32], strides = [1, 1]} : vector<8x128xf32> to vector<8x32xf32>
    %cst_196 = arith.constant 5.000000e-01 : f32
    %531 = vector.broadcast %cst_196 : f32 to vector<8x32xf32>
    %532 = arith.mulf %531, %530 : vector<8x32xf32>
    %533 = math.tanh %532 : vector<8x32xf32>
    %cst_197 = arith.constant 5.000000e-01 : f32
    %534 = vector.broadcast %cst_197 : f32 to vector<8x32xf32>
    %535 = arith.mulf %534, %533 : vector<8x32xf32>
    %cst_198 = arith.constant 5.000000e-01 : f32
    %536 = vector.broadcast %cst_198 : f32 to vector<8x32xf32>
    %537 = arith.addf %535, %536 : vector<8x32xf32>
    %538 = vector.extract_strided_slice %521 {offsets = [0, 64], sizes = [8, 32], strides = [1, 1]} : vector<8x128xf32> to vector<8x32xf32>
    %539 = math.tanh %538 : vector<8x32xf32>
    %540 = vector.extract_strided_slice %521 {offsets = [0, 96], sizes = [8, 32], strides = [1, 1]} : vector<8x128xf32> to vector<8x32xf32>
    %cst_199 = arith.constant 5.000000e-01 : f32
    %541 = vector.broadcast %cst_199 : f32 to vector<8x32xf32>
    %542 = arith.mulf %541, %540 : vector<8x32xf32>
    %543 = math.tanh %542 : vector<8x32xf32>
    %cst_200 = arith.constant 5.000000e-01 : f32
    %544 = vector.broadcast %cst_200 : f32 to vector<8x32xf32>
    %545 = arith.mulf %544, %543 : vector<8x32xf32>
    %cst_201 = arith.constant 5.000000e-01 : f32
    %546 = vector.broadcast %cst_201 : f32 to vector<8x32xf32>
    %547 = arith.addf %545, %546 : vector<8x32xf32>
    %548 = arith.mulf %537, %472 : vector<8x32xf32>
    %549 = arith.mulf %529, %539 : vector<8x32xf32>
    %550 = arith.addf %548, %549 : vector<8x32xf32>
    %551 = math.tanh %550 : vector<8x32xf32>
    %552 = arith.mulf %547, %551 : vector<8x32xf32>
    %cst_202 = arith.constant dense<0.000000e+00> : vector<8x256xf32>
    %553 = tpu.matmul %552, %10, %cst_202 {dimension_numbers = #tpu.dot_dimension_numbers<[1], [0], [0], [1], [0, 0, 1, 1], [], []>} : vector<8x32xf32>, vector<32x256xf32>, vector<8x256xf32> -> vector<8x256xf32>
    %554 = vector.extract_strided_slice %553 {offsets = [0, 0], sizes = [8, 128], strides = [1, 1]} : vector<8x256xf32> to vector<8x128xf32>
    %555 = vector.extract_strided_slice %553 {offsets = [0, 128], sizes = [8, 128], strides = [1, 1]} : vector<8x256xf32> to vector<8x128xf32>
    %c1_203 = arith.constant 1 : index
    %c0_204 = arith.constant 0 : index
    %c0_205 = arith.constant 0 : index
    %556 = vector.load %arg13[%c1_203, %c0_204, %c0_205] : memref<8x8x128xf32, #tpu.memory_space<vmem>>, vector<1x8x128xf32>
    %557 = vector.shape_cast %556 : vector<1x8x128xf32> to vector<8x128xf32>
    %558 = vector.shape_cast %555 : vector<8x128xf32> to vector<1x8x128xf32>
    tpu.vector_store %arg13[%c1_203, %c0_204, %c0_205], %558 {strides = array<i32>} : memref<8x8x128xf32, #tpu.memory_space<vmem>>, vector<1x8x128xf32>,
    %c56_206 = arith.constant 56 : index
    %c0_207 = arith.constant 0 : index
    %559 = vector.load %arg11[%c56_206, %c0_207] : memref<64x256xf32, #tpu.memory_space<vmem>>, vector<8x128xf32>
    %560 = arith.addf %559, %515 : vector<8x128xf32>
    %561 = vector.extract_strided_slice %560 {offsets = [0, 0], sizes = [8, 32], strides = [1, 1]} : vector<8x128xf32> to vector<8x32xf32>
    %cst_208 = arith.constant 5.000000e-01 : f32
    %562 = vector.broadcast %cst_208 : f32 to vector<8x32xf32>
    %563 = arith.mulf %562, %561 : vector<8x32xf32>
    %564 = math.tanh %563 : vector<8x32xf32>
    %cst_209 = arith.constant 5.000000e-01 : f32
    %565 = vector.broadcast %cst_209 : f32 to vector<8x32xf32>
    %566 = arith.mulf %565, %564 : vector<8x32xf32>
    %cst_210 = arith.constant 5.000000e-01 : f32
    %567 = vector.broadcast %cst_210 : f32 to vector<8x32xf32>
    %568 = arith.addf %566, %567 : vector<8x32xf32>
    %569 = vector.extract_strided_slice %560 {offsets = [0, 32], sizes = [8, 32], strides = [1, 1]} : vector<8x128xf32> to vector<8x32xf32>
    %cst_211 = arith.constant 5.000000e-01 : f32
    %570 = vector.broadcast %cst_211 : f32 to vector<8x32xf32>
    %571 = arith.mulf %570, %569 : vector<8x32xf32>
    %572 = math.tanh %571 : vector<8x32xf32>
    %cst_212 = arith.constant 5.000000e-01 : f32
    %573 = vector.broadcast %cst_212 : f32 to vector<8x32xf32>
    %574 = arith.mulf %573, %572 : vector<8x32xf32>
    %cst_213 = arith.constant 5.000000e-01 : f32
    %575 = vector.broadcast %cst_213 : f32 to vector<8x32xf32>
    %576 = arith.addf %574, %575 : vector<8x32xf32>
    %577 = vector.extract_strided_slice %560 {offsets = [0, 64], sizes = [8, 32], strides = [1, 1]} : vector<8x128xf32> to vector<8x32xf32>
    %578 = math.tanh %577 : vector<8x32xf32>
    %579 = vector.extract_strided_slice %560 {offsets = [0, 96], sizes = [8, 32], strides = [1, 1]} : vector<8x128xf32> to vector<8x32xf32>
    %cst_214 = arith.constant 5.000000e-01 : f32
    %580 = vector.broadcast %cst_214 : f32 to vector<8x32xf32>
    %581 = arith.mulf %580, %579 : vector<8x32xf32>
    %582 = math.tanh %581 : vector<8x32xf32>
    %cst_215 = arith.constant 5.000000e-01 : f32
    %583 = vector.broadcast %cst_215 : f32 to vector<8x32xf32>
    %584 = arith.mulf %583, %582 : vector<8x32xf32>
    %cst_216 = arith.constant 5.000000e-01 : f32
    %585 = vector.broadcast %cst_216 : f32 to vector<8x32xf32>
    %586 = arith.addf %584, %585 : vector<8x32xf32>
    %587 = arith.mulf %576, %511 : vector<8x32xf32>
    %588 = arith.mulf %568, %578 : vector<8x32xf32>
    %589 = arith.addf %587, %588 : vector<8x32xf32>
    %590 = math.tanh %589 : vector<8x32xf32>
    %591 = arith.mulf %586, %590 : vector<8x32xf32>
    %cst_217 = arith.constant dense<0.000000e+00> : vector<8x256xf32>
    %592 = tpu.matmul %591, %9, %cst_217 {dimension_numbers = #tpu.dot_dimension_numbers<[1], [0], [0], [1], [0, 0, 1, 1], [], []>} : vector<8x32xf32>, vector<32x256xf32>, vector<8x256xf32> -> vector<8x256xf32>
    %593 = vector.extract_strided_slice %592 {offsets = [0, 128], sizes = [8, 128], strides = [1, 1]} : vector<8x256xf32> to vector<8x128xf32>
    %c7_218 = arith.constant 7 : index
    %c0_219 = arith.constant 0 : index
    %c0_220 = arith.constant 0 : index
    %594 = vector.load %arg12[%c7_218, %c0_219, %c0_220] : memref<8x8x128xf32, #tpu.memory_space<vmem>>, vector<1x8x128xf32>
    %595 = vector.shape_cast %594 : vector<1x8x128xf32> to vector<8x128xf32>
    %596 = vector.shape_cast %593 : vector<8x128xf32> to vector<1x8x128xf32>
    tpu.vector_store %arg12[%c7_218, %c0_219, %c0_220], %596 {strides = array<i32>} : memref<8x8x128xf32, #tpu.memory_space<vmem>>, vector<1x8x128xf32>,
    %c0_221 = arith.constant 0 : index
    %c128_222 = arith.constant 128 : index
    %597 = vector.load %arg11[%c0_221, %c128_222] : memref<64x256xf32, #tpu.memory_space<vmem>>, vector<8x128xf32>
    %598 = arith.addf %597, %554 : vector<8x128xf32>
    %599 = vector.extract_strided_slice %598 {offsets = [0, 0], sizes = [8, 32], strides = [1, 1]} : vector<8x128xf32> to vector<8x32xf32>
    %cst_223 = arith.constant 5.000000e-01 : f32
    %600 = vector.broadcast %cst_223 : f32 to vector<8x32xf32>
    %601 = arith.mulf %600, %599 : vector<8x32xf32>
    %602 = math.tanh %601 : vector<8x32xf32>
    %cst_224 = arith.constant 5.000000e-01 : f32
    %603 = vector.broadcast %cst_224 : f32 to vector<8x32xf32>
    %604 = arith.mulf %603, %602 : vector<8x32xf32>
    %cst_225 = arith.constant 5.000000e-01 : f32
    %605 = vector.broadcast %cst_225 : f32 to vector<8x32xf32>
    %606 = arith.addf %604, %605 : vector<8x32xf32>
    %607 = vector.extract_strided_slice %598 {offsets = [0, 32], sizes = [8, 32], strides = [1, 1]} : vector<8x128xf32> to vector<8x32xf32>
    %cst_226 = arith.constant 5.000000e-01 : f32
    %608 = vector.broadcast %cst_226 : f32 to vector<8x32xf32>
    %609 = arith.mulf %608, %607 : vector<8x32xf32>
    %610 = math.tanh %609 : vector<8x32xf32>
    %cst_227 = arith.constant 5.000000e-01 : f32
    %611 = vector.broadcast %cst_227 : f32 to vector<8x32xf32>
    %612 = arith.mulf %611, %610 : vector<8x32xf32>
    %cst_228 = arith.constant 5.000000e-01 : f32
    %613 = vector.broadcast %cst_228 : f32 to vector<8x32xf32>
    %614 = arith.addf %612, %613 : vector<8x32xf32>
    %615 = vector.extract_strided_slice %598 {offsets = [0, 64], sizes = [8, 32], strides = [1, 1]} : vector<8x128xf32> to vector<8x32xf32>
    %616 = math.tanh %615 : vector<8x32xf32>
    %617 = vector.extract_strided_slice %598 {offsets = [0, 96], sizes = [8, 32], strides = [1, 1]} : vector<8x128xf32> to vector<8x32xf32>
    %cst_229 = arith.constant 5.000000e-01 : f32
    %618 = vector.broadcast %cst_229 : f32 to vector<8x32xf32>
    %619 = arith.mulf %618, %617 : vector<8x32xf32>
    %620 = math.tanh %619 : vector<8x32xf32>
    %cst_230 = arith.constant 5.000000e-01 : f32
    %621 = vector.broadcast %cst_230 : f32 to vector<8x32xf32>
    %622 = arith.mulf %621, %620 : vector<8x32xf32>
    %cst_231 = arith.constant 5.000000e-01 : f32
    %623 = vector.broadcast %cst_231 : f32 to vector<8x32xf32>
    %624 = arith.addf %622, %623 : vector<8x32xf32>
    %625 = arith.mulf %614, %550 : vector<8x32xf32>
    %626 = arith.mulf %606, %616 : vector<8x32xf32>
    %627 = arith.addf %625, %626 : vector<8x32xf32>
    %628 = math.tanh %627 : vector<8x32xf32>
    %629 = arith.mulf %624, %628 : vector<8x32xf32>
    %cst_232 = arith.constant dense<0.000000e+00> : vector<8x256xf32>
    %630 = tpu.matmul %629, %10, %cst_232 {dimension_numbers = #tpu.dot_dimension_numbers<[1], [0], [0], [1], [0, 0, 1, 1], [], []>} : vector<8x32xf32>, vector<32x256xf32>, vector<8x256xf32> -> vector<8x256xf32>
    %631 = vector.extract_strided_slice %630 {offsets = [0, 128], sizes = [8, 128], strides = [1, 1]} : vector<8x256xf32> to vector<8x128xf32>
    %c0_233 = arith.constant 0 : index
    %c0_234 = arith.constant 0 : index
    %c0_235 = arith.constant 0 : index
    %632 = vector.load %arg13[%c0_233, %c0_234, %c0_235] : memref<8x8x128xf32, #tpu.memory_space<vmem>>, vector<1x8x128xf32>
    %633 = vector.shape_cast %632 : vector<1x8x128xf32> to vector<8x128xf32>
    %634 = vector.shape_cast %631 : vector<8x128xf32> to vector<1x8x128xf32>
    tpu.vector_store %arg13[%c0_233, %c0_234, %c0_235], %634 {strides = array<i32>} : memref<8x8x128xf32, #tpu.memory_space<vmem>>, vector<1x8x128xf32>,
    %c0_236 = arith.constant 0 : index
    %c0_237 = arith.constant 0 : index
    %635 = vector.load %arg4[%c0_236, %c0_237] : memref<32x128xf32, #tpu.memory_space<vmem>>, vector<32x128xf32>
    %c0_238 = arith.constant 0 : index
    %c0_239 = arith.constant 0 : index
    %636 = vector.load %arg5[%c0_238, %c0_239] : memref<1x128xf32, #tpu.memory_space<vmem>>, vector<1x128xf32>
    %c7_240 = arith.constant 7 : index
    %c0_241 = arith.constant 0 : index
    %c0_242 = arith.constant 0 : index
    %637 = vector.load %arg12[%c7_240, %c0_241, %c0_242] : memref<8x8x128xf32, #tpu.memory_space<vmem>>, vector<1x8x128xf32>
    %638 = vector.shape_cast %637 : vector<1x8x128xf32> to vector<8x128xf32>
    %c7_243 = arith.constant 7 : index
    %c0_244 = arith.constant 0 : index
    %c0_245 = arith.constant 0 : index
    %639 = vector.load %arg13[%c7_243, %c0_244, %c0_245] : memref<8x8x128xf32, #tpu.memory_space<vmem>>, vector<1x8x128xf32>
    %640 = vector.shape_cast %639 : vector<1x8x128xf32> to vector<8x128xf32>
    %641 = arith.addf %638, %640 : vector<8x128xf32>
    %642 = vector.broadcast %636 : vector<1x128xf32> to vector<8x128xf32>
    %643 = arith.addf %641, %642 : vector<8x128xf32>
    %cst_246 = arith.constant dense<0.000000e+00> : vector<8x128xf32>
    %644 = tpu.matmul %11, %635, %cst_246 {dimension_numbers = #tpu.dot_dimension_numbers<[1], [0], [0], [1], [0, 0, 1, 1], [], []>} : vector<8x32xf32>, vector<32x128xf32>, vector<8x128xf32> -> vector<8x128xf32>
    %645 = arith.addf %643, %644 : vector<8x128xf32>
    %646 = vector.extract_strided_slice %645 {offsets = [0, 0], sizes = [8, 32], strides = [1, 1]} : vector<8x128xf32> to vector<8x32xf32>
    %cst_247 = arith.constant 5.000000e-01 : f32
    %647 = vector.broadcast %cst_247 : f32 to vector<8x32xf32>
    %648 = arith.mulf %647, %646 : vector<8x32xf32>
    %649 = math.tanh %648 : vector<8x32xf32>
    %cst_248 = arith.constant 5.000000e-01 : f32
    %650 = vector.broadcast %cst_248 : f32 to vector<8x32xf32>
    %651 = arith.mulf %650, %649 : vector<8x32xf32>
    %cst_249 = arith.constant 5.000000e-01 : f32
    %652 = vector.broadcast %cst_249 : f32 to vector<8x32xf32>
    %653 = arith.addf %651, %652 : vector<8x32xf32>
    %654 = vector.extract_strided_slice %645 {offsets = [0, 32], sizes = [8, 32], strides = [1, 1]} : vector<8x128xf32> to vector<8x32xf32>
    %cst_250 = arith.constant 5.000000e-01 : f32
    %655 = vector.broadcast %cst_250 : f32 to vector<8x32xf32>
    %656 = arith.mulf %655, %654 : vector<8x32xf32>
    %657 = math.tanh %656 : vector<8x32xf32>
    %cst_251 = arith.constant 5.000000e-01 : f32
    %658 = vector.broadcast %cst_251 : f32 to vector<8x32xf32>
    %659 = arith.mulf %658, %657 : vector<8x32xf32>
    %cst_252 = arith.constant 5.000000e-01 : f32
    %660 = vector.broadcast %cst_252 : f32 to vector<8x32xf32>
    %661 = arith.addf %659, %660 : vector<8x32xf32>
    %662 = vector.extract_strided_slice %645 {offsets = [0, 64], sizes = [8, 32], strides = [1, 1]} : vector<8x128xf32> to vector<8x32xf32>
    %663 = math.tanh %662 : vector<8x32xf32>
    %664 = vector.extract_strided_slice %645 {offsets = [0, 96], sizes = [8, 32], strides = [1, 1]} : vector<8x128xf32> to vector<8x32xf32>
    %cst_253 = arith.constant 5.000000e-01 : f32
    %665 = vector.broadcast %cst_253 : f32 to vector<8x32xf32>
    %666 = arith.mulf %665, %664 : vector<8x32xf32>
    %667 = math.tanh %666 : vector<8x32xf32>
    %cst_254 = arith.constant 5.000000e-01 : f32
    %668 = vector.broadcast %cst_254 : f32 to vector<8x32xf32>
    %669 = arith.mulf %668, %667 : vector<8x32xf32>
    %cst_255 = arith.constant 5.000000e-01 : f32
    %670 = vector.broadcast %cst_255 : f32 to vector<8x32xf32>
    %671 = arith.addf %669, %670 : vector<8x32xf32>
    %672 = arith.mulf %661, %11 : vector<8x32xf32>
    %673 = arith.mulf %653, %663 : vector<8x32xf32>
    %674 = arith.addf %672, %673 : vector<8x32xf32>
    %675 = math.tanh %674 : vector<8x32xf32>
    %676 = arith.mulf %671, %675 : vector<8x32xf32>
    %c6_256 = arith.constant 6 : index
    %c0_257 = arith.constant 0 : index
    %c0_258 = arith.constant 0 : index
    %677 = vector.load %arg12[%c6_256, %c0_257, %c0_258] : memref<8x8x128xf32, #tpu.memory_space<vmem>>, vector<1x8x128xf32>
    %678 = vector.shape_cast %677 : vector<1x8x128xf32> to vector<8x128xf32>
    %c6_259 = arith.constant 6 : index
    %c0_260 = arith.constant 0 : index
    %c0_261 = arith.constant 0 : index
    %679 = vector.load %arg13[%c6_259, %c0_260, %c0_261] : memref<8x8x128xf32, #tpu.memory_space<vmem>>, vector<1x8x128xf32>
    %680 = vector.shape_cast %679 : vector<1x8x128xf32> to vector<8x128xf32>
    %681 = arith.addf %678, %680 : vector<8x128xf32>
    %682 = vector.broadcast %636 : vector<1x128xf32> to vector<8x128xf32>
    %683 = arith.addf %681, %682 : vector<8x128xf32>
    %cst_262 = arith.constant dense<0.000000e+00> : vector<8x128xf32>
    %684 = tpu.matmul %676, %635, %cst_262 {dimension_numbers = #tpu.dot_dimension_numbers<[1], [0], [0], [1], [0, 0, 1, 1], [], []>} : vector<8x32xf32>, vector<32x128xf32>, vector<8x128xf32> -> vector<8x128xf32>
    %685 = arith.addf %683, %684 : vector<8x128xf32>
    %686 = vector.extract_strided_slice %685 {offsets = [0, 0], sizes = [8, 32], strides = [1, 1]} : vector<8x128xf32> to vector<8x32xf32>
    %cst_263 = arith.constant 5.000000e-01 : f32
    %687 = vector.broadcast %cst_263 : f32 to vector<8x32xf32>
    %688 = arith.mulf %687, %686 : vector<8x32xf32>
    %689 = math.tanh %688 : vector<8x32xf32>
    %cst_264 = arith.constant 5.000000e-01 : f32
    %690 = vector.broadcast %cst_264 : f32 to vector<8x32xf32>
    %691 = arith.mulf %690, %689 : vector<8x32xf32>
    %cst_265 = arith.constant 5.000000e-01 : f32
    %692 = vector.broadcast %cst_265 : f32 to vector<8x32xf32>
    %693 = arith.addf %691, %692 : vector<8x32xf32>
    %694 = vector.extract_strided_slice %685 {offsets = [0, 32], sizes = [8, 32], strides = [1, 1]} : vector<8x128xf32> to vector<8x32xf32>
    %cst_266 = arith.constant 5.000000e-01 : f32
    %695 = vector.broadcast %cst_266 : f32 to vector<8x32xf32>
    %696 = arith.mulf %695, %694 : vector<8x32xf32>
    %697 = math.tanh %696 : vector<8x32xf32>
    %cst_267 = arith.constant 5.000000e-01 : f32
    %698 = vector.broadcast %cst_267 : f32 to vector<8x32xf32>
    %699 = arith.mulf %698, %697 : vector<8x32xf32>
    %cst_268 = arith.constant 5.000000e-01 : f32
    %700 = vector.broadcast %cst_268 : f32 to vector<8x32xf32>
    %701 = arith.addf %699, %700 : vector<8x32xf32>
    %702 = vector.extract_strided_slice %685 {offsets = [0, 64], sizes = [8, 32], strides = [1, 1]} : vector<8x128xf32> to vector<8x32xf32>
    %703 = math.tanh %702 : vector<8x32xf32>
    %704 = vector.extract_strided_slice %685 {offsets = [0, 96], sizes = [8, 32], strides = [1, 1]} : vector<8x128xf32> to vector<8x32xf32>
    %cst_269 = arith.constant 5.000000e-01 : f32
    %705 = vector.broadcast %cst_269 : f32 to vector<8x32xf32>
    %706 = arith.mulf %705, %704 : vector<8x32xf32>
    %707 = math.tanh %706 : vector<8x32xf32>
    %cst_270 = arith.constant 5.000000e-01 : f32
    %708 = vector.broadcast %cst_270 : f32 to vector<8x32xf32>
    %709 = arith.mulf %708, %707 : vector<8x32xf32>
    %cst_271 = arith.constant 5.000000e-01 : f32
    %710 = vector.broadcast %cst_271 : f32 to vector<8x32xf32>
    %711 = arith.addf %709, %710 : vector<8x32xf32>
    %712 = arith.mulf %701, %674 : vector<8x32xf32>
    %713 = arith.mulf %693, %703 : vector<8x32xf32>
    %714 = arith.addf %712, %713 : vector<8x32xf32>
    %715 = math.tanh %714 : vector<8x32xf32>
    %716 = arith.mulf %711, %715 : vector<8x32xf32>
    %c5_272 = arith.constant 5 : index
    %c0_273 = arith.constant 0 : index
    %c0_274 = arith.constant 0 : index
    %717 = vector.load %arg12[%c5_272, %c0_273, %c0_274] : memref<8x8x128xf32, #tpu.memory_space<vmem>>, vector<1x8x128xf32>
    %718 = vector.shape_cast %717 : vector<1x8x128xf32> to vector<8x128xf32>
    %c5_275 = arith.constant 5 : index
    %c0_276 = arith.constant 0 : index
    %c0_277 = arith.constant 0 : index
    %719 = vector.load %arg13[%c5_275, %c0_276, %c0_277] : memref<8x8x128xf32, #tpu.memory_space<vmem>>, vector<1x8x128xf32>
    %720 = vector.shape_cast %719 : vector<1x8x128xf32> to vector<8x128xf32>
    %721 = arith.addf %718, %720 : vector<8x128xf32>
    %722 = vector.broadcast %636 : vector<1x128xf32> to vector<8x128xf32>
    %723 = arith.addf %721, %722 : vector<8x128xf32>
    %cst_278 = arith.constant dense<0.000000e+00> : vector<8x128xf32>
    %724 = tpu.matmul %716, %635, %cst_278 {dimension_numbers = #tpu.dot_dimension_numbers<[1], [0], [0], [1], [0, 0, 1, 1], [], []>} : vector<8x32xf32>, vector<32x128xf32>, vector<8x128xf32> -> vector<8x128xf32>
    %725 = arith.addf %723, %724 : vector<8x128xf32>
    %726 = vector.extract_strided_slice %725 {offsets = [0, 0], sizes = [8, 32], strides = [1, 1]} : vector<8x128xf32> to vector<8x32xf32>
    %cst_279 = arith.constant 5.000000e-01 : f32
    %727 = vector.broadcast %cst_279 : f32 to vector<8x32xf32>
    %728 = arith.mulf %727, %726 : vector<8x32xf32>
    %729 = math.tanh %728 : vector<8x32xf32>
    %cst_280 = arith.constant 5.000000e-01 : f32
    %730 = vector.broadcast %cst_280 : f32 to vector<8x32xf32>
    %731 = arith.mulf %730, %729 : vector<8x32xf32>
    %cst_281 = arith.constant 5.000000e-01 : f32
    %732 = vector.broadcast %cst_281 : f32 to vector<8x32xf32>
    %733 = arith.addf %731, %732 : vector<8x32xf32>
    %734 = vector.extract_strided_slice %725 {offsets = [0, 32], sizes = [8, 32], strides = [1, 1]} : vector<8x128xf32> to vector<8x32xf32>
    %cst_282 = arith.constant 5.000000e-01 : f32
    %735 = vector.broadcast %cst_282 : f32 to vector<8x32xf32>
    %736 = arith.mulf %735, %734 : vector<8x32xf32>
    %737 = math.tanh %736 : vector<8x32xf32>
    %cst_283 = arith.constant 5.000000e-01 : f32
    %738 = vector.broadcast %cst_283 : f32 to vector<8x32xf32>
    %739 = arith.mulf %738, %737 : vector<8x32xf32>
    %cst_284 = arith.constant 5.000000e-01 : f32
    %740 = vector.broadcast %cst_284 : f32 to vector<8x32xf32>
    %741 = arith.addf %739, %740 : vector<8x32xf32>
    %742 = vector.extract_strided_slice %725 {offsets = [0, 64], sizes = [8, 32], strides = [1, 1]} : vector<8x128xf32> to vector<8x32xf32>
    %743 = math.tanh %742 : vector<8x32xf32>
    %744 = vector.extract_strided_slice %725 {offsets = [0, 96], sizes = [8, 32], strides = [1, 1]} : vector<8x128xf32> to vector<8x32xf32>
    %cst_285 = arith.constant 5.000000e-01 : f32
    %745 = vector.broadcast %cst_285 : f32 to vector<8x32xf32>
    %746 = arith.mulf %745, %744 : vector<8x32xf32>
    %747 = math.tanh %746 : vector<8x32xf32>
    %cst_286 = arith.constant 5.000000e-01 : f32
    %748 = vector.broadcast %cst_286 : f32 to vector<8x32xf32>
    %749 = arith.mulf %748, %747 : vector<8x32xf32>
    %cst_287 = arith.constant 5.000000e-01 : f32
    %750 = vector.broadcast %cst_287 : f32 to vector<8x32xf32>
    %751 = arith.addf %749, %750 : vector<8x32xf32>
    %752 = arith.mulf %741, %714 : vector<8x32xf32>
    %753 = arith.mulf %733, %743 : vector<8x32xf32>
    %754 = arith.addf %752, %753 : vector<8x32xf32>
    %755 = math.tanh %754 : vector<8x32xf32>
    %756 = arith.mulf %751, %755 : vector<8x32xf32>
    %c4_288 = arith.constant 4 : index
    %c0_289 = arith.constant 0 : index
    %c0_290 = arith.constant 0 : index
    %757 = vector.load %arg12[%c4_288, %c0_289, %c0_290] : memref<8x8x128xf32, #tpu.memory_space<vmem>>, vector<1x8x128xf32>
    %758 = vector.shape_cast %757 : vector<1x8x128xf32> to vector<8x128xf32>
    %c4_291 = arith.constant 4 : index
    %c0_292 = arith.constant 0 : index
    %c0_293 = arith.constant 0 : index
    %759 = vector.load %arg13[%c4_291, %c0_292, %c0_293] : memref<8x8x128xf32, #tpu.memory_space<vmem>>, vector<1x8x128xf32>
    %760 = vector.shape_cast %759 : vector<1x8x128xf32> to vector<8x128xf32>
    %761 = arith.addf %758, %760 : vector<8x128xf32>
    %762 = vector.broadcast %636 : vector<1x128xf32> to vector<8x128xf32>
    %763 = arith.addf %761, %762 : vector<8x128xf32>
    %cst_294 = arith.constant dense<0.000000e+00> : vector<8x128xf32>
    %764 = tpu.matmul %756, %635, %cst_294 {dimension_numbers = #tpu.dot_dimension_numbers<[1], [0], [0], [1], [0, 0, 1, 1], [], []>} : vector<8x32xf32>, vector<32x128xf32>, vector<8x128xf32> -> vector<8x128xf32>
    %765 = arith.addf %763, %764 : vector<8x128xf32>
    %766 = vector.extract_strided_slice %765 {offsets = [0, 0], sizes = [8, 32], strides = [1, 1]} : vector<8x128xf32> to vector<8x32xf32>
    %cst_295 = arith.constant 5.000000e-01 : f32
    %767 = vector.broadcast %cst_295 : f32 to vector<8x32xf32>
    %768 = arith.mulf %767, %766 : vector<8x32xf32>
    %769 = math.tanh %768 : vector<8x32xf32>
    %cst_296 = arith.constant 5.000000e-01 : f32
    %770 = vector.broadcast %cst_296 : f32 to vector<8x32xf32>
    %771 = arith.mulf %770, %769 : vector<8x32xf32>
    %cst_297 = arith.constant 5.000000e-01 : f32
    %772 = vector.broadcast %cst_297 : f32 to vector<8x32xf32>
    %773 = arith.addf %771, %772 : vector<8x32xf32>
    %774 = vector.extract_strided_slice %765 {offsets = [0, 32], sizes = [8, 32], strides = [1, 1]} : vector<8x128xf32> to vector<8x32xf32>
    %cst_298 = arith.constant 5.000000e-01 : f32
    %775 = vector.broadcast %cst_298 : f32 to vector<8x32xf32>
    %776 = arith.mulf %775, %774 : vector<8x32xf32>
    %777 = math.tanh %776 : vector<8x32xf32>
    %cst_299 = arith.constant 5.000000e-01 : f32
    %778 = vector.broadcast %cst_299 : f32 to vector<8x32xf32>
    %779 = arith.mulf %778, %777 : vector<8x32xf32>
    %cst_300 = arith.constant 5.000000e-01 : f32
    %780 = vector.broadcast %cst_300 : f32 to vector<8x32xf32>
    %781 = arith.addf %779, %780 : vector<8x32xf32>
    %782 = vector.extract_strided_slice %765 {offsets = [0, 64], sizes = [8, 32], strides = [1, 1]} : vector<8x128xf32> to vector<8x32xf32>
    %783 = math.tanh %782 : vector<8x32xf32>
    %784 = vector.extract_strided_slice %765 {offsets = [0, 96], sizes = [8, 32], strides = [1, 1]} : vector<8x128xf32> to vector<8x32xf32>
    %cst_301 = arith.constant 5.000000e-01 : f32
    %785 = vector.broadcast %cst_301 : f32 to vector<8x32xf32>
    %786 = arith.mulf %785, %784 : vector<8x32xf32>
    %787 = math.tanh %786 : vector<8x32xf32>
    %cst_302 = arith.constant 5.000000e-01 : f32
    %788 = vector.broadcast %cst_302 : f32 to vector<8x32xf32>
    %789 = arith.mulf %788, %787 : vector<8x32xf32>
    %cst_303 = arith.constant 5.000000e-01 : f32
    %790 = vector.broadcast %cst_303 : f32 to vector<8x32xf32>
    %791 = arith.addf %789, %790 : vector<8x32xf32>
    %792 = arith.mulf %781, %754 : vector<8x32xf32>
    %793 = arith.mulf %773, %783 : vector<8x32xf32>
    %794 = arith.addf %792, %793 : vector<8x32xf32>
    %795 = math.tanh %794 : vector<8x32xf32>
    %796 = arith.mulf %791, %795 : vector<8x32xf32>
    %c3_304 = arith.constant 3 : index
    %c0_305 = arith.constant 0 : index
    %c0_306 = arith.constant 0 : index
    %797 = vector.load %arg12[%c3_304, %c0_305, %c0_306] : memref<8x8x128xf32, #tpu.memory_space<vmem>>, vector<1x8x128xf32>
    %798 = vector.shape_cast %797 : vector<1x8x128xf32> to vector<8x128xf32>
    %c3_307 = arith.constant 3 : index
    %c0_308 = arith.constant 0 : index
    %c0_309 = arith.constant 0 : index
    %799 = vector.load %arg13[%c3_307, %c0_308, %c0_309] : memref<8x8x128xf32, #tpu.memory_space<vmem>>, vector<1x8x128xf32>
    %800 = vector.shape_cast %799 : vector<1x8x128xf32> to vector<8x128xf32>
    %801 = arith.addf %798, %800 : vector<8x128xf32>
    %802 = vector.broadcast %636 : vector<1x128xf32> to vector<8x128xf32>
    %803 = arith.addf %801, %802 : vector<8x128xf32>
    %cst_310 = arith.constant dense<0.000000e+00> : vector<8x128xf32>
    %804 = tpu.matmul %796, %635, %cst_310 {dimension_numbers = #tpu.dot_dimension_numbers<[1], [0], [0], [1], [0, 0, 1, 1], [], []>} : vector<8x32xf32>, vector<32x128xf32>, vector<8x128xf32> -> vector<8x128xf32>
    %805 = arith.addf %803, %804 : vector<8x128xf32>
    %806 = vector.extract_strided_slice %805 {offsets = [0, 0], sizes = [8, 32], strides = [1, 1]} : vector<8x128xf32> to vector<8x32xf32>
    %cst_311 = arith.constant 5.000000e-01 : f32
    %807 = vector.broadcast %cst_311 : f32 to vector<8x32xf32>
    %808 = arith.mulf %807, %806 : vector<8x32xf32>
    %809 = math.tanh %808 : vector<8x32xf32>
    %cst_312 = arith.constant 5.000000e-01 : f32
    %810 = vector.broadcast %cst_312 : f32 to vector<8x32xf32>
    %811 = arith.mulf %810, %809 : vector<8x32xf32>
    %cst_313 = arith.constant 5.000000e-01 : f32
    %812 = vector.broadcast %cst_313 : f32 to vector<8x32xf32>
    %813 = arith.addf %811, %812 : vector<8x32xf32>
    %814 = vector.extract_strided_slice %805 {offsets = [0, 32], sizes = [8, 32], strides = [1, 1]} : vector<8x128xf32> to vector<8x32xf32>
    %cst_314 = arith.constant 5.000000e-01 : f32
    %815 = vector.broadcast %cst_314 : f32 to vector<8x32xf32>
    %816 = arith.mulf %815, %814 : vector<8x32xf32>
    %817 = math.tanh %816 : vector<8x32xf32>
    %cst_315 = arith.constant 5.000000e-01 : f32
    %818 = vector.broadcast %cst_315 : f32 to vector<8x32xf32>
    %819 = arith.mulf %818, %817 : vector<8x32xf32>
    %cst_316 = arith.constant 5.000000e-01 : f32
    %820 = vector.broadcast %cst_316 : f32 to vector<8x32xf32>
    %821 = arith.addf %819, %820 : vector<8x32xf32>
    %822 = vector.extract_strided_slice %805 {offsets = [0, 64], sizes = [8, 32], strides = [1, 1]} : vector<8x128xf32> to vector<8x32xf32>
    %823 = math.tanh %822 : vector<8x32xf32>
    %824 = vector.extract_strided_slice %805 {offsets = [0, 96], sizes = [8, 32], strides = [1, 1]} : vector<8x128xf32> to vector<8x32xf32>
    %cst_317 = arith.constant 5.000000e-01 : f32
    %825 = vector.broadcast %cst_317 : f32 to vector<8x32xf32>
    %826 = arith.mulf %825, %824 : vector<8x32xf32>
    %827 = math.tanh %826 : vector<8x32xf32>
    %cst_318 = arith.constant 5.000000e-01 : f32
    %828 = vector.broadcast %cst_318 : f32 to vector<8x32xf32>
    %829 = arith.mulf %828, %827 : vector<8x32xf32>
    %cst_319 = arith.constant 5.000000e-01 : f32
    %830 = vector.broadcast %cst_319 : f32 to vector<8x32xf32>
    %831 = arith.addf %829, %830 : vector<8x32xf32>
    %832 = arith.mulf %821, %794 : vector<8x32xf32>
    %833 = arith.mulf %813, %823 : vector<8x32xf32>
    %834 = arith.addf %832, %833 : vector<8x32xf32>
    %835 = math.tanh %834 : vector<8x32xf32>
    %836 = arith.mulf %831, %835 : vector<8x32xf32>
    %c2_320 = arith.constant 2 : index
    %c0_321 = arith.constant 0 : index
    %c0_322 = arith.constant 0 : index
    %837 = vector.load %arg12[%c2_320, %c0_321, %c0_322] : memref<8x8x128xf32, #tpu.memory_space<vmem>>, vector<1x8x128xf32>
    %838 = vector.shape_cast %837 : vector<1x8x128xf32> to vector<8x128xf32>
    %c2_323 = arith.constant 2 : index
    %c0_324 = arith.constant 0 : index
    %c0_325 = arith.constant 0 : index
    %839 = vector.load %arg13[%c2_323, %c0_324, %c0_325] : memref<8x8x128xf32, #tpu.memory_space<vmem>>, vector<1x8x128xf32>
    %840 = vector.shape_cast %839 : vector<1x8x128xf32> to vector<8x128xf32>
    %841 = arith.addf %838, %840 : vector<8x128xf32>
    %842 = vector.broadcast %636 : vector<1x128xf32> to vector<8x128xf32>
    %843 = arith.addf %841, %842 : vector<8x128xf32>
    %cst_326 = arith.constant dense<0.000000e+00> : vector<8x128xf32>
    %844 = tpu.matmul %836, %635, %cst_326 {dimension_numbers = #tpu.dot_dimension_numbers<[1], [0], [0], [1], [0, 0, 1, 1], [], []>} : vector<8x32xf32>, vector<32x128xf32>, vector<8x128xf32> -> vector<8x128xf32>
    %845 = arith.addf %843, %844 : vector<8x128xf32>
    %846 = vector.extract_strided_slice %845 {offsets = [0, 0], sizes = [8, 32], strides = [1, 1]} : vector<8x128xf32> to vector<8x32xf32>
    %cst_327 = arith.constant 5.000000e-01 : f32
    %847 = vector.broadcast %cst_327 : f32 to vector<8x32xf32>
    %848 = arith.mulf %847, %846 : vector<8x32xf32>
    %849 = math.tanh %848 : vector<8x32xf32>
    %cst_328 = arith.constant 5.000000e-01 : f32
    %850 = vector.broadcast %cst_328 : f32 to vector<8x32xf32>
    %851 = arith.mulf %850, %849 : vector<8x32xf32>
    %cst_329 = arith.constant 5.000000e-01 : f32
    %852 = vector.broadcast %cst_329 : f32 to vector<8x32xf32>
    %853 = arith.addf %851, %852 : vector<8x32xf32>
    %854 = vector.extract_strided_slice %845 {offsets = [0, 32], sizes = [8, 32], strides = [1, 1]} : vector<8x128xf32> to vector<8x32xf32>
    %cst_330 = arith.constant 5.000000e-01 : f32
    %855 = vector.broadcast %cst_330 : f32 to vector<8x32xf32>
    %856 = arith.mulf %855, %854 : vector<8x32xf32>
    %857 = math.tanh %856 : vector<8x32xf32>
    %cst_331 = arith.constant 5.000000e-01 : f32
    %858 = vector.broadcast %cst_331 : f32 to vector<8x32xf32>
    %859 = arith.mulf %858, %857 : vector<8x32xf32>
    %cst_332 = arith.constant 5.000000e-01 : f32
    %860 = vector.broadcast %cst_332 : f32 to vector<8x32xf32>
    %861 = arith.addf %859, %860 : vector<8x32xf32>
    %862 = vector.extract_strided_slice %845 {offsets = [0, 64], sizes = [8, 32], strides = [1, 1]} : vector<8x128xf32> to vector<8x32xf32>
    %863 = math.tanh %862 : vector<8x32xf32>
    %864 = vector.extract_strided_slice %845 {offsets = [0, 96], sizes = [8, 32], strides = [1, 1]} : vector<8x128xf32> to vector<8x32xf32>
    %cst_333 = arith.constant 5.000000e-01 : f32
    %865 = vector.broadcast %cst_333 : f32 to vector<8x32xf32>
    %866 = arith.mulf %865, %864 : vector<8x32xf32>
    %867 = math.tanh %866 : vector<8x32xf32>
    %cst_334 = arith.constant 5.000000e-01 : f32
    %868 = vector.broadcast %cst_334 : f32 to vector<8x32xf32>
    %869 = arith.mulf %868, %867 : vector<8x32xf32>
    %cst_335 = arith.constant 5.000000e-01 : f32
    %870 = vector.broadcast %cst_335 : f32 to vector<8x32xf32>
    %871 = arith.addf %869, %870 : vector<8x32xf32>
    %872 = arith.mulf %861, %834 : vector<8x32xf32>
    %873 = arith.mulf %853, %863 : vector<8x32xf32>
    %874 = arith.addf %872, %873 : vector<8x32xf32>
    %875 = math.tanh %874 : vector<8x32xf32>
    %876 = arith.mulf %871, %875 : vector<8x32xf32>
    %c1_336 = arith.constant 1 : index
    %c0_337 = arith.constant 0 : index
    %c0_338 = arith.constant 0 : index
    %877 = vector.load %arg12[%c1_336, %c0_337, %c0_338] : memref<8x8x128xf32, #tpu.memory_space<vmem>>, vector<1x8x128xf32>
    %878 = vector.shape_cast %877 : vector<1x8x128xf32> to vector<8x128xf32>
    %c1_339 = arith.constant 1 : index
    %c0_340 = arith.constant 0 : index
    %c0_341 = arith.constant 0 : index
    %879 = vector.load %arg13[%c1_339, %c0_340, %c0_341] : memref<8x8x128xf32, #tpu.memory_space<vmem>>, vector<1x8x128xf32>
    %880 = vector.shape_cast %879 : vector<1x8x128xf32> to vector<8x128xf32>
    %881 = arith.addf %878, %880 : vector<8x128xf32>
    %882 = vector.broadcast %636 : vector<1x128xf32> to vector<8x128xf32>
    %883 = arith.addf %881, %882 : vector<8x128xf32>
    %cst_342 = arith.constant dense<0.000000e+00> : vector<8x128xf32>
    %884 = tpu.matmul %876, %635, %cst_342 {dimension_numbers = #tpu.dot_dimension_numbers<[1], [0], [0], [1], [0, 0, 1, 1], [], []>} : vector<8x32xf32>, vector<32x128xf32>, vector<8x128xf32> -> vector<8x128xf32>
    %885 = arith.addf %883, %884 : vector<8x128xf32>
    %886 = vector.extract_strided_slice %885 {offsets = [0, 0], sizes = [8, 32], strides = [1, 1]} : vector<8x128xf32> to vector<8x32xf32>
    %cst_343 = arith.constant 5.000000e-01 : f32
    %887 = vector.broadcast %cst_343 : f32 to vector<8x32xf32>
    %888 = arith.mulf %887, %886 : vector<8x32xf32>
    %889 = math.tanh %888 : vector<8x32xf32>
    %cst_344 = arith.constant 5.000000e-01 : f32
    %890 = vector.broadcast %cst_344 : f32 to vector<8x32xf32>
    %891 = arith.mulf %890, %889 : vector<8x32xf32>
    %cst_345 = arith.constant 5.000000e-01 : f32
    %892 = vector.broadcast %cst_345 : f32 to vector<8x32xf32>
    %893 = arith.addf %891, %892 : vector<8x32xf32>
    %894 = vector.extract_strided_slice %885 {offsets = [0, 32], sizes = [8, 32], strides = [1, 1]} : vector<8x128xf32> to vector<8x32xf32>
    %cst_346 = arith.constant 5.000000e-01 : f32
    %895 = vector.broadcast %cst_346 : f32 to vector<8x32xf32>
    %896 = arith.mulf %895, %894 : vector<8x32xf32>
    %897 = math.tanh %896 : vector<8x32xf32>
    %cst_347 = arith.constant 5.000000e-01 : f32
    %898 = vector.broadcast %cst_347 : f32 to vector<8x32xf32>
    %899 = arith.mulf %898, %897 : vector<8x32xf32>
    %cst_348 = arith.constant 5.000000e-01 : f32
    %900 = vector.broadcast %cst_348 : f32 to vector<8x32xf32>
    %901 = arith.addf %899, %900 : vector<8x32xf32>
    %902 = vector.extract_strided_slice %885 {offsets = [0, 64], sizes = [8, 32], strides = [1, 1]} : vector<8x128xf32> to vector<8x32xf32>
    %903 = math.tanh %902 : vector<8x32xf32>
    %904 = vector.extract_strided_slice %885 {offsets = [0, 96], sizes = [8, 32], strides = [1, 1]} : vector<8x128xf32> to vector<8x32xf32>
    %cst_349 = arith.constant 5.000000e-01 : f32
    %905 = vector.broadcast %cst_349 : f32 to vector<8x32xf32>
    %906 = arith.mulf %905, %904 : vector<8x32xf32>
    %907 = math.tanh %906 : vector<8x32xf32>
    %cst_350 = arith.constant 5.000000e-01 : f32
    %908 = vector.broadcast %cst_350 : f32 to vector<8x32xf32>
    %909 = arith.mulf %908, %907 : vector<8x32xf32>
    %cst_351 = arith.constant 5.000000e-01 : f32
    %910 = vector.broadcast %cst_351 : f32 to vector<8x32xf32>
    %911 = arith.addf %909, %910 : vector<8x32xf32>
    %912 = arith.mulf %901, %874 : vector<8x32xf32>
    %913 = arith.mulf %893, %903 : vector<8x32xf32>
    %914 = arith.addf %912, %913 : vector<8x32xf32>
    %915 = math.tanh %914 : vector<8x32xf32>
    %916 = arith.mulf %911, %915 : vector<8x32xf32>
    %c0_352 = arith.constant 0 : index
    %c0_353 = arith.constant 0 : index
    %c0_354 = arith.constant 0 : index
    %917 = vector.load %arg12[%c0_352, %c0_353, %c0_354] : memref<8x8x128xf32, #tpu.memory_space<vmem>>, vector<1x8x128xf32>
    %918 = vector.shape_cast %917 : vector<1x8x128xf32> to vector<8x128xf32>
    %c0_355 = arith.constant 0 : index
    %c0_356 = arith.constant 0 : index
    %c0_357 = arith.constant 0 : index
    %919 = vector.load %arg13[%c0_355, %c0_356, %c0_357] : memref<8x8x128xf32, #tpu.memory_space<vmem>>, vector<1x8x128xf32>
    %920 = vector.shape_cast %919 : vector<1x8x128xf32> to vector<8x128xf32>
    %921 = arith.addf %918, %920 : vector<8x128xf32>
    %922 = vector.broadcast %636 : vector<1x128xf32> to vector<8x128xf32>
    %923 = arith.addf %921, %922 : vector<8x128xf32>
    %cst_358 = arith.constant dense<0.000000e+00> : vector<8x128xf32>
    %924 = tpu.matmul %916, %635, %cst_358 {dimension_numbers = #tpu.dot_dimension_numbers<[1], [0], [0], [1], [0, 0, 1, 1], [], []>} : vector<8x32xf32>, vector<32x128xf32>, vector<8x128xf32> -> vector<8x128xf32>
    %925 = arith.addf %923, %924 : vector<8x128xf32>
    %926 = vector.extract_strided_slice %925 {offsets = [0, 0], sizes = [8, 32], strides = [1, 1]} : vector<8x128xf32> to vector<8x32xf32>
    %cst_359 = arith.constant 5.000000e-01 : f32
    %927 = vector.broadcast %cst_359 : f32 to vector<8x32xf32>
    %928 = arith.mulf %927, %926 : vector<8x32xf32>
    %929 = math.tanh %928 : vector<8x32xf32>
    %cst_360 = arith.constant 5.000000e-01 : f32
    %930 = vector.broadcast %cst_360 : f32 to vector<8x32xf32>
    %931 = arith.mulf %930, %929 : vector<8x32xf32>
    %cst_361 = arith.constant 5.000000e-01 : f32
    %932 = vector.broadcast %cst_361 : f32 to vector<8x32xf32>
    %933 = arith.addf %931, %932 : vector<8x32xf32>
    %934 = vector.extract_strided_slice %925 {offsets = [0, 32], sizes = [8, 32], strides = [1, 1]} : vector<8x128xf32> to vector<8x32xf32>
    %cst_362 = arith.constant 5.000000e-01 : f32
    %935 = vector.broadcast %cst_362 : f32 to vector<8x32xf32>
    %936 = arith.mulf %935, %934 : vector<8x32xf32>
    %937 = math.tanh %936 : vector<8x32xf32>
    %cst_363 = arith.constant 5.000000e-01 : f32
    %938 = vector.broadcast %cst_363 : f32 to vector<8x32xf32>
    %939 = arith.mulf %938, %937 : vector<8x32xf32>
    %cst_364 = arith.constant 5.000000e-01 : f32
    %940 = vector.broadcast %cst_364 : f32 to vector<8x32xf32>
    %941 = arith.addf %939, %940 : vector<8x32xf32>
    %942 = vector.extract_strided_slice %925 {offsets = [0, 64], sizes = [8, 32], strides = [1, 1]} : vector<8x128xf32> to vector<8x32xf32>
    %943 = math.tanh %942 : vector<8x32xf32>
    %944 = vector.extract_strided_slice %925 {offsets = [0, 96], sizes = [8, 32], strides = [1, 1]} : vector<8x128xf32> to vector<8x32xf32>
    %cst_365 = arith.constant 5.000000e-01 : f32
    %945 = vector.broadcast %cst_365 : f32 to vector<8x32xf32>
    %946 = arith.mulf %945, %944 : vector<8x32xf32>
    %947 = math.tanh %946 : vector<8x32xf32>
    %cst_366 = arith.constant 5.000000e-01 : f32
    %948 = vector.broadcast %cst_366 : f32 to vector<8x32xf32>
    %949 = arith.mulf %948, %947 : vector<8x32xf32>
    %cst_367 = arith.constant 5.000000e-01 : f32
    %950 = vector.broadcast %cst_367 : f32 to vector<8x32xf32>
    %951 = arith.addf %949, %950 : vector<8x32xf32>
    %952 = arith.mulf %941, %914 : vector<8x32xf32>
    %953 = arith.mulf %933, %943 : vector<8x32xf32>
    %954 = arith.addf %952, %953 : vector<8x32xf32>
    %955 = math.tanh %954 : vector<8x32xf32>
    %956 = arith.mulf %951, %955 : vector<8x32xf32>
    %c0_368 = arith.constant 0 : index
    %c0_369 = arith.constant 0 : index
    %957 = vector.load %arg10[%c0_368, %c0_369] : memref<8x32xf32, #tpu.memory_space<vmem>>, vector<8x32xf32>
    tpu.vector_store %arg10[%c0_368, %c0_369], %956 {strides = array<i32>} : memref<8x32xf32, #tpu.memory_space<vmem>>, vector<8x32xf32>,
    %c0_370 = arith.constant 0 : index
    %c0_371 = arith.constant 0 : index
    %958 = vector.load %arg6[%c0_370, %c0_371] : memref<32x144xf32, #tpu.memory_space<vmem>>, vector<32x144xf32>
    %c0_372 = arith.constant 0 : index
    %c0_373 = arith.constant 0 : index
    %959 = vector.load %arg7[%c0_372, %c0_373] : memref<1x144xf32, #tpu.memory_space<vmem>>, vector<1x144xf32>
    %c0_374 = arith.constant 0 : index
    %c0_375 = arith.constant 0 : index
    %960 = vector.load %arg8[%c0_374, %c0_375] : memref<16x128xf32, #tpu.memory_space<vmem>>, vector<16x128xf32>
    %961 = tpu.iota {dimensions = array<i32: 1>} : vector<8x16xi32>
    %cst_376 = arith.constant dense<0.000000e+00> : vector<8x144xf32>
    %962 = tpu.matmul %956, %958, %cst_376 {dimension_numbers = #tpu.dot_dimension_numbers<[1], [0], [0], [1], [0, 0, 1, 1], [], []>} : vector<8x32xf32>, vector<32x144xf32>, vector<8x144xf32> -> vector<8x144xf32>
    %963 = vector.broadcast %959 : vector<1x144xf32> to vector<8x144xf32>
    %964 = arith.addf %962, %963 : vector<8x144xf32>
    %965 = vector.extract_strided_slice %964 {offsets = [0, 0], sizes = [8, 128], strides = [1, 1]} : vector<8x144xf32> to vector<8x128xf32>
    %966 = vector.extract_strided_slice %965 {offsets = [0, 0], sizes = [8, 32], strides = [1, 1]} : vector<8x128xf32> to vector<8x32xf32>
    %cst_377 = arith.constant 5.000000e-01 : f32
    %967 = vector.broadcast %cst_377 : f32 to vector<8x32xf32>
    %968 = arith.mulf %967, %966 : vector<8x32xf32>
    %969 = math.tanh %968 : vector<8x32xf32>
    %cst_378 = arith.constant 5.000000e-01 : f32
    %970 = vector.broadcast %cst_378 : f32 to vector<8x32xf32>
    %971 = arith.mulf %970, %969 : vector<8x32xf32>
    %cst_379 = arith.constant 5.000000e-01 : f32
    %972 = vector.broadcast %cst_379 : f32 to vector<8x32xf32>
    %973 = arith.addf %971, %972 : vector<8x32xf32>
    %974 = vector.extract_strided_slice %965 {offsets = [0, 32], sizes = [8, 32], strides = [1, 1]} : vector<8x128xf32> to vector<8x32xf32>
    %cst_380 = arith.constant 5.000000e-01 : f32
    %975 = vector.broadcast %cst_380 : f32 to vector<8x32xf32>
    %976 = arith.mulf %975, %974 : vector<8x32xf32>
    %977 = math.tanh %976 : vector<8x32xf32>
    %cst_381 = arith.constant 5.000000e-01 : f32
    %978 = vector.broadcast %cst_381 : f32 to vector<8x32xf32>
    %979 = arith.mulf %978, %977 : vector<8x32xf32>
    %cst_382 = arith.constant 5.000000e-01 : f32
    %980 = vector.broadcast %cst_382 : f32 to vector<8x32xf32>
    %981 = arith.addf %979, %980 : vector<8x32xf32>
    %982 = vector.extract_strided_slice %965 {offsets = [0, 64], sizes = [8, 32], strides = [1, 1]} : vector<8x128xf32> to vector<8x32xf32>
    %983 = math.tanh %982 : vector<8x32xf32>
    %984 = vector.extract_strided_slice %965 {offsets = [0, 96], sizes = [8, 32], strides = [1, 1]} : vector<8x128xf32> to vector<8x32xf32>
    %cst_383 = arith.constant 5.000000e-01 : f32
    %985 = vector.broadcast %cst_383 : f32 to vector<8x32xf32>
    %986 = arith.mulf %985, %984 : vector<8x32xf32>
    %987 = math.tanh %986 : vector<8x32xf32>
    %cst_384 = arith.constant 5.000000e-01 : f32
    %988 = vector.broadcast %cst_384 : f32 to vector<8x32xf32>
    %989 = arith.mulf %988, %987 : vector<8x32xf32>
    %cst_385 = arith.constant 5.000000e-01 : f32
    %990 = vector.broadcast %cst_385 : f32 to vector<8x32xf32>
    %991 = arith.addf %989, %990 : vector<8x32xf32>
    %992 = arith.mulf %981, %954 : vector<8x32xf32>
    %993 = arith.mulf %973, %983 : vector<8x32xf32>
    %994 = arith.addf %992, %993 : vector<8x32xf32>
    %995 = math.tanh %994 : vector<8x32xf32>
    %996 = arith.mulf %991, %995 : vector<8x32xf32>
    %cst_386 = arith.constant dense<0.000000e+00> : vector<8x144xf32>
    %997 = tpu.matmul %996, %958, %cst_386 {dimension_numbers = #tpu.dot_dimension_numbers<[1], [0], [0], [1], [0, 0, 1, 1], [], []>} : vector<8x32xf32>, vector<32x144xf32>, vector<8x144xf32> -> vector<8x144xf32>
    %998 = vector.broadcast %959 : vector<1x144xf32> to vector<8x144xf32>
    %999 = arith.addf %997, %998 : vector<8x144xf32>
    %1000 = vector.extract_strided_slice %999 {offsets = [0, 128], sizes = [8, 16], strides = [1, 1]} : vector<8x144xf32> to vector<8x16xf32>
    %cst_387 = arith.constant dense<0xFF800000> : vector<8xf32>
    %1001 = vector.multi_reduction <maximumf>, %1000, %cst_387 [1] : vector<8x16xf32> to vector<8xf32>
    %1002 = vector.shape_cast %1001 : vector<8xf32> to vector<8x1xf32>
    %1003 = vector.broadcast %1002 : vector<8x1xf32> to vector<8x16xf32>
    %1004 = arith.cmpf oeq, %1000, %1003 : vector<8x16xf32>
    %c16_i32 = arith.constant 16 : i32
    %1005 = vector.broadcast %c16_i32 : i32 to vector<8x16xi32>
    %1006 = arith.select %1004, %961, %1005 : vector<8x16xi1>, vector<8x16xi32>
    %cst_388 = arith.constant dense<2147483647> : vector<8xi32>
    %1007 = vector.multi_reduction <minsi>, %1006, %cst_388 [1] : vector<8x16xi32> to vector<8xi32>
    %1008 = vector.shape_cast %1007 : vector<8xi32> to vector<8x1xi32>
    %1009 = vector.broadcast %1008 : vector<8x1xi32> to vector<8x16xi32>
    %1010 = arith.cmpi eq, %961, %1009 : vector<8x16xi32>
    %1011 = arith.extui %1010 : vector<8x16xi1> to vector<8x16xi32>
    %1012 = arith.sitofp %1011 : vector<8x16xi32> to vector<8x16xf32>
    %cst_389 = arith.constant dense<0.000000e+00> : vector<8x128xf32>
    %1013 = tpu.matmul %1012, %960, %cst_389 {dimension_numbers = #tpu.dot_dimension_numbers<[1], [0], [0], [1], [0, 0, 1, 1], [], []>} : vector<8x16xf32>, vector<16x128xf32>, vector<8x128xf32> -> vector<8x128xf32>
    %1014 = vector.extract_strided_slice %999 {offsets = [0, 0], sizes = [8, 128], strides = [1, 1]} : vector<8x144xf32> to vector<8x128xf32>
    %1015 = arith.addf %1014, %1013 : vector<8x128xf32>
    %1016 = vector.extract_strided_slice %1015 {offsets = [0, 0], sizes = [8, 32], strides = [1, 1]} : vector<8x128xf32> to vector<8x32xf32>
    %cst_390 = arith.constant 5.000000e-01 : f32
    %1017 = vector.broadcast %cst_390 : f32 to vector<8x32xf32>
    %1018 = arith.mulf %1017, %1016 : vector<8x32xf32>
    %1019 = math.tanh %1018 : vector<8x32xf32>
    %cst_391 = arith.constant 5.000000e-01 : f32
    %1020 = vector.broadcast %cst_391 : f32 to vector<8x32xf32>
    %1021 = arith.mulf %1020, %1019 : vector<8x32xf32>
    %cst_392 = arith.constant 5.000000e-01 : f32
    %1022 = vector.broadcast %cst_392 : f32 to vector<8x32xf32>
    %1023 = arith.addf %1021, %1022 : vector<8x32xf32>
    %1024 = vector.extract_strided_slice %1015 {offsets = [0, 32], sizes = [8, 32], strides = [1, 1]} : vector<8x128xf32> to vector<8x32xf32>
    %cst_393 = arith.constant 5.000000e-01 : f32
    %1025 = vector.broadcast %cst_393 : f32 to vector<8x32xf32>
    %1026 = arith.mulf %1025, %1024 : vector<8x32xf32>
    %1027 = math.tanh %1026 : vector<8x32xf32>
    %cst_394 = arith.constant 5.000000e-01 : f32
    %1028 = vector.broadcast %cst_394 : f32 to vector<8x32xf32>
    %1029 = arith.mulf %1028, %1027 : vector<8x32xf32>
    %cst_395 = arith.constant 5.000000e-01 : f32
    %1030 = vector.broadcast %cst_395 : f32 to vector<8x32xf32>
    %1031 = arith.addf %1029, %1030 : vector<8x32xf32>
    %1032 = vector.extract_strided_slice %1015 {offsets = [0, 64], sizes = [8, 32], strides = [1, 1]} : vector<8x128xf32> to vector<8x32xf32>
    %1033 = math.tanh %1032 : vector<8x32xf32>
    %1034 = vector.extract_strided_slice %1015 {offsets = [0, 96], sizes = [8, 32], strides = [1, 1]} : vector<8x128xf32> to vector<8x32xf32>
    %cst_396 = arith.constant 5.000000e-01 : f32
    %1035 = vector.broadcast %cst_396 : f32 to vector<8x32xf32>
    %1036 = arith.mulf %1035, %1034 : vector<8x32xf32>
    %1037 = math.tanh %1036 : vector<8x32xf32>
    %cst_397 = arith.constant 5.000000e-01 : f32
    %1038 = vector.broadcast %cst_397 : f32 to vector<8x32xf32>
    %1039 = arith.mulf %1038, %1037 : vector<8x32xf32>
    %cst_398 = arith.constant 5.000000e-01 : f32
    %1040 = vector.broadcast %cst_398 : f32 to vector<8x32xf32>
    %1041 = arith.addf %1039, %1040 : vector<8x32xf32>
    %1042 = arith.mulf %1031, %994 : vector<8x32xf32>
    %1043 = arith.mulf %1023, %1033 : vector<8x32xf32>
    %1044 = arith.addf %1042, %1043 : vector<8x32xf32>
    %1045 = math.tanh %1044 : vector<8x32xf32>
    %1046 = arith.mulf %1041, %1045 : vector<8x32xf32>
    %cst_399 = arith.constant dense<0.000000e+00> : vector<8x144xf32>
    %1047 = tpu.matmul %1046, %958, %cst_399 {dimension_numbers = #tpu.dot_dimension_numbers<[1], [0], [0], [1], [0, 0, 1, 1], [], []>} : vector<8x32xf32>, vector<32x144xf32>, vector<8x144xf32> -> vector<8x144xf32>
    %1048 = vector.broadcast %959 : vector<1x144xf32> to vector<8x144xf32>
    %1049 = arith.addf %1047, %1048 : vector<8x144xf32>
    %1050 = vector.extract_strided_slice %1049 {offsets = [0, 128], sizes = [8, 16], strides = [1, 1]} : vector<8x144xf32> to vector<8x16xf32>
    %cst_400 = arith.constant dense<0xFF800000> : vector<8xf32>
    %1051 = vector.multi_reduction <maximumf>, %1050, %cst_400 [1] : vector<8x16xf32> to vector<8xf32>
    %1052 = vector.shape_cast %1051 : vector<8xf32> to vector<8x1xf32>
    %1053 = vector.broadcast %1052 : vector<8x1xf32> to vector<8x16xf32>
    %1054 = arith.cmpf oeq, %1050, %1053 : vector<8x16xf32>
    %c16_i32_401 = arith.constant 16 : i32
    %1055 = vector.broadcast %c16_i32_401 : i32 to vector<8x16xi32>
    %1056 = arith.select %1054, %961, %1055 : vector<8x16xi1>, vector<8x16xi32>
    %cst_402 = arith.constant dense<2147483647> : vector<8xi32>
    %1057 = vector.multi_reduction <minsi>, %1056, %cst_402 [1] : vector<8x16xi32> to vector<8xi32>
    %1058 = vector.shape_cast %1057 : vector<8xi32> to vector<8x1xi32>
    %1059 = vector.broadcast %1058 : vector<8x1xi32> to vector<8x16xi32>
    %1060 = arith.cmpi eq, %961, %1059 : vector<8x16xi32>
    %1061 = arith.extui %1060 : vector<8x16xi1> to vector<8x16xi32>
    %1062 = arith.sitofp %1061 : vector<8x16xi32> to vector<8x16xf32>
    %cst_403 = arith.constant dense<0.000000e+00> : vector<8x128xf32>
    %1063 = tpu.matmul %1062, %960, %cst_403 {dimension_numbers = #tpu.dot_dimension_numbers<[1], [0], [0], [1], [0, 0, 1, 1], [], []>} : vector<8x16xf32>, vector<16x128xf32>, vector<8x128xf32> -> vector<8x128xf32>
    %1064 = vector.extract_strided_slice %1049 {offsets = [0, 0], sizes = [8, 128], strides = [1, 1]} : vector<8x144xf32> to vector<8x128xf32>
    %1065 = arith.addf %1064, %1063 : vector<8x128xf32>
    %1066 = vector.extract_strided_slice %1065 {offsets = [0, 0], sizes = [8, 32], strides = [1, 1]} : vector<8x128xf32> to vector<8x32xf32>
    %cst_404 = arith.constant 5.000000e-01 : f32
    %1067 = vector.broadcast %cst_404 : f32 to vector<8x32xf32>
    %1068 = arith.mulf %1067, %1066 : vector<8x32xf32>
    %1069 = math.tanh %1068 : vector<8x32xf32>
    %cst_405 = arith.constant 5.000000e-01 : f32
    %1070 = vector.broadcast %cst_405 : f32 to vector<8x32xf32>
    %1071 = arith.mulf %1070, %1069 : vector<8x32xf32>
    %cst_406 = arith.constant 5.000000e-01 : f32
    %1072 = vector.broadcast %cst_406 : f32 to vector<8x32xf32>
    %1073 = arith.addf %1071, %1072 : vector<8x32xf32>
    %1074 = vector.extract_strided_slice %1065 {offsets = [0, 32], sizes = [8, 32], strides = [1, 1]} : vector<8x128xf32> to vector<8x32xf32>
    %cst_407 = arith.constant 5.000000e-01 : f32
    %1075 = vector.broadcast %cst_407 : f32 to vector<8x32xf32>
    %1076 = arith.mulf %1075, %1074 : vector<8x32xf32>
    %1077 = math.tanh %1076 : vector<8x32xf32>
    %cst_408 = arith.constant 5.000000e-01 : f32
    %1078 = vector.broadcast %cst_408 : f32 to vector<8x32xf32>
    %1079 = arith.mulf %1078, %1077 : vector<8x32xf32>
    %cst_409 = arith.constant 5.000000e-01 : f32
    %1080 = vector.broadcast %cst_409 : f32 to vector<8x32xf32>
    %1081 = arith.addf %1079, %1080 : vector<8x32xf32>
    %1082 = vector.extract_strided_slice %1065 {offsets = [0, 64], sizes = [8, 32], strides = [1, 1]} : vector<8x128xf32> to vector<8x32xf32>
    %1083 = math.tanh %1082 : vector<8x32xf32>
    %1084 = vector.extract_strided_slice %1065 {offsets = [0, 96], sizes = [8, 32], strides = [1, 1]} : vector<8x128xf32> to vector<8x32xf32>
    %cst_410 = arith.constant 5.000000e-01 : f32
    %1085 = vector.broadcast %cst_410 : f32 to vector<8x32xf32>
    %1086 = arith.mulf %1085, %1084 : vector<8x32xf32>
    %1087 = math.tanh %1086 : vector<8x32xf32>
    %cst_411 = arith.constant 5.000000e-01 : f32
    %1088 = vector.broadcast %cst_411 : f32 to vector<8x32xf32>
    %1089 = arith.mulf %1088, %1087 : vector<8x32xf32>
    %cst_412 = arith.constant 5.000000e-01 : f32
    %1090 = vector.broadcast %cst_412 : f32 to vector<8x32xf32>
    %1091 = arith.addf %1089, %1090 : vector<8x32xf32>
    %1092 = arith.mulf %1081, %1044 : vector<8x32xf32>
    %1093 = arith.mulf %1073, %1083 : vector<8x32xf32>
    %1094 = arith.addf %1092, %1093 : vector<8x32xf32>
    %1095 = math.tanh %1094 : vector<8x32xf32>
    %1096 = arith.mulf %1091, %1095 : vector<8x32xf32>
    %cst_413 = arith.constant dense<0.000000e+00> : vector<8x144xf32>
    %1097 = tpu.matmul %1096, %958, %cst_413 {dimension_numbers = #tpu.dot_dimension_numbers<[1], [0], [0], [1], [0, 0, 1, 1], [], []>} : vector<8x32xf32>, vector<32x144xf32>, vector<8x144xf32> -> vector<8x144xf32>
    %1098 = vector.broadcast %959 : vector<1x144xf32> to vector<8x144xf32>
    %1099 = arith.addf %1097, %1098 : vector<8x144xf32>
    %1100 = vector.extract_strided_slice %1099 {offsets = [0, 128], sizes = [8, 16], strides = [1, 1]} : vector<8x144xf32> to vector<8x16xf32>
    %cst_414 = arith.constant dense<0xFF800000> : vector<8xf32>
    %1101 = vector.multi_reduction <maximumf>, %1100, %cst_414 [1] : vector<8x16xf32> to vector<8xf32>
    %1102 = vector.shape_cast %1101 : vector<8xf32> to vector<8x1xf32>
    %1103 = vector.broadcast %1102 : vector<8x1xf32> to vector<8x16xf32>
    %1104 = arith.cmpf oeq, %1100, %1103 : vector<8x16xf32>
    %c16_i32_415 = arith.constant 16 : i32
    %1105 = vector.broadcast %c16_i32_415 : i32 to vector<8x16xi32>
    %1106 = arith.select %1104, %961, %1105 : vector<8x16xi1>, vector<8x16xi32>
    %cst_416 = arith.constant dense<2147483647> : vector<8xi32>
    %1107 = vector.multi_reduction <minsi>, %1106, %cst_416 [1] : vector<8x16xi32> to vector<8xi32>
    %1108 = vector.shape_cast %1107 : vector<8xi32> to vector<8x1xi32>
    %1109 = vector.broadcast %1108 : vector<8x1xi32> to vector<8x16xi32>
    %1110 = arith.cmpi eq, %961, %1109 : vector<8x16xi32>
    %1111 = arith.extui %1110 : vector<8x16xi1> to vector<8x16xi32>
    %1112 = arith.sitofp %1111 : vector<8x16xi32> to vector<8x16xf32>
    %cst_417 = arith.constant dense<0.000000e+00> : vector<8x128xf32>
    %1113 = tpu.matmul %1112, %960, %cst_417 {dimension_numbers = #tpu.dot_dimension_numbers<[1], [0], [0], [1], [0, 0, 1, 1], [], []>} : vector<8x16xf32>, vector<16x128xf32>, vector<8x128xf32> -> vector<8x128xf32>
    %1114 = vector.extract_strided_slice %1099 {offsets = [0, 0], sizes = [8, 128], strides = [1, 1]} : vector<8x144xf32> to vector<8x128xf32>
    %1115 = arith.addf %1114, %1113 : vector<8x128xf32>
    %1116 = vector.extract_strided_slice %1115 {offsets = [0, 0], sizes = [8, 32], strides = [1, 1]} : vector<8x128xf32> to vector<8x32xf32>
    %cst_418 = arith.constant 5.000000e-01 : f32
    %1117 = vector.broadcast %cst_418 : f32 to vector<8x32xf32>
    %1118 = arith.mulf %1117, %1116 : vector<8x32xf32>
    %1119 = math.tanh %1118 : vector<8x32xf32>
    %cst_419 = arith.constant 5.000000e-01 : f32
    %1120 = vector.broadcast %cst_419 : f32 to vector<8x32xf32>
    %1121 = arith.mulf %1120, %1119 : vector<8x32xf32>
    %cst_420 = arith.constant 5.000000e-01 : f32
    %1122 = vector.broadcast %cst_420 : f32 to vector<8x32xf32>
    %1123 = arith.addf %1121, %1122 : vector<8x32xf32>
    %1124 = vector.extract_strided_slice %1115 {offsets = [0, 32], sizes = [8, 32], strides = [1, 1]} : vector<8x128xf32> to vector<8x32xf32>
    %cst_421 = arith.constant 5.000000e-01 : f32
    %1125 = vector.broadcast %cst_421 : f32 to vector<8x32xf32>
    %1126 = arith.mulf %1125, %1124 : vector<8x32xf32>
    %1127 = math.tanh %1126 : vector<8x32xf32>
    %cst_422 = arith.constant 5.000000e-01 : f32
    %1128 = vector.broadcast %cst_422 : f32 to vector<8x32xf32>
    %1129 = arith.mulf %1128, %1127 : vector<8x32xf32>
    %cst_423 = arith.constant 5.000000e-01 : f32
    %1130 = vector.broadcast %cst_423 : f32 to vector<8x32xf32>
    %1131 = arith.addf %1129, %1130 : vector<8x32xf32>
    %1132 = vector.extract_strided_slice %1115 {offsets = [0, 64], sizes = [8, 32], strides = [1, 1]} : vector<8x128xf32> to vector<8x32xf32>
    %1133 = math.tanh %1132 : vector<8x32xf32>
    %1134 = vector.extract_strided_slice %1115 {offsets = [0, 96], sizes = [8, 32], strides = [1, 1]} : vector<8x128xf32> to vector<8x32xf32>
    %cst_424 = arith.constant 5.000000e-01 : f32
    %1135 = vector.broadcast %cst_424 : f32 to vector<8x32xf32>
    %1136 = arith.mulf %1135, %1134 : vector<8x32xf32>
    %1137 = math.tanh %1136 : vector<8x32xf32>
    %cst_425 = arith.constant 5.000000e-01 : f32
    %1138 = vector.broadcast %cst_425 : f32 to vector<8x32xf32>
    %1139 = arith.mulf %1138, %1137 : vector<8x32xf32>
    %cst_426 = arith.constant 5.000000e-01 : f32
    %1140 = vector.broadcast %cst_426 : f32 to vector<8x32xf32>
    %1141 = arith.addf %1139, %1140 : vector<8x32xf32>
    %1142 = arith.mulf %1131, %1094 : vector<8x32xf32>
    %1143 = arith.mulf %1123, %1133 : vector<8x32xf32>
    %1144 = arith.addf %1142, %1143 : vector<8x32xf32>
    %1145 = math.tanh %1144 : vector<8x32xf32>
    %1146 = arith.mulf %1141, %1145 : vector<8x32xf32>
    %cst_427 = arith.constant dense<0.000000e+00> : vector<8x144xf32>
    %1147 = tpu.matmul %1146, %958, %cst_427 {dimension_numbers = #tpu.dot_dimension_numbers<[1], [0], [0], [1], [0, 0, 1, 1], [], []>} : vector<8x32xf32>, vector<32x144xf32>, vector<8x144xf32> -> vector<8x144xf32>
    %1148 = vector.broadcast %959 : vector<1x144xf32> to vector<8x144xf32>
    %1149 = arith.addf %1147, %1148 : vector<8x144xf32>
    %1150 = vector.extract_strided_slice %1149 {offsets = [0, 128], sizes = [8, 16], strides = [1, 1]} : vector<8x144xf32> to vector<8x16xf32>
    %cst_428 = arith.constant dense<0xFF800000> : vector<8xf32>
    %1151 = vector.multi_reduction <maximumf>, %1150, %cst_428 [1] : vector<8x16xf32> to vector<8xf32>
    %1152 = vector.shape_cast %1151 : vector<8xf32> to vector<8x1xf32>
    %1153 = vector.broadcast %1152 : vector<8x1xf32> to vector<8x16xf32>
    %1154 = arith.cmpf oeq, %1150, %1153 : vector<8x16xf32>
    %c16_i32_429 = arith.constant 16 : i32
    %1155 = vector.broadcast %c16_i32_429 : i32 to vector<8x16xi32>
    %1156 = arith.select %1154, %961, %1155 : vector<8x16xi1>, vector<8x16xi32>
    %cst_430 = arith.constant dense<2147483647> : vector<8xi32>
    %1157 = vector.multi_reduction <minsi>, %1156, %cst_430 [1] : vector<8x16xi32> to vector<8xi32>
    %1158 = vector.shape_cast %1157 : vector<8xi32> to vector<8x1xi32>
    %1159 = vector.broadcast %1158 : vector<8x1xi32> to vector<8x16xi32>
    %1160 = arith.cmpi eq, %961, %1159 : vector<8x16xi32>
    %1161 = arith.extui %1160 : vector<8x16xi1> to vector<8x16xi32>
    %1162 = arith.sitofp %1161 : vector<8x16xi32> to vector<8x16xf32>
    %cst_431 = arith.constant dense<0.000000e+00> : vector<8x128xf32>
    %1163 = tpu.matmul %1162, %960, %cst_431 {dimension_numbers = #tpu.dot_dimension_numbers<[1], [0], [0], [1], [0, 0, 1, 1], [], []>} : vector<8x16xf32>, vector<16x128xf32>, vector<8x128xf32> -> vector<8x128xf32>
    %1164 = vector.extract_strided_slice %1149 {offsets = [0, 0], sizes = [8, 128], strides = [1, 1]} : vector<8x144xf32> to vector<8x128xf32>
    %1165 = arith.addf %1164, %1163 : vector<8x128xf32>
    %1166 = vector.extract_strided_slice %1165 {offsets = [0, 0], sizes = [8, 32], strides = [1, 1]} : vector<8x128xf32> to vector<8x32xf32>
    %cst_432 = arith.constant 5.000000e-01 : f32
    %1167 = vector.broadcast %cst_432 : f32 to vector<8x32xf32>
    %1168 = arith.mulf %1167, %1166 : vector<8x32xf32>
    %1169 = math.tanh %1168 : vector<8x32xf32>
    %cst_433 = arith.constant 5.000000e-01 : f32
    %1170 = vector.broadcast %cst_433 : f32 to vector<8x32xf32>
    %1171 = arith.mulf %1170, %1169 : vector<8x32xf32>
    %cst_434 = arith.constant 5.000000e-01 : f32
    %1172 = vector.broadcast %cst_434 : f32 to vector<8x32xf32>
    %1173 = arith.addf %1171, %1172 : vector<8x32xf32>
    %1174 = vector.extract_strided_slice %1165 {offsets = [0, 32], sizes = [8, 32], strides = [1, 1]} : vector<8x128xf32> to vector<8x32xf32>
    %cst_435 = arith.constant 5.000000e-01 : f32
    %1175 = vector.broadcast %cst_435 : f32 to vector<8x32xf32>
    %1176 = arith.mulf %1175, %1174 : vector<8x32xf32>
    %1177 = math.tanh %1176 : vector<8x32xf32>
    %cst_436 = arith.constant 5.000000e-01 : f32
    %1178 = vector.broadcast %cst_436 : f32 to vector<8x32xf32>
    %1179 = arith.mulf %1178, %1177 : vector<8x32xf32>
    %cst_437 = arith.constant 5.000000e-01 : f32
    %1180 = vector.broadcast %cst_437 : f32 to vector<8x32xf32>
    %1181 = arith.addf %1179, %1180 : vector<8x32xf32>
    %1182 = vector.extract_strided_slice %1165 {offsets = [0, 64], sizes = [8, 32], strides = [1, 1]} : vector<8x128xf32> to vector<8x32xf32>
    %1183 = math.tanh %1182 : vector<8x32xf32>
    %1184 = vector.extract_strided_slice %1165 {offsets = [0, 96], sizes = [8, 32], strides = [1, 1]} : vector<8x128xf32> to vector<8x32xf32>
    %cst_438 = arith.constant 5.000000e-01 : f32
    %1185 = vector.broadcast %cst_438 : f32 to vector<8x32xf32>
    %1186 = arith.mulf %1185, %1184 : vector<8x32xf32>
    %1187 = math.tanh %1186 : vector<8x32xf32>
    %cst_439 = arith.constant 5.000000e-01 : f32
    %1188 = vector.broadcast %cst_439 : f32 to vector<8x32xf32>
    %1189 = arith.mulf %1188, %1187 : vector<8x32xf32>
    %cst_440 = arith.constant 5.000000e-01 : f32
    %1190 = vector.broadcast %cst_440 : f32 to vector<8x32xf32>
    %1191 = arith.addf %1189, %1190 : vector<8x32xf32>
    %1192 = arith.mulf %1181, %1144 : vector<8x32xf32>
    %1193 = arith.mulf %1173, %1183 : vector<8x32xf32>
    %1194 = arith.addf %1192, %1193 : vector<8x32xf32>
    %1195 = math.tanh %1194 : vector<8x32xf32>
    %1196 = arith.mulf %1191, %1195 : vector<8x32xf32>
    %cst_441 = arith.constant dense<0.000000e+00> : vector<8x144xf32>
    %1197 = tpu.matmul %1196, %958, %cst_441 {dimension_numbers = #tpu.dot_dimension_numbers<[1], [0], [0], [1], [0, 0, 1, 1], [], []>} : vector<8x32xf32>, vector<32x144xf32>, vector<8x144xf32> -> vector<8x144xf32>
    %1198 = vector.broadcast %959 : vector<1x144xf32> to vector<8x144xf32>
    %1199 = arith.addf %1197, %1198 : vector<8x144xf32>
    %1200 = vector.extract_strided_slice %1199 {offsets = [0, 128], sizes = [8, 16], strides = [1, 1]} : vector<8x144xf32> to vector<8x16xf32>
    %cst_442 = arith.constant dense<0xFF800000> : vector<8xf32>
    %1201 = vector.multi_reduction <maximumf>, %1200, %cst_442 [1] : vector<8x16xf32> to vector<8xf32>
    %1202 = vector.shape_cast %1201 : vector<8xf32> to vector<8x1xf32>
    %1203 = vector.broadcast %1202 : vector<8x1xf32> to vector<8x16xf32>
    %1204 = arith.cmpf oeq, %1200, %1203 : vector<8x16xf32>
    %c16_i32_443 = arith.constant 16 : i32
    %1205 = vector.broadcast %c16_i32_443 : i32 to vector<8x16xi32>
    %1206 = arith.select %1204, %961, %1205 : vector<8x16xi1>, vector<8x16xi32>
    %cst_444 = arith.constant dense<2147483647> : vector<8xi32>
    %1207 = vector.multi_reduction <minsi>, %1206, %cst_444 [1] : vector<8x16xi32> to vector<8xi32>
    %1208 = vector.shape_cast %1207 : vector<8xi32> to vector<8x1xi32>
    %1209 = vector.broadcast %1208 : vector<8x1xi32> to vector<8x16xi32>
    %1210 = arith.cmpi eq, %961, %1209 : vector<8x16xi32>
    %1211 = arith.extui %1210 : vector<8x16xi1> to vector<8x16xi32>
    %1212 = arith.sitofp %1211 : vector<8x16xi32> to vector<8x16xf32>
    %cst_445 = arith.constant dense<0.000000e+00> : vector<8x128xf32>
    %1213 = tpu.matmul %1212, %960, %cst_445 {dimension_numbers = #tpu.dot_dimension_numbers<[1], [0], [0], [1], [0, 0, 1, 1], [], []>} : vector<8x16xf32>, vector<16x128xf32>, vector<8x128xf32> -> vector<8x128xf32>
    %1214 = vector.extract_strided_slice %1199 {offsets = [0, 0], sizes = [8, 128], strides = [1, 1]} : vector<8x144xf32> to vector<8x128xf32>
    %1215 = arith.addf %1214, %1213 : vector<8x128xf32>
    %1216 = vector.extract_strided_slice %1215 {offsets = [0, 0], sizes = [8, 32], strides = [1, 1]} : vector<8x128xf32> to vector<8x32xf32>
    %cst_446 = arith.constant 5.000000e-01 : f32
    %1217 = vector.broadcast %cst_446 : f32 to vector<8x32xf32>
    %1218 = arith.mulf %1217, %1216 : vector<8x32xf32>
    %1219 = math.tanh %1218 : vector<8x32xf32>
    %cst_447 = arith.constant 5.000000e-01 : f32
    %1220 = vector.broadcast %cst_447 : f32 to vector<8x32xf32>
    %1221 = arith.mulf %1220, %1219 : vector<8x32xf32>
    %cst_448 = arith.constant 5.000000e-01 : f32
    %1222 = vector.broadcast %cst_448 : f32 to vector<8x32xf32>
    %1223 = arith.addf %1221, %1222 : vector<8x32xf32>
    %1224 = vector.extract_strided_slice %1215 {offsets = [0, 32], sizes = [8, 32], strides = [1, 1]} : vector<8x128xf32> to vector<8x32xf32>
    %cst_449 = arith.constant 5.000000e-01 : f32
    %1225 = vector.broadcast %cst_449 : f32 to vector<8x32xf32>
    %1226 = arith.mulf %1225, %1224 : vector<8x32xf32>
    %1227 = math.tanh %1226 : vector<8x32xf32>
    %cst_450 = arith.constant 5.000000e-01 : f32
    %1228 = vector.broadcast %cst_450 : f32 to vector<8x32xf32>
    %1229 = arith.mulf %1228, %1227 : vector<8x32xf32>
    %cst_451 = arith.constant 5.000000e-01 : f32
    %1230 = vector.broadcast %cst_451 : f32 to vector<8x32xf32>
    %1231 = arith.addf %1229, %1230 : vector<8x32xf32>
    %1232 = vector.extract_strided_slice %1215 {offsets = [0, 64], sizes = [8, 32], strides = [1, 1]} : vector<8x128xf32> to vector<8x32xf32>
    %1233 = math.tanh %1232 : vector<8x32xf32>
    %1234 = vector.extract_strided_slice %1215 {offsets = [0, 96], sizes = [8, 32], strides = [1, 1]} : vector<8x128xf32> to vector<8x32xf32>
    %cst_452 = arith.constant 5.000000e-01 : f32
    %1235 = vector.broadcast %cst_452 : f32 to vector<8x32xf32>
    %1236 = arith.mulf %1235, %1234 : vector<8x32xf32>
    %1237 = math.tanh %1236 : vector<8x32xf32>
    %cst_453 = arith.constant 5.000000e-01 : f32
    %1238 = vector.broadcast %cst_453 : f32 to vector<8x32xf32>
    %1239 = arith.mulf %1238, %1237 : vector<8x32xf32>
    %cst_454 = arith.constant 5.000000e-01 : f32
    %1240 = vector.broadcast %cst_454 : f32 to vector<8x32xf32>
    %1241 = arith.addf %1239, %1240 : vector<8x32xf32>
    %1242 = arith.mulf %1231, %1194 : vector<8x32xf32>
    %1243 = arith.mulf %1223, %1233 : vector<8x32xf32>
    %1244 = arith.addf %1242, %1243 : vector<8x32xf32>
    %1245 = math.tanh %1244 : vector<8x32xf32>
    %1246 = arith.mulf %1241, %1245 : vector<8x32xf32>
    %cst_455 = arith.constant dense<0.000000e+00> : vector<8x144xf32>
    %1247 = tpu.matmul %1246, %958, %cst_455 {dimension_numbers = #tpu.dot_dimension_numbers<[1], [0], [0], [1], [0, 0, 1, 1], [], []>} : vector<8x32xf32>, vector<32x144xf32>, vector<8x144xf32> -> vector<8x144xf32>
    %1248 = vector.broadcast %959 : vector<1x144xf32> to vector<8x144xf32>
    %1249 = arith.addf %1247, %1248 : vector<8x144xf32>
    %1250 = vector.extract_strided_slice %1249 {offsets = [0, 128], sizes = [8, 16], strides = [1, 1]} : vector<8x144xf32> to vector<8x16xf32>
    %cst_456 = arith.constant dense<0xFF800000> : vector<8xf32>
    %1251 = vector.multi_reduction <maximumf>, %1250, %cst_456 [1] : vector<8x16xf32> to vector<8xf32>
    %1252 = vector.shape_cast %1251 : vector<8xf32> to vector<8x1xf32>
    %1253 = vector.broadcast %1252 : vector<8x1xf32> to vector<8x16xf32>
    %1254 = arith.cmpf oeq, %1250, %1253 : vector<8x16xf32>
    %c16_i32_457 = arith.constant 16 : i32
    %1255 = vector.broadcast %c16_i32_457 : i32 to vector<8x16xi32>
    %1256 = arith.select %1254, %961, %1255 : vector<8x16xi1>, vector<8x16xi32>
    %cst_458 = arith.constant dense<2147483647> : vector<8xi32>
    %1257 = vector.multi_reduction <minsi>, %1256, %cst_458 [1] : vector<8x16xi32> to vector<8xi32>
    %1258 = vector.shape_cast %1257 : vector<8xi32> to vector<8x1xi32>
    %1259 = vector.broadcast %1258 : vector<8x1xi32> to vector<8x16xi32>
    %1260 = arith.cmpi eq, %961, %1259 : vector<8x16xi32>
    %1261 = arith.extui %1260 : vector<8x16xi1> to vector<8x16xi32>
    %1262 = arith.sitofp %1261 : vector<8x16xi32> to vector<8x16xf32>
    %cst_459 = arith.constant dense<0.000000e+00> : vector<8x128xf32>
    %1263 = tpu.matmul %1262, %960, %cst_459 {dimension_numbers = #tpu.dot_dimension_numbers<[1], [0], [0], [1], [0, 0, 1, 1], [], []>} : vector<8x16xf32>, vector<16x128xf32>, vector<8x128xf32> -> vector<8x128xf32>
    %1264 = vector.extract_strided_slice %1249 {offsets = [0, 0], sizes = [8, 128], strides = [1, 1]} : vector<8x144xf32> to vector<8x128xf32>
    %1265 = arith.addf %1264, %1263 : vector<8x128xf32>
    %1266 = vector.extract_strided_slice %1265 {offsets = [0, 0], sizes = [8, 32], strides = [1, 1]} : vector<8x128xf32> to vector<8x32xf32>
    %cst_460 = arith.constant 5.000000e-01 : f32
    %1267 = vector.broadcast %cst_460 : f32 to vector<8x32xf32>
    %1268 = arith.mulf %1267, %1266 : vector<8x32xf32>
    %1269 = math.tanh %1268 : vector<8x32xf32>
    %cst_461 = arith.constant 5.000000e-01 : f32
    %1270 = vector.broadcast %cst_461 : f32 to vector<8x32xf32>
    %1271 = arith.mulf %1270, %1269 : vector<8x32xf32>
    %cst_462 = arith.constant 5.000000e-01 : f32
    %1272 = vector.broadcast %cst_462 : f32 to vector<8x32xf32>
    %1273 = arith.addf %1271, %1272 : vector<8x32xf32>
    %1274 = vector.extract_strided_slice %1265 {offsets = [0, 32], sizes = [8, 32], strides = [1, 1]} : vector<8x128xf32> to vector<8x32xf32>
    %cst_463 = arith.constant 5.000000e-01 : f32
    %1275 = vector.broadcast %cst_463 : f32 to vector<8x32xf32>
    %1276 = arith.mulf %1275, %1274 : vector<8x32xf32>
    %1277 = math.tanh %1276 : vector<8x32xf32>
    %cst_464 = arith.constant 5.000000e-01 : f32
    %1278 = vector.broadcast %cst_464 : f32 to vector<8x32xf32>
    %1279 = arith.mulf %1278, %1277 : vector<8x32xf32>
    %cst_465 = arith.constant 5.000000e-01 : f32
    %1280 = vector.broadcast %cst_465 : f32 to vector<8x32xf32>
    %1281 = arith.addf %1279, %1280 : vector<8x32xf32>
    %1282 = vector.extract_strided_slice %1265 {offsets = [0, 64], sizes = [8, 32], strides = [1, 1]} : vector<8x128xf32> to vector<8x32xf32>
    %1283 = math.tanh %1282 : vector<8x32xf32>
    %1284 = vector.extract_strided_slice %1265 {offsets = [0, 96], sizes = [8, 32], strides = [1, 1]} : vector<8x128xf32> to vector<8x32xf32>
    %cst_466 = arith.constant 5.000000e-01 : f32
    %1285 = vector.broadcast %cst_466 : f32 to vector<8x32xf32>
    %1286 = arith.mulf %1285, %1284 : vector<8x32xf32>
    %1287 = math.tanh %1286 : vector<8x32xf32>
    %cst_467 = arith.constant 5.000000e-01 : f32
    %1288 = vector.broadcast %cst_467 : f32 to vector<8x32xf32>
    %1289 = arith.mulf %1288, %1287 : vector<8x32xf32>
    %cst_468 = arith.constant 5.000000e-01 : f32
    %1290 = vector.broadcast %cst_468 : f32 to vector<8x32xf32>
    %1291 = arith.addf %1289, %1290 : vector<8x32xf32>
    %1292 = arith.mulf %1281, %1244 : vector<8x32xf32>
    %1293 = arith.mulf %1273, %1283 : vector<8x32xf32>
    %1294 = arith.addf %1292, %1293 : vector<8x32xf32>
    %1295 = math.tanh %1294 : vector<8x32xf32>
    %1296 = arith.mulf %1291, %1295 : vector<8x32xf32>
    %cst_469 = arith.constant dense<0.000000e+00> : vector<8x144xf32>
    %1297 = tpu.matmul %1296, %958, %cst_469 {dimension_numbers = #tpu.dot_dimension_numbers<[1], [0], [0], [1], [0, 0, 1, 1], [], []>} : vector<8x32xf32>, vector<32x144xf32>, vector<8x144xf32> -> vector<8x144xf32>
    %1298 = vector.broadcast %959 : vector<1x144xf32> to vector<8x144xf32>
    %1299 = arith.addf %1297, %1298 : vector<8x144xf32>
    %1300 = vector.extract_strided_slice %1299 {offsets = [0, 128], sizes = [8, 16], strides = [1, 1]} : vector<8x144xf32> to vector<8x16xf32>
    %cst_470 = arith.constant dense<0xFF800000> : vector<8xf32>
    %1301 = vector.multi_reduction <maximumf>, %1300, %cst_470 [1] : vector<8x16xf32> to vector<8xf32>
    %1302 = vector.shape_cast %1301 : vector<8xf32> to vector<8x1xf32>
    %1303 = vector.broadcast %1302 : vector<8x1xf32> to vector<8x16xf32>
    %1304 = arith.cmpf oeq, %1300, %1303 : vector<8x16xf32>
    %c16_i32_471 = arith.constant 16 : i32
    %1305 = vector.broadcast %c16_i32_471 : i32 to vector<8x16xi32>
    %1306 = arith.select %1304, %961, %1305 : vector<8x16xi1>, vector<8x16xi32>
    %cst_472 = arith.constant dense<2147483647> : vector<8xi32>
    %1307 = vector.multi_reduction <minsi>, %1306, %cst_472 [1] : vector<8x16xi32> to vector<8xi32>
    %1308 = vector.shape_cast %1307 : vector<8xi32> to vector<8x1xi32>
    %1309 = vector.broadcast %1308 : vector<8x1xi32> to vector<8x16xi32>
    %1310 = arith.cmpi eq, %961, %1309 : vector<8x16xi32>
    %1311 = arith.extui %1310 : vector<8x16xi1> to vector<8x16xi32>
    %1312 = arith.sitofp %1311 : vector<8x16xi32> to vector<8x16xf32>
    %cst_473 = arith.constant dense<0.000000e+00> : vector<8x128xf32>
    %1313 = tpu.matmul %1312, %960, %cst_473 {dimension_numbers = #tpu.dot_dimension_numbers<[1], [0], [0], [1], [0, 0, 1, 1], [], []>} : vector<8x16xf32>, vector<16x128xf32>, vector<8x128xf32> -> vector<8x128xf32>
    %1314 = vector.extract_strided_slice %1299 {offsets = [0, 0], sizes = [8, 128], strides = [1, 1]} : vector<8x144xf32> to vector<8x128xf32>
    %1315 = arith.addf %1314, %1313 : vector<8x128xf32>
    %1316 = vector.extract_strided_slice %1315 {offsets = [0, 0], sizes = [8, 32], strides = [1, 1]} : vector<8x128xf32> to vector<8x32xf32>
    %cst_474 = arith.constant 5.000000e-01 : f32
    %1317 = vector.broadcast %cst_474 : f32 to vector<8x32xf32>
    %1318 = arith.mulf %1317, %1316 : vector<8x32xf32>
    %1319 = math.tanh %1318 : vector<8x32xf32>
    %cst_475 = arith.constant 5.000000e-01 : f32
    %1320 = vector.broadcast %cst_475 : f32 to vector<8x32xf32>
    %1321 = arith.mulf %1320, %1319 : vector<8x32xf32>
    %cst_476 = arith.constant 5.000000e-01 : f32
    %1322 = vector.broadcast %cst_476 : f32 to vector<8x32xf32>
    %1323 = arith.addf %1321, %1322 : vector<8x32xf32>
    %1324 = vector.extract_strided_slice %1315 {offsets = [0, 32], sizes = [8, 32], strides = [1, 1]} : vector<8x128xf32> to vector<8x32xf32>
    %cst_477 = arith.constant 5.000000e-01 : f32
    %1325 = vector.broadcast %cst_477 : f32 to vector<8x32xf32>
    %1326 = arith.mulf %1325, %1324 : vector<8x32xf32>
    %1327 = math.tanh %1326 : vector<8x32xf32>
    %cst_478 = arith.constant 5.000000e-01 : f32
    %1328 = vector.broadcast %cst_478 : f32 to vector<8x32xf32>
    %1329 = arith.mulf %1328, %1327 : vector<8x32xf32>
    %cst_479 = arith.constant 5.000000e-01 : f32
    %1330 = vector.broadcast %cst_479 : f32 to vector<8x32xf32>
    %1331 = arith.addf %1329, %1330 : vector<8x32xf32>
    %1332 = vector.extract_strided_slice %1315 {offsets = [0, 64], sizes = [8, 32], strides = [1, 1]} : vector<8x128xf32> to vector<8x32xf32>
    %1333 = math.tanh %1332 : vector<8x32xf32>
    %1334 = vector.extract_strided_slice %1315 {offsets = [0, 96], sizes = [8, 32], strides = [1, 1]} : vector<8x128xf32> to vector<8x32xf32>
    %cst_480 = arith.constant 5.000000e-01 : f32
    %1335 = vector.broadcast %cst_480 : f32 to vector<8x32xf32>
    %1336 = arith.mulf %1335, %1334 : vector<8x32xf32>
    %1337 = math.tanh %1336 : vector<8x32xf32>
    %cst_481 = arith.constant 5.000000e-01 : f32
    %1338 = vector.broadcast %cst_481 : f32 to vector<8x32xf32>
    %1339 = arith.mulf %1338, %1337 : vector<8x32xf32>
    %cst_482 = arith.constant 5.000000e-01 : f32
    %1340 = vector.broadcast %cst_482 : f32 to vector<8x32xf32>
    %1341 = arith.addf %1339, %1340 : vector<8x32xf32>
    %1342 = arith.mulf %1331, %1294 : vector<8x32xf32>
    %1343 = arith.mulf %1323, %1333 : vector<8x32xf32>
    %1344 = arith.addf %1342, %1343 : vector<8x32xf32>
    %1345 = math.tanh %1344 : vector<8x32xf32>
    %1346 = arith.mulf %1341, %1345 : vector<8x32xf32>
    %cst_483 = arith.constant dense<0.000000e+00> : vector<8x144xf32>
    %1347 = tpu.matmul %1346, %958, %cst_483 {dimension_numbers = #tpu.dot_dimension_numbers<[1], [0], [0], [1], [0, 0, 1, 1], [], []>} : vector<8x32xf32>, vector<32x144xf32>, vector<8x144xf32> -> vector<8x144xf32>
    %1348 = vector.broadcast %959 : vector<1x144xf32> to vector<8x144xf32>
    %1349 = arith.addf %1347, %1348 : vector<8x144xf32>
    %1350 = vector.extract_strided_slice %1349 {offsets = [0, 128], sizes = [8, 16], strides = [1, 1]} : vector<8x144xf32> to vector<8x16xf32>
    %1351 = tpu.concatenate %1000, %1050, %1100, %1150, %1200, %1250, %1300, %1350 in 1 : vector<8x16xf32>, vector<8x16xf32>, vector<8x16xf32>, vector<8x16xf32>, vector<8x16xf32>, vector<8x16xf32>, vector<8x16xf32>, vector<8x16xf32> -> vector<8x128xf32>
    %c0_484 = arith.constant 0 : index
    %c0_485 = arith.constant 0 : index
    %1352 = vector.load %arg9[%c0_484, %c0_485] : memref<8x128xf32, #tpu.memory_space<vmem>>, vector<8x128xf32>
    tpu.vector_store %arg9[%c0_484, %c0_485], %1351 {strides = array<i32>} : memref<8x128xf32, #tpu.memory_space<vmem>>, vector<8x128xf32>,
    return
  }
}

</mosaic_0001>

<bundles_post_ra>
// kernel: recurrent_autoencoder_forward.1
= control target key start
LH: loop header
LB: loop body
LE: loop exit
PB: predicated region body
PF: predicated region fallthrough
CT: control target
= control target key end

     0   :  { %16 = vsyncpa [#allocation6], 0  ;;  %s6030_s0 = inlined_call_operand.vmem [shape: s32[64,1], index: 0, kind: input, shape index: {}]   ;;  %s6031_s1 = inlined_call_operand.vmem [shape: f32[16,256], index: 1, kind: input, shape index: {}]   ;;  %s6032_s2 = inlined_call_operand.vmem [shape: f32[32,256], index: 2, kind: input, shape index: {}]   ;;  %s6033_s3 = inlined_call_operand.hbm [shape: f32[32,256], index: 3, kind: input, shape index: {}]   ;;  %s6034_s4 = inlined_call_operand.hbm [shape: f32[32,128], index: 4, kind: input, shape index: {}]   ;;  %s6035_s5 = inlined_call_operand.vmem [shape: f32[1,128], index: 5, kind: input, shape index: {}]   ;;  %s6036_s6 = inlined_call_operand.hbm [shape: f32[32,144], index: 6, kind: input, shape index: {}]   ;;  %s6037_s7 = inlined_call_operand.vmem [shape: f32[1,144], index: 7, kind: input, shape index: {}]   ;;  %s6038_s8 = inlined_call_operand.hbm [shape: f32[16,128], index: 8, kind: input, shape index: {}]   ;;  %s6039_s9 = inlined_call_operand.vmem [shape: f32[8,128], index: 9, kind: output, shape index: {0}]   ;;  %s6040_s10 = inlined_call_operand.hbm [shape: f32[8,32], index: 10, kind: output, shape index: {1}]  }
   0x1   :  { %17 = vsyncpa [#allocation9], 0 }
   0x2   :  { %18 = vsyncpa [#allocation12], 0 }
   0x3   :  { %19 = vsyncpa [#allocation7], 0  ;;  %s4980_s13 = smov [#allocation8]  }
   0x4   :  { %s43_s14 = sshll.u32 %s4980_s13, 4  ;;  %s44_s14 = int_to_ptr.vmem [resolvable:$true] %s43_s14 }
   0x5   :  { %s4880_s15 = scalar_lea.vmem %s44_s14, 512  ;;  %p4885_p1 = scmp.lt.s32.totalorder %s44_s14, %s44_s14 }
   0x6   :  { %p4881_p0 = scmp.ne.s32.totalorder %s44_s14, %s4880_s15  ;;  %p4886_p2 = scmp.lt.s32.totalorder %s4880_s15, %s4880_s15 }
   0x8   :  { %p4887_p3 = por %p4886_p2, %p4885_p1 }
   0xa   :  { %p4888_p4 = pnand %p4887_p3, %p4881_p0 }
   0xc   :  { %4891 = shalt.err (!%p4888_p4)
}
   0xd   :  { %s4981_s16 = smov 128   ;;  %s4982_s17 = smov 8  }
   0xe   :  { %49 = dma.hbm_to_vmem [thread:$0]  %s6034_s4, 512, %s44_s14, [#allocation9], %s4981_s16, %s4981_s16, %s4982_s17  }
   0xf   :  { %s4983_s20 = smov [#allocation5]  }
  0x10   :  { %s31_s21 = sshll.u32 %s4983_s20, 4  ;;  %s32_s21 = int_to_ptr.vmem [resolvable:$true] %s31_s21 }
  0x11   :  { %s4900_s22 = scalar_lea.vmem %s32_s21, 1024  ;;  %p4905_p6 = scmp.lt.s32.totalorder %s32_s21, %s32_s21 }
  0x12   :  { %p4901_p5 = scmp.ne.s32.totalorder %s32_s21, %s4900_s22  ;;  %p4906_p7 = scmp.lt.s32.totalorder %s4900_s22, %s4900_s22 }
  0x14   :  { %p4907_p8 = por %p4906_p7, %p4905_p6 }
  0x16   :  { %p4908_p9 = pnand %p4907_p8, %p4901_p5 }
  0x18   :  { %4911 = shalt.err (!%p4908_p9)
}
  0x19   :  { %s4984_s23 = smov 256   ;;  %s4985_s24 = smov 16  }
  0x1a   :  { %37 = dma.hbm_to_vmem [thread:$0]  %s6033_s3, 1024, %s32_s21, [#allocation6], %s4984_s23, %s4984_s23, %s4985_s24  }
  0x1b   :  { %s4986_s27 = smov [#allocation10]   ;;  %s4987_s4 = smov [#allocation11]  }
  0x1c   :  { %s57_s28 = sshll.u32 %s4986_s27, 4  ;;  %s71_s29 = sshll.u32 %s4987_s4, 4  ;;  %s58_s28 = int_to_ptr.vmem [resolvable:$true] %s57_s28  ;;  %s72_s29 = int_to_ptr.vmem [resolvable:$true] %s71_s29 }
  0x1d   :  { %s4920_s30 = scalar_lea.vmem %s58_s28, 1024  ;;  %p4925_p11 = scmp.lt.s32.totalorder %s58_s28, %s58_s28 }
  0x1e   :  { %p4921_p10 = scmp.ne.s32.totalorder %s58_s28, %s4920_s30  ;;  %p4926_p12 = scmp.lt.s32.totalorder %s4920_s30, %s4920_s30 }
  0x20   :  { %p4927_p13 = por %p4926_p12, %p4925_p11 }
  0x22   :  { %p4928_p0 = pnand %p4927_p13, %p4921_p10 }
  0x24   :  { %4931 = shalt.err (!%p4928_p0)
}
  0x25   :  { %63 = dma.hbm_to_vmem [thread:$0]  %s6036_s6, 1024, %s58_s28, [#allocation9], %s4984_s23, %s4984_s23, %s4985_s24  }
  0x26   :  { %s4940_s13 = scalar_lea.vmem %s72_s29, 256  ;;  %p4945_p2 = scmp.lt.s32.totalorder %s72_s29, %s72_s29 }
  0x27   :  { %p4941_p1 = scmp.ne.s32.totalorder %s72_s29, %s4940_s13  ;;  %p4946_p3 = scmp.lt.s32.totalorder %s4940_s13, %s4940_s13 }
  0x29   :  { %p4947_p4 = por %p4946_p3, %p4945_p2 }
  0x2b   :  { %p4948_p5 = pnand %p4947_p4, %p4941_p1 }
  0x2d   :  { %4951 = shalt.err (!%p4948_p5)
}
  0x2e   :  { %77 = dma.hbm_to_vmem [thread:$0]  %s6038_s8, 256, %s72_s29, [#allocation12], %s4981_s16, %s4981_s16, %s4982_s17  }
  0x2f   :  { %4972 = dma.done.wait [#allocation6], 1024  }
  0x30   :  { %4973 = vsyncadd [#allocation6], 4294966272 }
  0x31   :  { %4974 = dma.done.wait [#allocation9], 1536  }
  0x32   :  { %4975 = vsyncadd [#allocation9], 4294965760 }
  0x33   :  { %4976 = dma.done.wait [#allocation12], 256  }
  0x34   :  { %4977 = vsyncadd [#allocation12], 4294967040  ;;  %v4988_v0 = vmov 0   ;;  %v4989_v1 = vmov 0.0   ;;  %v90_v2 = vld [vmem:[%s6030_s0] sm:$0xff]  ;;  %v151_v3 = vld [vmem:[%s6031_s1 + $0x18] sm:$0xff]  ;;  %v98_v7 = vlaneseq }
  0x35   :  { %4678 = vset.pattern.permute.xlu0 %v4988_v0  ;;  %241 = vmatprep.mubr.f32.mxu0 %v4989_v1  ;;  %v150_v4 = vld [vmem:[%s6031_s1 + $0x10] sm:$0xff]  ;;  %v149_v5 = vld [vmem:[%s6031_s1 + $0x8] sm:$0xff]  ;;  %v148_v6 = vld [vmem:[%s6031_s1] sm:$0xff]  ;;  %vm152_vm0 = vcmask 130048   ;;  %s4990_s1 = smov 64   ;;  %s4991_s11 = smov 32  }
  0x36   :  { %4679 = vset.pattern.permute.xlu1 %v4988_v0  ;;  %416 = vmatprep.mubr.f32.mxu1 %v4989_v1  ;;  %v5091_v8 = vand.u32 127, %v98_v7  ;;  %v91_v13 = vld [vmem:[%s6030_s0 + $0x8] sm:$0xff]  ;;  %v93_v14 = vld [vmem:[%s6030_s0 + $0x18] sm:$0xff]  ;;  %v92_v29 = vld [vmem:[%s6030_s0 + $0x10] sm:$0xff]  ;;  %vm349_vm9 = vcmask 261120   ;;  %vm4992_vm10 = vmmov 0  }
  0x37   :  { %101 = vperm.xlu0 %4678, %v90_v2   ;;  %205 = vmatprep.subr.mxu0 %v151_v3  ;;  %v95_v15 = vld [vmem:[%s6030_s0 + $0x28] sm:$0xff]  ;;  %v97_v16 = vld [vmem:[%s6030_s0 + $0x38] sm:$0xff]  ;;  %v94_v30 = vld [vmem:[%s6030_s0 + $0x20] sm:$0xff]  ;;  %s4994_s13 = smov 80   ;;  %s4995_s3 = smov 96  }
  0x38   :  { %206 = vmatpush1.msra.mxu0 %v150_v4  ;;  %v96_v31 = vld [vmem:[%s6030_s0 + $0x30] sm:$0xff]  ;;  %v5131_v32 = vld [vmem:[%s6032_s2 + $0x38] sm:$0xff]  ;;  %v5141_v34 = vld [vmem:[%s6032_s2 + $0x28] sm:$0xff] }
  0x39   :  { %207 = vmatprep.subr.mxu0 %v149_v5  ;;  %v5136_v33 = vld [vmem:[%s6032_s2 + $0x30] sm:$0xff]  ;;  %376 = vmatprep.subr.mxu1 %v5131_v32  ;;  %v5147_v35 = vld [vmem:[%s6032_s2 + $0x20] sm:$0xff]  ;;  %v5154_v36 = vld [vmem:[%s6032_s2 + $0x18] sm:$0xff] }
  0x3a   :  { %208 = vmatpush1.msra.mxu0 %v148_v6  ;;  %377 = vmatpush1.msra.mxu1 %v5136_v33  ;;  %v5161_v37 = vld [vmem:[%s6032_s2 + $0x10] sm:$0xff]  ;;  %v5168_v38 = vld [vmem:[%s6032_s2 + $0x8] sm:$0xff]  ;;  %v5175_v39 = vld [vmem:[%s6032_s2] sm:$0xff] }
  0x3b   :  { %783 = vmatprep.subr.mxu0 %v5131_v32  ;;  %378 = vmatprep.subr.mxu1 %v5141_v34 }
  0x3c   :  { %379 = vmatpush1.msra.mxu1 %v5147_v35 }
  0x3d   :  { %380 = vmatprep.subr.mxu1 %v5154_v36 }
  0x3e   :  { %381 = vmatpush1.msra.mxu1 %v5161_v37 }
  0x3f   :  { %382 = vmatprep.subr.mxu1 %v5168_v38 }
  0x40   :  { %383 = vmatpush1.msra.mxu1 %v5175_v39 }
  0xb2   :  { %v102_v9 = vpop.permute.xlu0 %101 }
  0xb3   :  { %vm124_vm1 = vcmp.eq.s32.totalorder %v102_v9, %v5091_v8 }
  0xb4   :  { %v4399_v10 = vsel %vm124_vm1, 1.0, %v4989_v1 }
  0xb5   :  { %4407 = vmatmul.mubr.msk.f32.vlgmr.msra.gmra.mxu0 %vm152_vm0, %v4399_v10 }
  0xb6   :  { %247 = vmatprep.mubr.f32.mxu0 %v4989_v1  ;;  %784 = vmatpush1.msra.mxu0 %v5136_v33 }
  0xb7   :  { %785 = vmatprep.subr.mxu0 %v5141_v34 }
  0xb8   :  { %786 = vmatpush1.msra.mxu0 %v5147_v35 }
  0xb9   :  { %787 = vmatprep.subr.mxu0 %v5154_v36 }
  0xba   :  { %788 = vmatpush1.msra.mxu0 %v5161_v37 }
  0xbb   :  { %789 = vmatprep.subr.mxu0 %v5168_v38 }
  0xbc   :  { %790 = vmatpush1.msra.mxu0 %v5175_v39 }
  0xbd   :  { %987 = vmatprep.subr.mxu0 %v5131_v32 }
 0x175   :  { %v243_v11 = vpop.f32.mrf.mxu0 }
 0x176   :  { %4680 = vtanh.f32 %v243_v11  ;;  %v324_v17 = vmul.f32 0.5, %v243_v11 }
 0x177   :  { %v5212_v55 = vpop.f32.mrf.mxu0 }
 0x178   :  { %4682 = vtanh.f32 %v324_v17 }
 0x183   :  { %v4681_v12 = vpop.eup %4680 }
 0x184   :  { %331 = vrot.lane.b32.xlu0 %v4681_v12, %s4990_s1 }
 0x185   :  { %v4683_v18 = vpop.eup %4682 }
 0x186   :  { %v326_v19 = vmul.f32 0.5, %v4683_v18 }
 0x188   :  { %104 = vperm.xlu0 %4678, %v91_v13   ;;  %v327_v20 = vadd.f32 0.5, %v326_v19 }
 0x18a   :  { %v329_v25 = vmul.f32 0.0, %v327_v20 }
 0x18c   :  { %110 = vperm.xlu0 %4678, %v93_v14  }
 0x190   :  { %116 = vperm.xlu0 %4678, %v95_v15  }
 0x194   :  { %122 = vperm.xlu0 %4678, %v97_v16  }
 0x1f6   :  { %v332_v21 = vpop.permute.xlu0 %331 }
 0x1f7   :  { %v334_v22 = vmul.f32 %v332_v21, %v327_v20 }
 0x1f9   :  { %336 = vrot.lane.b32.xlu1 %v334_v22, %s4991_s11 }
 0x203   :  { %v105_v23 = vpop.permute.xlu0 %104 }
 0x204   :  { %vm125_vm2 = vcmp.eq.s32.totalorder %v105_v23, %v5091_v8 }
 0x205   :  { %v4400_v24 = vsel %vm125_vm2, 1.0, %v4989_v1 }
 0x206   :  { %4408 = vmatmul.mubr.msk.f32.gmra.mxu0 %vm152_vm0, %v4400_v24 }
 0x207   :  { %253 = vmatprep.mubr.f32.mxu0 %v4989_v1  ;;  %v111_v42 = vpop.permute.xlu0 %110 }
 0x208   :  { %vm127_vm4 = vcmp.eq.s32.totalorder %v111_v42, %v5091_v8  ;;  %v5252_v42 = vld [vmem:[#allocation5 + $0x30] sm:$0xff] }
 0x209   :  { %v4402_v46 = vsel %vm127_vm4, 1.0, %v4989_v1 }
 0x20b   :  { %v117_v47 = vpop.permute.xlu0 %116 }
 0x20c   :  { %vm129_vm6 = vcmp.eq.s32.totalorder %v117_v47, %v5091_v8  ;;  %v5269_v47 = vld [vmem:[#allocation5] sm:$0xff] }
 0x20d   :  { %v4404_v50 = vsel %vm129_vm6, 1.0, %v4989_v1 }
 0x20f   :  { %v123_v51 = vpop.permute.xlu0 %122 }
 0x210   :  { %vm131_vm8 = vcmp.eq.s32.totalorder %v123_v51, %v5091_v8 }
 0x211   :  { %v4406_v53 = vsel %vm131_vm8, 1.0, %v4989_v1 }
 0x26b   :  { %v337_v26 = vpop.permute.xlu1 %336 }
 0x26c   :  { %v5115_v27 = vadd.f32 %v337_v26, %v329_v25 }
 0x26e   :  { %4684 = vtanh.f32 %v5115_v27 }
 0x27b   :  { %v4685_v28 = vpop.eup %4684 }
 0x27c   :  { %342 = vrot.lane.b32.xlu1 %v4685_v28, %s4990_s1 }
 0x280   :  { %107 = vperm.xlu1 %4679, %v92_v29  }
 0x284   :  { %113 = vperm.xlu1 %4679, %v94_v30  }
 0x288   :  { %119 = vperm.xlu1 %4679, %v96_v31  }
 0x2c6   :  { %v249_v56 = vpop.f32.mrf.mxu0 }
 0x2c8   :  { %v5214_v57 = vpop.f32.mrf.mxu0 }
 0x2ee   :  { %v343_v40 = vpop.permute.xlu1 %342 }
 0x2ef   :  { %v345_v41 = vmul.f32 %v343_v40, %v327_v20 }
 0x2f1   :  { %347 = vrot.lane.b32.xlu1 %v345_v41, %s4991_s11  ;;  %v5250_v41 = vld [vmem:[#allocation5 + $0x38] sm:$0xff] }
 0x2f2   :  { %477 = vmatprep.subr.mxu1 %v5250_v41 }
 0x2fb   :  { %v108_v43 = vpop.permute.xlu1 %107 }
 0x2fc   :  { %vm126_vm3 = vcmp.eq.s32.totalorder %v108_v43, %v5091_v8  ;;  %v5254_v43 = vld [vmem:[#allocation5 + $0x28] sm:$0xff] }
 0x2fd   :  { %v4401_v44 = vsel %vm126_vm3, 1.0, %v4989_v1 }
 0x2fe   :  { %4409 = vmatmul.mubr.msk.f32.gmra.mxu0 %vm152_vm0, %v4401_v44  ;;  %v5257_v44 = vld [vmem:[#allocation5 + $0x20] sm:$0xff] }
 0x2ff   :  { %259 = vmatprep.mubr.f32.mxu0 %v4989_v1  ;;  %v114_v45 = vpop.permute.xlu1 %113 }
 0x300   :  { %vm128_vm5 = vcmp.eq.s32.totalorder %v114_v45, %v5091_v8  ;;  %v5260_v45 = vld [vmem:[#allocation5 + $0x18] sm:$0xff] }
 0x301   :  { %v4403_v48 = vsel %vm128_vm5, 1.0, %v4989_v1 }
 0x302   :  { %4410 = vmatmul.mubr.msk.f32.gmra.mxu0 %vm152_vm0, %v4402_v46  ;;  %v5266_v46 = vld [vmem:[#allocation5 + $0x8] sm:$0xff] }
 0x303   :  { %265 = vmatprep.mubr.f32.mxu0 %v4989_v1  ;;  %v120_v49 = vpop.permute.xlu1 %119 }
 0x304   :  { %vm130_vm7 = vcmp.eq.s32.totalorder %v120_v49, %v5091_v8 }
 0x305   :  { %v4405_v52 = vsel %vm130_vm7, 1.0, %v4989_v1 }
 0x306   :  { %4411 = vmatmul.mubr.msk.f32.gmra.mxu0 %vm152_vm0, %v4403_v48 }
 0x307   :  { %271 = vmatprep.mubr.f32.mxu0 %v4989_v1 }
 0x30a   :  { %4412 = vmatmul.mubr.msk.f32.gmra.mxu0 %vm152_vm0, %v4404_v50 }
 0x30b   :  { %277 = vmatprep.mubr.f32.mxu0 %v4989_v1 }
 0x30e   :  { %4413 = vmatmul.mubr.msk.f32.gmra.mxu0 %vm152_vm0, %v4405_v52 }
 0x30f   :  { %283 = vmatprep.mubr.f32.mxu0 %v4989_v1 }
 0x312   :  { %4414 = vmatmul.mubr.msk.f32.gmra.mxu0 %vm152_vm0, %v4406_v53 }
 0x313   :  { %823 = vmatprep.mubr.f32.mxu0 %v4989_v1 }
 0x363   :  { %v348_v54 = vpop.permute.xlu1 %347 }
 0x364   :  { %4415 = vmatmul.mubr.msk.f32.vlgmr.msra.gmra.mxu1 %vm349_vm9, %v348_v54 }
 0x365   :  { %517 = vmatprep.mubr.f32.mxu1 %v4989_v1  ;;  %478 = vmatpush1.msra.mxu1 %v5252_v42 }
 0x366   :  { %479 = vmatprep.subr.mxu1 %v5254_v43 }
 0x367   :  { %480 = vmatpush1.msra.mxu1 %v5257_v44 }
 0x368   :  { %481 = vmatprep.subr.mxu1 %v5260_v45 }
 0x3be   :  { %v5216_v58 = vpop.f32.mrf.mxu0 }
 0x3c0   :  { %v5218_v59 = vpop.f32.mrf.mxu0 }
 0x3c2   :  { %v5220_v60 = vpop.f32.mrf.mxu0 }
 0x3c4   :  { %v5222_v61 = vpop.f32.mrf.mxu0 }
 0x3c6   :  { %v5224_v62 = vpop.f32.mrf.mxu0 }
 0x3c8   :  { %v5226_v63 = vpop.f32.mrf.mxu0 }
 0x3ca   :  { %v5228_v0 = vpop.f32.mrf.mxu0 }
 0x3cc   :  { %v5230_v2 = vpop.f32.mrf.mxu0 }
 0x3ce   :  { %v5232_v3 = vpop.f32.mrf.mxu0 }
 0x3d0   :  { %v5234_v4 = vpop.f32.mrf.mxu0 }
 0x3d2   :  { %v5236_v5 = vpop.f32.mrf.mxu0 }
 0x3d4   :  { %v287_v6 = vpop.f32.mrf.mxu0 }
 0x3d5   :  { %4686 = vtanh.f32 %v287_v6  ;;  %v426_v13 = vmul.f32 0.5, %v287_v6 }
 0x3e2   :  { %v4687_v9 = vpop.eup %4686 }
 0x3e3   :  { %433 = vrot.lane.b32.xlu0 %v4687_v9, %s4990_s1 }
 0x424   :  { %v418_v10 = vpop.f32.mrf.mxu1 }
 0x425   :  { %v527_v11 = vadd.f32 %v418_v10, %v249_v56 }
 0x426   :  { %v5298_v56 = vpop.f32.mrf.mxu1 }
 0x427   :  { %4688 = vtanh.f32 %v527_v11  ;;  %v528_v19 = vmul.f32 0.5, %v527_v11 }
 0x428   :  { %4690 = vtanh.f32 %v426_v13 }
 0x429   :  { %4692 = vtanh.f32 %v528_v19 }
 0x434   :  { %v4689_v12 = vpop.eup %4688 }
 0x435   :  { %535 = vrot.lane.b32.xlu1 %v4689_v12, %s4990_s1  ;;  %v4691_v14 = vpop.eup %4690 }
 0x436   :  { %v428_v15 = vmul.f32 0.5, %v4691_v14  ;;  %v4693_v20 = vpop.eup %4692 }
 0x437   :  { %v530_v21 = vmul.f32 0.5, %v4693_v20 }
 0x438   :  { %v429_v16 = vadd.f32 0.5, %v428_v15 }
 0x439   :  { %v531_v22 = vadd.f32 0.5, %v530_v21 }
 0x43a   :  { %v431_v25 = vmul.f32 0.0, %v429_v16 }
 0x43b   :  { %v533_v30 = vmul.f32 %v531_v22, %v5115_v27  ;;  %v5263_v27 = vld [vmem:[#allocation5 + $0x10] sm:$0xff] }
 0x43c   :  { %482 = vmatpush1.msra.mxu1 %v5263_v27 }
 0x43d   :  { %483 = vmatprep.subr.mxu1 %v5266_v46 }
 0x43e   :  { %484 = vmatpush1.msra.mxu1 %v5269_v47 }
 0x43f   :  { %579 = vmatprep.subr.mxu1 %v5131_v32 }
 0x455   :  { %v434_v17 = vpop.permute.xlu0 %433 }
 0x456   :  { %v436_v18 = vmul.f32 %v434_v17, %v429_v16 }
 0x458   :  { %438 = vrot.lane.b32.xlu0 %v436_v18, %s4991_s11 }
 0x4a7   :  { %v536_v23 = vpop.permute.xlu1 %535 }
 0x4a8   :  { %v538_v24 = vmul.f32 %v536_v23, %v531_v22 }
 0x4aa   :  { %540 = vrot.lane.b32.xlu1 %v538_v24, %s4991_s11 }
 0x4ca   :  { %v439_v26 = vpop.permute.xlu0 %438 }
 0x4cb   :  { %v5242_v28 = vadd.f32 %v439_v26, %v431_v25 }
 0x4cd   :  { %4694 = vtanh.f32 %v5242_v28 }
 0x4da   :  { %v4695_v29 = vpop.eup %4694 }
 0x4db   :  { %444 = vrot.lane.b32.xlu0 %v4695_v29, %s4990_s1 }
 0x51c   :  { %v541_v31 = vpop.permute.xlu1 %540 }
 0x51d   :  { %v5247_v40 = vadd.f32 %v541_v31, %v533_v30 }
 0x51f   :  { %4696 = vtanh.f32 %v5247_v40 }
 0x52c   :  { %v4697_v48 = vpop.eup %4696 }
 0x52d   :  { %546 = vrot.lane.b32.xlu1 %v4697_v48, %s4990_s1 }
 0x54d   :  { %v445_v49 = vpop.permute.xlu0 %444 }
 0x54e   :  { %v447_v50 = vmul.f32 %v445_v49, %v429_v16 }
 0x550   :  { %449 = vrot.lane.b32.xlu0 %v447_v50, %s4991_s11 }
 0x59f   :  { %v547_v51 = vpop.permute.xlu1 %546 }
 0x5a0   :  { %v549_v52 = vmul.f32 %v547_v51, %v531_v22 }
 0x5a2   :  { %551 = vrot.lane.b32.xlu1 %v549_v52, %s4991_s11 }
 0x5c2   :  { %v450_v53 = vpop.permute.xlu0 %449 }
 0x5c3   :  { %4416 = vmatmul.mubr.msk.f32.vlgmr.msra.gmra.mxu1 %vm349_vm9, %v450_v53 }
 0x5c4   :  { %580 = vmatpush1.msra.mxu1 %v5136_v33  ;;  %619 = vmatprep.mubr.f32.mxu1 %v4989_v1 }
 0x5c5   :  { %581 = vmatprep.subr.mxu1 %v5141_v34 }
 0x5c6   :  { %582 = vmatpush1.msra.mxu1 %v5147_v35 }
 0x5c7   :  { %583 = vmatprep.subr.mxu1 %v5154_v36 }
 0x5c8   :  { %584 = vmatpush1.msra.mxu1 %v5161_v37 }
 0x5c9   :  { %585 = vmatprep.subr.mxu1 %v5168_v38 }
 0x5ca   :  { %586 = vmatpush1.msra.mxu1 %v5175_v39 }
 0x5cb   :  { %681 = vmatprep.subr.mxu1 %v5250_v41 }
 0x614   :  { %v552_v54 = vpop.permute.xlu1 %551 }
 0x615   :  { %4417 = vmatmul.mubr.msk.f32.vlgmr.msra.gmra.mxu1 %vm349_vm9, %v552_v54 }
 0x616   :  { %682 = vmatpush1.msra.mxu1 %v5252_v42  ;;  %721 = vmatprep.mubr.f32.mxu1 %v4989_v1 }
 0x617   :  { %683 = vmatprep.subr.mxu1 %v5254_v43 }
 0x618   :  { %684 = vmatpush1.msra.mxu1 %v5257_v44 }
 0x619   :  { %685 = vmatprep.subr.mxu1 %v5260_v45 }
 0x61a   :  { %686 = vmatpush1.msra.mxu1 %v5263_v27 }
 0x61b   :  { %687 = vmatprep.subr.mxu1 %v5266_v46 }
 0x61c   :  { %688 = vmatpush1.msra.mxu1 %v5269_v47 }
 0x61d   :  { %885 = vmatprep.subr.mxu1 %v5250_v41 }
 0x683   :  { %v519_v6 = vpop.f32.mrf.mxu1 }
 0x684   :  { %v629_v9 = vadd.f32 %v519_v6, %v5234_v4 }
 0x685   :  { %v5302_v11 = vpop.f32.mrf.mxu1 }
 0x686   :  { %4698 = vtanh.f32 %v629_v9  ;;  %v630_v15 = vmul.f32 0.5, %v629_v9 }
 0x693   :  { %v4699_v10 = vpop.eup %4698 }
 0x694   :  { %637 = vrot.lane.b32.xlu0 %v4699_v10, %s4990_s1 }
 0x6d5   :  { %v621_v12 = vpop.f32.mrf.mxu1 }
 0x6d6   :  { %v731_v13 = vadd.f32 %v621_v12, %v5216_v58 }
 0x6d7   :  { %v5340_v6 = vpop.f32.mrf.mxu1 }
 0x6d8   :  { %4700 = vtanh.f32 %v731_v13  ;;  %v732_v20 = vmul.f32 0.5, %v731_v13 }
 0x6d9   :  { %4702 = vtanh.f32 %v630_v15 }
 0x6da   :  { %4704 = vtanh.f32 %v732_v20 }
 0x6e5   :  { %v4701_v14 = vpop.eup %4700 }
 0x6e6   :  { %739 = vrot.lane.b32.xlu1 %v4701_v14, %s4990_s1  ;;  %v4703_v16 = vpop.eup %4702 }
 0x6e7   :  { %v632_v17 = vmul.f32 0.5, %v4703_v16  ;;  %v4705_v21 = vpop.eup %4704 }
 0x6e8   :  { %v734_v22 = vmul.f32 0.5, %v4705_v21 }
 0x6e9   :  { %v633_v18 = vadd.f32 0.5, %v632_v17 }
 0x6ea   :  { %v735_v23 = vadd.f32 0.5, %v734_v22 }
 0x6eb   :  { %v635_v25 = vmul.f32 %v633_v18, %v5242_v28 }
 0x6ec   :  { %v737_v31 = vmul.f32 %v735_v23, %v5247_v40 }
 0x706   :  { %v638_v19 = vpop.permute.xlu0 %637 }
 0x707   :  { %v640_v4 = vmul.f32 %v638_v19, %v633_v18 }
 0x709   :  { %642 = vrot.lane.b32.xlu0 %v640_v4, %s4991_s11 }
 0x758   :  { %v740_v24 = vpop.permute.xlu1 %739 }
 0x759   :  { %v742_v58 = vmul.f32 %v740_v24, %v735_v23 }
 0x75b   :  { %744 = vrot.lane.b32.xlu1 %v742_v58, %s4991_s11 }
 0x77b   :  { %v643_v26 = vpop.permute.xlu0 %642 }
 0x77c   :  { %v5309_v29 = vadd.f32 %v643_v26, %v635_v25 }
 0x77e   :  { %4706 = vtanh.f32 %v5309_v29 }
 0x78b   :  { %v4707_v30 = vpop.eup %4706 }
 0x78c   :  { %648 = vrot.lane.b32.xlu0 %v4707_v30, %s4990_s1 }
 0x7cd   :  { %v745_v48 = vpop.permute.xlu1 %744 }
 0x7ce   :  { %v5314_v49 = vadd.f32 %v745_v48, %v737_v31 }
 0x7d0   :  { %4708 = vtanh.f32 %v5314_v49 }
 0x7dd   :  { %v4709_v50 = vpop.eup %4708 }
 0x7de   :  { %750 = vrot.lane.b32.xlu1 %v4709_v50, %s4990_s1 }
 0x7fe   :  { %v649_v51 = vpop.permute.xlu0 %648 }
 0x7ff   :  { %v651_v28 = vmul.f32 %v649_v51, %v633_v18 }
 0x801   :  { %653 = vrot.lane.b32.xlu0 %v651_v28, %s4991_s11 }
 0x850   :  { %v751_v52 = vpop.permute.xlu1 %750 }
 0x851   :  { %v753_v53 = vmul.f32 %v751_v52, %v735_v23 }
 0x853   :  { %755 = vrot.lane.b32.xlu1 %v753_v53, %s4991_s11 }
 0x873   :  { %v654_v54 = vpop.permute.xlu0 %653 }
 0x874   :  { %4418 = vmatmul.mubr.msk.f32.vlgmr.msra.gmra.mxu1 %vm349_vm9, %v654_v54 }
 0x875   :  { %886 = vmatpush1.msra.mxu1 %v5252_v42  ;;  %925 = vmatprep.mubr.f32.mxu1 %v4989_v1 }
 0x876   :  { %887 = vmatprep.subr.mxu1 %v5254_v43 }
 0x877   :  { %888 = vmatpush1.msra.mxu1 %v5257_v44 }
 0x878   :  { %889 = vmatprep.subr.mxu1 %v5260_v45 }
 0x879   :  { %890 = vmatpush1.msra.mxu1 %v5263_v27 }
 0x87a   :  { %891 = vmatprep.subr.mxu1 %v5266_v46 }
 0x87b   :  { %892 = vmatpush1.msra.mxu1 %v5269_v47 }
 0x87c   :  { %1089 = vmatprep.subr.mxu1 %v5250_v41 }
 0x8c5   :  { %v756_v40 = vpop.permute.xlu1 %755 }
 0x8c6   :  { %4419 = vmatmul.mubr.msk.f32.vlgmr.msra.gmra.mxu0 %vm349_vm9, %v756_v40 }
 0x8c7   :  { %988 = vmatpush1.msra.mxu0 %v5136_v33  ;;  %1027 = vmatprep.mubr.f32.mxu0 %v4989_v1 }
 0x8c8   :  { %989 = vmatprep.subr.mxu0 %v5141_v34 }
 0x8c9   :  { %990 = vmatpush1.msra.mxu0 %v5147_v35 }
 0x8ca   :  { %991 = vmatprep.subr.mxu0 %v5154_v36 }
 0x8cb   :  { %992 = vmatpush1.msra.mxu0 %v5161_v37 }
 0x8cc   :  { %993 = vmatprep.subr.mxu0 %v5168_v38 }
 0x8cd   :  { %994 = vmatpush1.msra.mxu0 %v5175_v39 }
 0x8ce   :  { %1191 = vmatprep.subr.mxu0 %v5131_v32 }
 0x934   :  { %v723_v9 = vpop.f32.mrf.mxu1 }
 0x935   :  { %v833_v10 = vadd.f32 %v723_v9, %v5230_v2 }
 0x936   :  { %v5380_v40 = vpop.f32.mrf.mxu1 }
 0x937   :  { %4710 = vtanh.f32 %v833_v10  ;;  %v834_v16 = vmul.f32 0.5, %v833_v10 }
 0x944   :  { %v4711_v12 = vpop.eup %4710 }
 0x945   :  { %841 = vrot.lane.b32.xlu0 %v4711_v12, %s4990_s1 }
 0x986   :  { %v825_v13 = vpop.f32.mrf.mxu0 }
 0x987   :  { %v935_v14 = vadd.f32 %v825_v13, %v5220_v60 }
 0x988   :  { %v5384_v13 = vpop.f32.mrf.mxu0 }
 0x989   :  { %4712 = vtanh.f32 %v935_v14  ;;  %v936_v2 = vmul.f32 0.5, %v935_v14 }
 0x98a   :  { %4714 = vtanh.f32 %v834_v16 }
 0x98b   :  { %4716 = vtanh.f32 %v936_v2 }
 0x996   :  { %v4713_v15 = vpop.eup %4712 }
 0x997   :  { %943 = vrot.lane.b32.xlu1 %v4713_v15, %s4990_s1  ;;  %v4715_v17 = vpop.eup %4714 }
 0x998   :  { %v836_v18 = vmul.f32 0.5, %v4715_v17  ;;  %v4717_v21 = vpop.eup %4716 }
 0x999   :  { %v938_v22 = vmul.f32 0.5, %v4717_v21 }
 0x99a   :  { %v837_v19 = vadd.f32 0.5, %v836_v18 }
 0x99b   :  { %v939_v23 = vadd.f32 0.5, %v938_v22 }
 0x99c   :  { %v839_v58 = vmul.f32 %v837_v19, %v5309_v29 }
 0x99d   :  { %v941_v31 = vmul.f32 %v939_v23, %v5314_v49 }
 0x9b7   :  { %v842_v4 = vpop.permute.xlu0 %841 }
 0x9b8   :  { %v844_v20 = vmul.f32 %v842_v4, %v837_v19 }
 0x9ba   :  { %846 = vrot.lane.b32.xlu0 %v844_v20, %s4991_s11 }
 0xa09   :  { %v944_v24 = vpop.permute.xlu1 %943 }
 0xa0a   :  { %v946_v60 = vmul.f32 %v944_v24, %v939_v23 }
 0xa0c   :  { %948 = vrot.lane.b32.xlu1 %v946_v60, %s4991_s11 }
 0xa2c   :  { %v847_v25 = vpop.permute.xlu0 %846 }
 0xa2d   :  { %v5349_v26 = vadd.f32 %v847_v25, %v839_v58 }
 0xa2f   :  { %4718 = vtanh.f32 %v5349_v26 }
 0xa3c   :  { %v4719_v30 = vpop.eup %4718 }
 0xa3d   :  { %852 = vrot.lane.b32.xlu0 %v4719_v30, %s4990_s1 }
 0xa7e   :  { %v949_v48 = vpop.permute.xlu1 %948 }
 0xa7f   :  { %v5354_v50 = vadd.f32 %v949_v48, %v941_v31 }
 0xa81   :  { %4720 = vtanh.f32 %v5354_v50 }
 0xa8e   :  { %v4721_v51 = vpop.eup %4720 }
 0xa8f   :  { %954 = vrot.lane.b32.xlu1 %v4721_v51, %s4990_s1 }
 0xaaf   :  { %v853_v28 = vpop.permute.xlu0 %852 }
 0xab0   :  { %v855_v29 = vmul.f32 %v853_v28, %v837_v19 }
 0xab2   :  { %857 = vrot.lane.b32.xlu0 %v855_v29, %s4991_s11 }
 0xb01   :  { %v955_v52 = vpop.permute.xlu1 %954 }
 0xb02   :  { %v957_v53 = vmul.f32 %v955_v52, %v939_v23 }
 0xb04   :  { %959 = vrot.lane.b32.xlu1 %v957_v53, %s4991_s11 }
 0xb24   :  { %v858_v54 = vpop.permute.xlu0 %857 }
 0xb25   :  { %4420 = vmatmul.mubr.msk.f32.vlgmr.msra.gmra.mxu1 %vm349_vm9, %v858_v54 }
 0xb26   :  { %1090 = vmatpush1.msra.mxu1 %v5252_v42  ;;  %1129 = vmatprep.mubr.f32.mxu1 %v4989_v1 }
 0xb27   :  { %1091 = vmatprep.subr.mxu1 %v5254_v43 }
 0xb28   :  { %1092 = vmatpush1.msra.mxu1 %v5257_v44 }
 0xb29   :  { %1093 = vmatprep.subr.mxu1 %v5260_v45 }
 0xb2a   :  { %1094 = vmatpush1.msra.mxu1 %v5263_v27 }
 0xb2b   :  { %1095 = vmatprep.subr.mxu1 %v5266_v46 }
 0xb2c   :  { %1096 = vmatpush1.msra.mxu1 %v5269_v47 }
 0xb2d   :  { %1293 = vmatprep.subr.mxu1 %v5250_v41 }
 0xb76   :  { %v960_v49 = vpop.permute.xlu1 %959 }
 0xb77   :  { %4421 = vmatmul.mubr.msk.f32.vlgmr.msra.gmra.mxu0 %vm349_vm9, %v960_v49 }
 0xb78   :  { %1192 = vmatpush1.msra.mxu0 %v5136_v33  ;;  %1231 = vmatprep.mubr.f32.mxu0 %v4989_v1 }
 0xb79   :  { %1193 = vmatprep.subr.mxu0 %v5141_v34 }
 0xb7a   :  { %1194 = vmatpush1.msra.mxu0 %v5147_v35 }
 0xb7b   :  { %1195 = vmatprep.subr.mxu0 %v5154_v36 }
 0xb7c   :  { %1196 = vmatpush1.msra.mxu0 %v5161_v37 }
 0xb7d   :  { %1197 = vmatprep.subr.mxu0 %v5168_v38 }
 0xb7e   :  { %1198 = vmatpush1.msra.mxu0 %v5175_v39 }
 0xb7f   :  { %1395 = vmatprep.subr.mxu0 %v5131_v32 }
 0xbe5   :  { %v927_v9 = vpop.f32.mrf.mxu1 }
 0xbe6   :  { %v1037_v10 = vadd.f32 %v927_v9, %v5226_v63 }
 0xbe7   :  { %v5422_v49 = vpop.f32.mrf.mxu1 }
 0xbe8   :  { %4722 = vtanh.f32 %v1037_v10  ;;  %v1038_v17 = vmul.f32 0.5, %v1037_v10 }
 0xbf5   :  { %v4723_v12 = vpop.eup %4722 }
 0xbf6   :  { %1045 = vrot.lane.b32.xlu0 %v4723_v12, %s4990_s1 }
 0xc37   :  { %v1029_v14 = vpop.f32.mrf.mxu0 }
 0xc38   :  { %v1139_v15 = vadd.f32 %v1029_v14, %v5224_v62 }
 0xc39   :  { %v5426_v14 = vpop.f32.mrf.mxu0 }
 0xc3a   :  { %4724 = vtanh.f32 %v1139_v15  ;;  %v1140_v2 = vmul.f32 0.5, %v1139_v15 }
 0xc3b   :  { %4726 = vtanh.f32 %v1038_v17 }
 0xc3c   :  { %4728 = vtanh.f32 %v1140_v2 }
 0xc47   :  { %v4725_v16 = vpop.eup %4724 }
 0xc48   :  { %1147 = vrot.lane.b32.xlu1 %v4725_v16, %s4990_s1  ;;  %v4727_v18 = vpop.eup %4726 }
 0xc49   :  { %v1040_v19 = vmul.f32 0.5, %v4727_v18  ;;  %v4729_v21 = vpop.eup %4728 }
 0xc4a   :  { %v1142_v22 = vmul.f32 0.5, %v4729_v21 }
 0xc4b   :  { %v1041_v4 = vadd.f32 0.5, %v1040_v19 }
 0xc4c   :  { %v1143_v23 = vadd.f32 0.5, %v1142_v22 }
 0xc4d   :  { %v1043_v60 = vmul.f32 %v1041_v4, %v5349_v26 }
 0xc4e   :  { %v1145_v31 = vmul.f32 %v1143_v23, %v5354_v50 }
 0xc68   :  { %v1046_v20 = vpop.permute.xlu0 %1045 }
 0xc69   :  { %v1048_v63 = vmul.f32 %v1046_v20, %v1041_v4 }
 0xc6b   :  { %1050 = vrot.lane.b32.xlu0 %v1048_v63, %s4991_s11 }
 0xcba   :  { %v1148_v24 = vpop.permute.xlu1 %1147 }
 0xcbb   :  { %v1150_v62 = vmul.f32 %v1148_v24, %v1143_v23 }
 0xcbd   :  { %1152 = vrot.lane.b32.xlu1 %v1150_v62, %s4991_s11 }
 0xcdd   :  { %v1051_v58 = vpop.permute.xlu0 %1050 }
 0xcde   :  { %v5391_v25 = vadd.f32 %v1051_v58, %v1043_v60 }
 0xce0   :  { %4730 = vtanh.f32 %v5391_v25 }
 0xced   :  { %v4731_v30 = vpop.eup %4730 }
 0xcee   :  { %1056 = vrot.lane.b32.xlu0 %v4731_v30, %s4990_s1 }
 0xd2f   :  { %v1153_v48 = vpop.permute.xlu1 %1152 }
 0xd30   :  { %v5396_v51 = vadd.f32 %v1153_v48, %v1145_v31 }
 0xd32   :  { %4732 = vtanh.f32 %v5396_v51 }
 0xd3f   :  { %v4733_v28 = vpop.eup %4732 }
 0xd40   :  { %1158 = vrot.lane.b32.xlu1 %v4733_v28, %s4990_s1 }
 0xd60   :  { %v1057_v29 = vpop.permute.xlu0 %1056 }
 0xd61   :  { %v1059_v26 = vmul.f32 %v1057_v29, %v1041_v4 }
 0xd63   :  { %1061 = vrot.lane.b32.xlu0 %v1059_v26, %s4991_s11 }
 0xdb2   :  { %v1159_v52 = vpop.permute.xlu1 %1158 }
 0xdb3   :  { %v1161_v53 = vmul.f32 %v1159_v52, %v1143_v23 }
 0xdb5   :  { %1163 = vrot.lane.b32.xlu1 %v1161_v53, %s4991_s11 }
 0xdd5   :  { %v1062_v54 = vpop.permute.xlu0 %1061 }
 0xdd6   :  { %4422 = vmatmul.mubr.msk.f32.vlgmr.msra.gmra.mxu1 %vm349_vm9, %v1062_v54 }
 0xdd7   :  { %1294 = vmatpush1.msra.mxu1 %v5252_v42  ;;  %1333 = vmatprep.mubr.f32.mxu1 %v4989_v1 }
 0xdd8   :  { %1295 = vmatprep.subr.mxu1 %v5254_v43 }
 0xdd9   :  { %1296 = vmatpush1.msra.mxu1 %v5257_v44 }
 0xdda   :  { %1297 = vmatprep.subr.mxu1 %v5260_v45 }
 0xddb   :  { %1298 = vmatpush1.msra.mxu1 %v5263_v27 }
 0xddc   :  { %1299 = vmatprep.subr.mxu1 %v5266_v46 }
 0xddd   :  { %1300 = vmatpush1.msra.mxu1 %v5269_v47 }
 0xdde   :  { %1497 = vmatprep.subr.mxu1 %v5250_v41 }
 0xe27   :  { %v1164_v50 = vpop.permute.xlu1 %1163 }
 0xe28   :  { %4423 = vmatmul.mubr.msk.f32.vlgmr.msra.gmra.mxu0 %vm349_vm9, %v1164_v50 }
 0xe29   :  { %1396 = vmatpush1.msra.mxu0 %v5136_v33  ;;  %1435 = vmatprep.mubr.f32.mxu0 %v4989_v1 }
 0xe2a   :  { %1397 = vmatprep.subr.mxu0 %v5141_v34 }
 0xe2b   :  { %1398 = vmatpush1.msra.mxu0 %v5147_v35 }
 0xe2c   :  { %1399 = vmatprep.subr.mxu0 %v5154_v36 }
 0xe2d   :  { %1400 = vmatpush1.msra.mxu0 %v5161_v37 }
 0xe2e   :  { %1401 = vmatprep.subr.mxu0 %v5168_v38 }
 0xe2f   :  { %1402 = vmatpush1.msra.mxu0 %v5175_v39 }
 0xe30   :  { %1599 = vmatprep.subr.mxu0 %v5131_v32 }
 0xe96   :  { %v1131_v9 = vpop.f32.mrf.mxu1 }
 0xe97   :  { %v1241_v10 = vadd.f32 %v1131_v9, %v5222_v61 }
 0xe98   :  { %v5464_v50 = vpop.f32.mrf.mxu1 }
 0xe99   :  { %4734 = vtanh.f32 %v1241_v10  ;;  %v1242_v18 = vmul.f32 0.5, %v1241_v10 }
 0xea6   :  { %v4735_v12 = vpop.eup %4734 }
 0xea7   :  { %1249 = vrot.lane.b32.xlu0 %v4735_v12, %s4990_s1 }
 0xee8   :  { %v1233_v15 = vpop.f32.mrf.mxu0 }
 0xee9   :  { %v1343_v16 = vadd.f32 %v1233_v15, %v5228_v0 }
 0xeea   :  { %v5468_v15 = vpop.f32.mrf.mxu0 }
 0xeeb   :  { %4736 = vtanh.f32 %v1343_v16  ;;  %v1344_v2 = vmul.f32 0.5, %v1343_v16 }
 0xeec   :  { %4738 = vtanh.f32 %v1242_v18 }
 0xeed   :  { %4740 = vtanh.f32 %v1344_v2 }
 0xef8   :  { %v4737_v17 = vpop.eup %4736 }
 0xef9   :  { %1351 = vrot.lane.b32.xlu1 %v4737_v17, %s4990_s1  ;;  %v4739_v19 = vpop.eup %4738 }
 0xefa   :  { %v1244_v4 = vmul.f32 0.5, %v4739_v19  ;;  %v4741_v21 = vpop.eup %4740 }
 0xefb   :  { %v1346_v22 = vmul.f32 0.5, %v4741_v21 }
 0xefc   :  { %v1245_v20 = vadd.f32 0.5, %v1244_v4 }
 0xefd   :  { %v1347_v23 = vadd.f32 0.5, %v1346_v22 }
 0xefe   :  { %v1247_v62 = vmul.f32 %v1245_v20, %v5391_v25 }
 0xeff   :  { %v1349_v31 = vmul.f32 %v1347_v23, %v5396_v51 }
 0xf19   :  { %v1250_v63 = vpop.permute.xlu0 %1249 }
 0xf1a   :  { %v1252_v61 = vmul.f32 %v1250_v63, %v1245_v20 }
 0xf1c   :  { %1254 = vrot.lane.b32.xlu0 %v1252_v61, %s4991_s11 }
 0xf6b   :  { %v1352_v24 = vpop.permute.xlu1 %1351 }
 0xf6c   :  { %v1354_v0 = vmul.f32 %v1352_v24, %v1347_v23 }
 0xf6e   :  { %1356 = vrot.lane.b32.xlu1 %v1354_v0, %s4991_s11 }
 0xf8e   :  { %v1255_v60 = vpop.permute.xlu0 %1254 }
 0xf8f   :  { %v5433_v58 = vadd.f32 %v1255_v60, %v1247_v62 }
 0xf91   :  { %4742 = vtanh.f32 %v5433_v58 }
 0xf9e   :  { %v4743_v30 = vpop.eup %4742 }
 0xf9f   :  { %1260 = vrot.lane.b32.xlu0 %v4743_v30, %s4990_s1 }
 0xfe0   :  { %v1357_v48 = vpop.permute.xlu1 %1356 }
 0xfe1   :  { %v5438_v28 = vadd.f32 %v1357_v48, %v1349_v31 }
 0xfe3   :  { %4744 = vtanh.f32 %v5438_v28 }
 0xff0   :  { %v4745_v29 = vpop.eup %4744 }
 0xff1   :  { %1362 = vrot.lane.b32.xlu1 %v4745_v29, %s4990_s1 }
0x1011   :  { %v1261_v26 = vpop.permute.xlu0 %1260 }
0x1012   :  { %v1263_v25 = vmul.f32 %v1261_v26, %v1245_v20 }
0x1014   :  { %1265 = vrot.lane.b32.xlu0 %v1263_v25, %s4991_s11 }
0x1063   :  { %v1363_v52 = vpop.permute.xlu1 %1362 }
0x1064   :  { %v1365_v53 = vmul.f32 %v1363_v52, %v1347_v23 }
0x1066   :  { %1367 = vrot.lane.b32.xlu1 %v1365_v53, %s4991_s11 }
0x1086   :  { %v1266_v54 = vpop.permute.xlu0 %1265 }
0x1087   :  { %4424 = vmatmul.mubr.msk.f32.vlgmr.msra.gmra.mxu1 %vm349_vm9, %v1266_v54 }
0x1088   :  { %1498 = vmatpush1.msra.mxu1 %v5252_v42  ;;  %1537 = vmatprep.mubr.f32.mxu1 %v4989_v1 }
0x1089   :  { %1499 = vmatprep.subr.mxu1 %v5254_v43 }
0x108a   :  { %1500 = vmatpush1.msra.mxu1 %v5257_v44 }
0x108b   :  { %1501 = vmatprep.subr.mxu1 %v5260_v45 }
0x108c   :  { %1502 = vmatpush1.msra.mxu1 %v5263_v27 }
0x108d   :  { %1503 = vmatprep.subr.mxu1 %v5266_v46 }
0x108e   :  { %1504 = vmatpush1.msra.mxu1 %v5269_v47 }
0x108f   :  { %1701 = vmatprep.subr.mxu1 %v5250_v41 }
0x10d8   :  { %v1368_v51 = vpop.permute.xlu1 %1367 }
0x10d9   :  { %4425 = vmatmul.mubr.msk.f32.vlgmr.msra.gmra.mxu0 %vm349_vm9, %v1368_v51 }
0x10da   :  { %1600 = vmatpush1.msra.mxu0 %v5136_v33  ;;  %1639 = vmatprep.mubr.f32.mxu0 %v4989_v1 }
0x10db   :  { %1601 = vmatprep.subr.mxu0 %v5141_v34 }
0x10dc   :  { %1602 = vmatpush1.msra.mxu0 %v5147_v35 }
0x10dd   :  { %1603 = vmatprep.subr.mxu0 %v5154_v36 }
0x10de   :  { %1604 = vmatpush1.msra.mxu0 %v5161_v37 }
0x10df   :  { %1605 = vmatprep.subr.mxu0 %v5168_v38 }
0x10e0   :  { %1606 = vmatpush1.msra.mxu0 %v5175_v39 }
0x10e1   :  { %1803 = vmatprep.subr.mxu0 %v5131_v32 }
0x1147   :  { %v1335_v9 = vpop.f32.mrf.mxu1 }
0x1148   :  { %v1445_v10 = vadd.f32 %v1335_v9, %v5218_v59 }
0x114a   :  { %4746 = vtanh.f32 %v1445_v10  ;;  %v1446_v19 = vmul.f32 0.5, %v1445_v10 }
0x1157   :  { %v4747_v12 = vpop.eup %4746 }
0x1158   :  { %1453 = vrot.lane.b32.xlu0 %v4747_v12, %s4990_s1 }
0x1199   :  { %v1437_v16 = vpop.f32.mrf.mxu0 }
0x119a   :  { %v1547_v17 = vadd.f32 %v1437_v16, %v5232_v3 }
0x119c   :  { %4748 = vtanh.f32 %v1547_v17  ;;  %v1548_v61 = vmul.f32 0.5, %v1547_v17 }
0x119d   :  { %4750 = vtanh.f32 %v1446_v19 }
0x119e   :  { %4752 = vtanh.f32 %v1548_v61 }
0x11a9   :  { %v4749_v18 = vpop.eup %4748 }
0x11aa   :  { %1555 = vrot.lane.b32.xlu1 %v4749_v18, %s4990_s1  ;;  %v4751_v32 = vpop.eup %4750 }
0x11ab   :  { %v1448_v4 = vmul.f32 0.5, %v4751_v32  ;;  %v4753_v2 = vpop.eup %4752 }
0x11ac   :  { %v1550_v21 = vmul.f32 0.5, %v4753_v2 }
0x11ad   :  { %v1449_v20 = vadd.f32 0.5, %v1448_v4 }
0x11ae   :  { %v1551_v22 = vadd.f32 0.5, %v1550_v21 }
0x11af   :  { %v1451_v24 = vmul.f32 %v1449_v20, %v5433_v58 }
0x11b0   :  { %v1553_v30 = vmul.f32 %v1551_v22, %v5438_v28 }
0x11ca   :  { %v1454_v63 = vpop.permute.xlu0 %1453 }
0x11cb   :  { %v1456_v59 = vmul.f32 %v1454_v63, %v1449_v20 }
0x11cd   :  { %1458 = vrot.lane.b32.xlu0 %v1456_v59, %s4991_s11 }
0x121c   :  { %v1556_v23 = vpop.permute.xlu1 %1555 }
0x121d   :  { %v1558_v3 = vmul.f32 %v1556_v23, %v1551_v22 }
0x121f   :  { %1560 = vrot.lane.b32.xlu1 %v1558_v3, %s4991_s11 }
0x123f   :  { %v1459_v0 = vpop.permute.xlu0 %1458 }
0x1240   :  { %v5475_v62 = vadd.f32 %v1459_v0, %v1451_v24 }
0x1242   :  { %4754 = vtanh.f32 %v5475_v62 }
0x124f   :  { %v4755_v60 = vpop.eup %4754 }
0x1250   :  { %1464 = vrot.lane.b32.xlu0 %v4755_v60, %s4990_s1  ;;  %v5535_v60 = vld [vmem:[#allocation8 + $0x18] sm:$0xff] }
0x1291   :  { %v1561_v31 = vpop.permute.xlu1 %1560 }
0x1292   :  { %v5480_v48 = vadd.f32 %v1561_v31, %v1553_v30 }
0x1294   :  { %4756 = vtanh.f32 %v5480_v48 }
0x12a1   :  { %v4757_v29 = vpop.eup %4756 }
0x12a2   :  { %1566 = vrot.lane.b32.xlu1 %v4757_v29, %s4990_s1 }
0x12c2   :  { %v1465_v26 = vpop.permute.xlu0 %1464 }
0x12c3   :  { %v1467_v58 = vmul.f32 %v1465_v26, %v1449_v20 }
0x12c5   :  { %1469 = vrot.lane.b32.xlu0 %v1467_v58, %s4991_s11  ;;  %v5575_v58 = vld [vmem:[%s6035_s5] ss:$0 sm:$0xff] }
0x1314   :  { %v1567_v25 = vpop.permute.xlu1 %1566 }
0x1315   :  { %v1569_v52 = vmul.f32 %v1567_v25, %v1551_v22 }
0x1317   :  { %1571 = vrot.lane.b32.xlu1 %v1569_v52, %s4991_s11 }
0x1337   :  { %v1470_v53 = vpop.permute.xlu0 %1469 }
0x1338   :  { %4426 = vmatmul.mubr.msk.f32.vlgmr.msra.gmra.mxu1 %vm349_vm9, %v1470_v53 }
0x1339   :  { %1702 = vmatpush1.msra.mxu1 %v5252_v42  ;;  %1741 = vmatprep.mubr.f32.mxu1 %v4989_v1 }
0x133a   :  { %1703 = vmatprep.subr.mxu1 %v5254_v43 }
0x133b   :  { %1704 = vmatpush1.msra.mxu1 %v5257_v44 }
0x133c   :  { %1705 = vmatprep.subr.mxu1 %v5260_v45 }
0x133d   :  { %1706 = vmatpush1.msra.mxu1 %v5263_v27 }
0x133e   :  { %1707 = vmatprep.subr.mxu1 %v5266_v46 }
0x133f   :  { %1708 = vmatpush1.msra.mxu1 %v5269_v47 }
0x1340   :  { %1904 = vmatprep.subr.mxu1 %v5250_v41  ;;  %v5506_v41 = vpop.f32.mrf.mxu1 }
0x1389   :  { %v1572_v28 = vpop.permute.xlu1 %1571 }
0x138a   :  { %4427 = vmatmul.mubr.msk.f32.vlgmr.msra.gmra.mxu0 %vm349_vm9, %v1572_v28 }
0x138b   :  { %1804 = vmatpush1.msra.mxu0 %v5136_v33  ;;  %1843 = vmatprep.mubr.f32.mxu0 %v4989_v1 }
0x138c   :  { %1805 = vmatprep.subr.mxu0 %v5141_v34  ;;  %v5510_v34 = vpop.f32.mrf.mxu0 }
0x138d   :  { %1806 = vmatpush1.msra.mxu0 %v5147_v35 }
0x138e   :  { %1807 = vmatprep.subr.mxu0 %v5154_v36 }
0x138f   :  { %1808 = vmatpush1.msra.mxu0 %v5161_v37 }
0x1390   :  { %1809 = vmatprep.subr.mxu0 %v5168_v38 }
0x1391   :  { %1810 = vmatpush1.msra.mxu0 %v5175_v39 }
0x1392   :  { %4523 = vmatprep.subr.mxu0 %v4989_v1 }
0x13f8   :  { %v1539_v54 = vpop.f32.mrf.mxu1 }
0x13f9   :  { %v1649_v33 = vadd.f32 %v1539_v54, %v5214_v57 }
0x13fb   :  { %4758 = vtanh.f32 %v1649_v33  ;;  %v1650_v38 = vmul.f32 0.5, %v1649_v33 }
0x1408   :  { %v4759_v51 = vpop.eup %4758 }
0x1409   :  { %1657 = vrot.lane.b32.xlu0 %v4759_v51, %s4990_s1 }
0x144a   :  { %v1641_v35 = vpop.f32.mrf.mxu0 }
0x144b   :  { %v1751_v36 = vadd.f32 %v1641_v35, %v5236_v5 }
0x144c   :  { %v5569_v31 = vpop.f32.mrf.mxu0 }
0x144d   :  { %4760 = vtanh.f32 %v1751_v36  ;;  %v1752_v16 = vmul.f32 0.5, %v1751_v36 }
0x144e   :  { %4762 = vtanh.f32 %v1650_v38 }
0x144f   :  { %4764 = vtanh.f32 %v1752_v16 }
0x145a   :  { %v4761_v37 = vpop.eup %4760 }
0x145b   :  { %1759 = vrot.lane.b32.xlu1 %v4761_v37, %s4990_s1  ;;  %v4763_v39 = vpop.eup %4762 }
0x145c   :  { %v1652_v9 = vmul.f32 0.5, %v4763_v39  ;;  %v4765_v17 = vpop.eup %4764 }
0x145d   :  { %v1754_v18 = vmul.f32 0.5, %v4765_v17 }
0x145e   :  { %v1653_v10 = vadd.f32 0.5, %v1652_v9 }
0x145f   :  { %v1755_v19 = vadd.f32 0.5, %v1754_v18 }
0x1460   :  { %v1655_v4 = vmul.f32 %v1653_v10, %v5475_v62 }
0x1461   :  { %v1757_v61 = vmul.f32 %v1755_v19, %v5480_v48 }
0x147b   :  { %v1658_v12 = vpop.permute.xlu0 %1657 }
0x147c   :  { %v1660_v57 = vmul.f32 %v1658_v12, %v1653_v10 }
0x147e   :  { %1662 = vrot.lane.b32.xlu0 %v1660_v57, %s4991_s11 }
0x14cd   :  { %v1760_v32 = vpop.permute.xlu1 %1759 }
0x14ce   :  { %v1762_v5 = vmul.f32 %v1760_v32, %v1755_v19 }
0x14d0   :  { %1764 = vrot.lane.b32.xlu1 %v1762_v5, %s4991_s11 }
0x14f0   :  { %v1663_v20 = vpop.permute.xlu0 %1662 }
0x14f1   :  { %v5517_v63 = vadd.f32 %v1663_v20, %v1655_v4 }
0x14f3   :  { %4766 = vtanh.f32 %v5517_v63 }
0x1500   :  { %v4767_v59 = vpop.eup %4766 }
0x1501   :  { %1668 = vrot.lane.b32.xlu0 %v4767_v59, %s4990_s1 }
0x1542   :  { %v1765_v2 = vpop.permute.xlu1 %1764 }
0x1543   :  { %v1767_v21 = vadd.f32 %v1765_v2, %v1757_v61 }
0x1545   :  { %4768 = vtanh.f32 %v1767_v21 }
0x1552   :  { %v4769_v22 = vpop.eup %4768 }
0x1553   :  { %1770 = vrot.lane.b32.xlu1 %v4769_v22, %s4990_s1 }
0x1573   :  { %v1669_v23 = vpop.permute.xlu0 %1668 }
0x1574   :  { %v1671_v3 = vmul.f32 %v1669_v23, %v1653_v10 }
0x1576   :  { %1673 = vrot.lane.b32.xlu0 %v1671_v3, %s4991_s11  ;;  %v2064_v3 = vadd.f32 %v5569_v31, %v5380_v40 }
0x15c5   :  { %v1771_v24 = vpop.permute.xlu1 %1770 }
0x15c6   :  { %v1773_v0 = vmul.f32 %v1771_v24, %v1755_v19 }
0x15c8   :  { %1775 = vrot.lane.b32.xlu1 %v1773_v0, %s4991_s11  ;;  %v2065_v0 = vadd.f32 %v5575_v58, %v2064_v3 }
0x15e8   :  { %v1674_v62 = vpop.permute.xlu0 %1673 }
0x15e9   :  { %4428 = vmatmul.mubr.msk.f32.vlgmr.msra.gmra.mxu1 %vm349_vm9, %v1674_v62 }
0x15ea   :  { %1905 = vmatpush1.msra.mxu1 %v5252_v42  ;;  %1944 = vmatprep.mubr.f32.mxu1 %v4989_v1  ;;  %v5538_v42 = vld [vmem:[#allocation8 + $0x10] sm:$0xff] }
0x15eb   :  { %1906 = vmatprep.subr.mxu1 %v5254_v43  ;;  %v5544_v43 = vld [vmem:[#allocation8 + $0x8] sm:$0xff] }
0x15ec   :  { %1907 = vmatpush1.msra.mxu1 %v5257_v44  ;;  %v5548_v44 = vld [vmem:[#allocation8] sm:$0xff] }
0x15ed   :  { %1908 = vmatprep.subr.mxu1 %v5260_v45  ;;  %v5565_v45 = vpop.f32.mrf.mxu1 }
0x15ee   :  { %1909 = vmatpush1.msra.mxu1 %v5263_v27 }
0x15ef   :  { %1910 = vmatprep.subr.mxu1 %v5266_v46 }
0x15f0   :  { %1911 = vmatpush1.msra.mxu1 %v5269_v47 }
0x15f1   :  { %4534 = vmatprep.subr.mxu1 %v4989_v1 }
0x163a   :  { %v1776_v30 = vpop.permute.xlu1 %1775 }
0x163b   :  { %4429 = vmatmul.mubr.msk.f32.vlgmr.msra.gmra.mxu0 %vm349_vm9, %v1776_v30 }
0x163c   :  { %4524 = vmatpush3.msra.mxu0 %v5535_v60  ;;  %4531 = vmatprep.mubr.msk.f32.mxu0 %vm4992_vm10, %v4989_v1 }
0x163d   :  { %4525 = vmatprep.subr.mxu0 %v4989_v1 }
0x163e   :  { %4526 = vmatpush3.msra.mxu0 %v5538_v42 }
0x163f   :  { %4527 = vmatprep.subr.mxu0 %v4989_v1 }
0x1640   :  { %4528 = vmatpush3.msra.mxu0 %v5544_v43 }
0x1641   :  { %4529 = vmatprep.subr.mxu0 %v4989_v1 }
0x1642   :  { %4530 = vmatpush3.msra.mxu0 %v5548_v44 }
0x1643   :  { %4532 = vmatmul.mubr.f32.vlgmr.msra.gmra.mxu0 %v4989_v1  ;;  %4545 = vmatprep.subr.mxu0 %v4989_v1 }
0x1644   :  { %4546 = vmatpush3.msra.mxu0 %v5535_v60  ;;  %4553 = vmatprep.mubr.msk.f32.mxu0 %vm4992_vm10, %v4989_v1 }
0x1645   :  { %4547 = vmatprep.subr.mxu0 %v4989_v1 }
0x1646   :  { %4548 = vmatpush3.msra.mxu0 %v5538_v42 }
0x1647   :  { %4549 = vmatprep.subr.mxu0 %v4989_v1 }
0x1648   :  { %4550 = vmatpush3.msra.mxu0 %v5544_v43 }
0x1649   :  { %4551 = vmatprep.subr.mxu0 %v4989_v1 }
0x164a   :  { %4552 = vmatpush3.msra.mxu0 %v5548_v44 }
0x164b   :  { %4567 = vmatprep.subr.mxu0 %v4989_v1 }
0x16a9   :  { %v1743_v27 = vpop.f32.mrf.mxu1 }
0x16aa   :  { %v1852_v46 = vadd.f32 %v1743_v27, %v5212_v55 }
0x16ab   :  { %v5608_v22 = vpop.f32.mrf.mxu1 }
0x16ac   :  { %4770 = vtanh.f32 %v1852_v46  ;;  %v1853_v54 = vmul.f32 0.5, %v1852_v46 }
0x16b9   :  { %v4771_v47 = vpop.eup %4770 }
0x16ba   :  { %1860 = vrot.lane.b32.xlu0 %v4771_v47, %s4990_s1 }
0x16fb   :  { %v1845_v48 = vpop.f32.mrf.mxu0 }
0x16fd   :  { %v1846_v29 = vpop.f32.mrf.mxu0 }
0x16fe   :  { %v1958_v26 = vadd.f32 %v1846_v29, %v5302_v11 }
0x1700   :  { %v1965_v25 = vadd.f32 %v5575_v58, %v1958_v26 }
0x1703   :  { %v2035_v52 = vpop.f32.mrf.mxu0 }
0x1704   :  { %v2039_v53 = vadd.f32 %v2035_v52, %v1965_v25 }
0x1705   :  { %v4533_v55 = vpop.f32.mrf.mxu0 }
0x1706   :  { %4772 = vtanh.f32 %v2039_v53  ;;  %v2040_v37 = vmul.f32 0.5, %v2039_v53 }
0x1707   :  { %4774 = vtanh.f32 %v1853_v54 }
0x1708   :  { %4776 = vtanh.f32 %v2040_v37 }
0x1713   :  { %v4773_v28 = vpop.eup %4772 }
0x1714   :  { %2047 = vrot.lane.b32.xlu1 %v4773_v28, %s4990_s1  ;;  %v4775_v33 = vpop.eup %4774 }
0x1715   :  { %v1855_v51 = vmul.f32 0.5, %v4775_v33  ;;  %v4777_v38 = vpop.eup %4776 }
0x1716   :  { %v2042_v39 = vmul.f32 0.5, %v4777_v38 }
0x1717   :  { %v1856_v35 = vadd.f32 0.5, %v1855_v51  ;;  %v2166_v51 = vadd.f32 %v5510_v34, %v5422_v49 }
0x1718   :  { %v2043_v9 = vadd.f32 0.5, %v2042_v39 }
0x1719   :  { %v1858_v57 = vmul.f32 %v1856_v35, %v5517_v63 }
0x171a   :  { %v2045_v19 = vmul.f32 0.0, %v2043_v9 }
0x172c   :  { %v1861_v11 = vpop.permute.xlu0 %1860 }
0x172d   :  { %v1863_v36 = vmul.f32 %v1861_v11, %v1856_v35 }
0x172f   :  { %1865 = vrot.lane.b32.xlu0 %v1863_v36, %s4991_s11 }
0x1786   :  { %v2048_v10 = vpop.permute.xlu1 %2047 }
0x1787   :  { %v2050_v12 = vmul.f32 %v2048_v10, %v2043_v9 }
0x1789   :  { %2052 = vrot.lane.b32.xlu1 %v2050_v12, %s4991_s11 }
0x17a1   :  { %v1866_v16 = vpop.permute.xlu0 %1865 }
0x17a2   :  { %v1868_v17 = vadd.f32 %v1866_v16, %v1858_v57 }
0x17a4   :  { %4778 = vtanh.f32 %v1868_v17 }
0x17b1   :  { %v4779_v18 = vpop.eup %4778 }
0x17b2   :  { %1871 = vrot.lane.b32.xlu0 %v4779_v18, %s4990_s1 }
0x17fb   :  { %v2053_v32 = vpop.permute.xlu1 %2052 }
0x17fc   :  { %v2055_v5 = vadd.f32 %v2053_v32, %v2045_v19 }
0x17fe   :  { %4780 = vtanh.f32 %v2055_v5 }
0x180b   :  { %v4781_v4 = vpop.eup %4780 }
0x180c   :  { %2058 = vrot.lane.b32.xlu1 %v4781_v4, %s4990_s1  ;;  %v2268_v4 = vadd.f32 %v5468_v15, %v5464_v50 }
0x1824   :  { %v1872_v20 = vpop.permute.xlu0 %1871 }
0x1825   :  { %v1874_v59 = vmul.f32 %v1872_v20, %v1856_v35  ;;  %v2167_v35 = vadd.f32 %v5575_v58, %v2166_v51  ;;  %v2269_v20 = vadd.f32 %v5575_v58, %v2268_v4 }
0x1827   :  { %1876 = vrot.lane.b32.xlu0 %v1874_v59, %s4991_s11 }
0x187e   :  { %v2059_v61 = vpop.permute.xlu1 %2058 }
0x187f   :  { %v2061_v2 = vmul.f32 %v2059_v61, %v2043_v9 }
0x1881   :  { %2067 = vrot.lane.b32.xlu1 %v2061_v2, %s4991_s11 }
0x1899   :  { %v1877_v63 = vpop.permute.xlu0 %1876 }
0x189a   :  { %4430 = vmatmul.mubr.msk.f32.vlgmr.msra.gmra.mxu1 %vm349_vm9, %v1877_v63 }
0x189b   :  { %4535 = vmatpush3.msra.mxu1 %v5535_v60  ;;  %4542 = vmatprep.mubr.msk.f32.mxu1 %vm4992_vm10, %v4989_v1 }
0x189c   :  { %4536 = vmatprep.subr.mxu1 %v4989_v1 }
0x189d   :  { %4537 = vmatpush3.msra.mxu1 %v5538_v42 }
0x189e   :  { %4538 = vmatprep.subr.mxu1 %v4989_v1 }
0x189f   :  { %4539 = vmatpush3.msra.mxu1 %v5544_v43 }
0x18a0   :  { %4540 = vmatprep.subr.mxu1 %v4989_v1 }
0x18a1   :  { %4541 = vmatpush3.msra.mxu1 %v5548_v44 }
0x18a2   :  { %4556 = vmatprep.subr.mxu1 %v4989_v1 }
0x18f3   :  { %v2068_v21 = vpop.permute.xlu1 %2067 }
0x18f4   :  { %4543 = vmatmul.mubr.msk.f32.vlgmr.msra.gmra.mxu1 %vm349_vm9, %v2068_v21 }
0x18f5   :  { %4557 = vmatpush3.msra.mxu1 %v5535_v60  ;;  %4564 = vmatprep.mubr.msk.f32.mxu1 %vm4992_vm10, %v4989_v1 }
0x18f6   :  { %4558 = vmatprep.subr.mxu1 %v4989_v1 }
0x18f7   :  { %4559 = vmatpush3.msra.mxu1 %v5538_v42 }
0x18f8   :  { %4560 = vmatprep.subr.mxu1 %v4989_v1 }
0x18f9   :  { %4561 = vmatpush3.msra.mxu1 %v5544_v43 }
0x18fa   :  { %4562 = vmatprep.subr.mxu1 %v4989_v1 }
0x18fb   :  { %4563 = vmatpush3.msra.mxu1 %v5548_v44 }
0x18fc   :  { %4578 = vmatprep.subr.mxu1 %v4989_v1 }
0x195a   :  { %v1946_v23 = vpop.f32.mrf.mxu1 }
0x195c   :  { %v5612_v24 = vpop.f32.mrf.mxu1 }
0x19b4   :  { %v2137_v62 = vpop.f32.mrf.mxu1 }
0x19b5   :  { %v2141_v30 = vadd.f32 %v2137_v62, %v2065_v0 }
0x19b6   :  { %v4544_v27 = vpop.f32.mrf.mxu1 }
0x19b7   :  { %4782 = vtanh.f32 %v2141_v30  ;;  %v2142_v47 = vmul.f32 0.5, %v2141_v30 }
0x19b9   :  { %4784 = vtanh.f32 %v2142_v47 }
0x19c4   :  { %v4783_v46 = vpop.eup %4782 }
0x19c5   :  { %2149 = vrot.lane.b32.xlu0 %v4783_v46, %s4990_s1 }
0x19c6   :  { %v4785_v48 = vpop.eup %4784 }
0x19c7   :  { %v2144_v29 = vmul.f32 0.5, %v4785_v48 }
0x19c9   :  { %v2145_v26 = vadd.f32 0.5, %v2144_v29 }
0x19cb   :  { %v2147_v40 = vmul.f32 %v2145_v26, %v2055_v5 }
0x1a37   :  { %v2150_v25 = vpop.permute.xlu0 %2149 }
0x1a38   :  { %v2152_v52 = vmul.f32 %v2150_v25, %v2145_v26 }
0x1a3a   :  { %2154 = vrot.lane.b32.xlu1 %v2152_v52, %s4991_s11 }
0x1aac   :  { %v2155_v31 = vpop.permute.xlu1 %2154 }
0x1aad   :  { %v2157_v53 = vadd.f32 %v2155_v31, %v2147_v40 }
0x1aaf   :  { %4786 = vtanh.f32 %v2157_v53 }
0x1abc   :  { %v4787_v55 = vpop.eup %4786 }
0x1abd   :  { %2160 = vrot.lane.b32.xlu0 %v4787_v55, %s4990_s1 }
0x1b2f   :  { %v2161_v28 = vpop.permute.xlu0 %2160 }
0x1b30   :  { %v2163_v54 = vmul.f32 %v2161_v28, %v2145_v26  ;;  %v2370_v26 = vadd.f32 %v5506_v41, %v5426_v14 }
0x1b32   :  { %2169 = vrot.lane.b32.xlu1 %v2163_v54, %s4991_s11  ;;  %v2371_v25 = vadd.f32 %v5575_v58, %v2370_v26 }
0x1ba4   :  { %v2170_v33 = vpop.permute.xlu1 %2169 }
0x1ba5   :  { %4554 = vmatmul.mubr.msk.f32.vlgmr.msra.gmra.mxu0 %vm349_vm9, %v2170_v33 }
0x1ba6   :  { %4568 = vmatpush3.msra.mxu0 %v5535_v60  ;;  %4575 = vmatprep.mubr.msk.f32.mxu0 %vm4992_vm10, %v4989_v1 }
0x1ba7   :  { %4569 = vmatprep.subr.mxu0 %v4989_v1 }
0x1ba8   :  { %4570 = vmatpush3.msra.mxu0 %v5538_v42 }
0x1ba9   :  { %4571 = vmatprep.subr.mxu0 %v4989_v1 }
0x1baa   :  { %4572 = vmatpush3.msra.mxu0 %v5544_v43 }
0x1bab   :  { %4573 = vmatprep.subr.mxu0 %v4989_v1 }
0x1bac   :  { %4574 = vmatpush3.msra.mxu0 %v5548_v44 }
0x1bad   :  { %4589 = vmatprep.subr.mxu0 %v4989_v1 }
0x1c65   :  { %v2239_v11 = vpop.f32.mrf.mxu0 }
0x1c66   :  { %v2243_v36 = vadd.f32 %v2239_v11, %v2167_v35 }
0x1c67   :  { %v4555_v37 = vpop.f32.mrf.mxu0 }
0x1c68   :  { %4788 = vtanh.f32 %v2243_v36  ;;  %v2244_v39 = vmul.f32 0.5, %v2243_v36 }
0x1c6a   :  { %4790 = vtanh.f32 %v2244_v39 }
0x1c75   :  { %v4789_v38 = vpop.eup %4788 }
0x1c76   :  { %2251 = vrot.lane.b32.xlu0 %v4789_v38, %s4990_s1 }
0x1c77   :  { %v4791_v9 = vpop.eup %4790 }
0x1c78   :  { %v2246_v10 = vmul.f32 0.5, %v4791_v9  ;;  %v2472_v9 = vadd.f32 %v5565_v45, %v5384_v13 }
0x1c7a   :  { %v2247_v12 = vadd.f32 0.5, %v2246_v10 }
0x1c7c   :  { %v2249_v17 = vmul.f32 %v2247_v12, %v2157_v53 }
0x1ce8   :  { %v2252_v57 = vpop.permute.xlu0 %2251 }
0x1ce9   :  { %v2254_v16 = vmul.f32 %v2252_v57, %v2247_v12 }
0x1ceb   :  { %2256 = vrot.lane.b32.xlu1 %v2254_v16, %s4991_s11 }
0x1d5d   :  { %v2257_v49 = vpop.permute.xlu1 %2256 }
0x1d5e   :  { %v2259_v34 = vadd.f32 %v2257_v49, %v2249_v17 }
0x1d60   :  { %4792 = vtanh.f32 %v2259_v34 }
0x1d6d   :  { %v4793_v18 = vpop.eup %4792 }
0x1d6e   :  { %2262 = vrot.lane.b32.xlu0 %v4793_v18, %s4990_s1 }
0x1de0   :  { %v2263_v19 = vpop.permute.xlu0 %2262 }
0x1de1   :  { %v2265_v32 = vmul.f32 %v2263_v19, %v2247_v12 }
0x1de3   :  { %2271 = vrot.lane.b32.xlu1 %v2265_v32, %s4991_s11 }
0x1e55   :  { %v2272_v5 = vpop.permute.xlu1 %2271 }
0x1e56   :  { %4565 = vmatmul.mubr.msk.f32.vlgmr.msra.gmra.mxu1 %vm349_vm9, %v2272_v5 }
0x1e57   :  { %4579 = vmatpush3.msra.mxu1 %v5535_v60  ;;  %4586 = vmatprep.mubr.msk.f32.mxu1 %vm4992_vm10, %v4989_v1 }
0x1e58   :  { %4580 = vmatprep.subr.mxu1 %v4989_v1 }
0x1e59   :  { %4581 = vmatpush3.msra.mxu1 %v5538_v42 }
0x1e5a   :  { %4582 = vmatprep.subr.mxu1 %v4989_v1 }
0x1e5b   :  { %4583 = vmatpush3.msra.mxu1 %v5544_v43 }
0x1e5c   :  { %4584 = vmatprep.subr.mxu1 %v4989_v1 }
0x1e5d   :  { %4585 = vmatpush3.msra.mxu1 %v5548_v44 }
0x1e5e   :  { %4600 = vmatprep.subr.mxu1 %v4989_v1 }
0x1f16   :  { %v2341_v59 = vpop.f32.mrf.mxu1 }
0x1f17   :  { %v2345_v61 = vadd.f32 %v2341_v59, %v2269_v20  ;;  %v2574_v20 = vadd.f32 %v5608_v22, %v5340_v6 }
0x1f18   :  { %v4566_v2 = vpop.f32.mrf.mxu1 }
0x1f19   :  { %4794 = vtanh.f32 %v2345_v61  ;;  %v2346_v21 = vmul.f32 0.5, %v2345_v61  ;;  %v2575_v59 = vadd.f32 %v5575_v58, %v2574_v20 }
0x1f1b   :  { %4796 = vtanh.f32 %v2346_v21 }
0x1f26   :  { %v4795_v63 = vpop.eup %4794 }
0x1f27   :  { %2353 = vrot.lane.b32.xlu0 %v4795_v63, %s4990_s1 }
0x1f28   :  { %v4797_v23 = vpop.eup %4796 }
0x1f29   :  { %v2348_v3 = vmul.f32 0.5, %v4797_v23 }
0x1f2b   :  { %v2349_v0 = vadd.f32 0.5, %v2348_v3 }
0x1f2d   :  { %v2351_v27 = vmul.f32 %v2349_v0, %v2259_v34 }
0x1f99   :  { %v2354_v62 = vpop.permute.xlu0 %2353 }
0x1f9a   :  { %v2356_v30 = vmul.f32 %v2354_v62, %v2349_v0 }
0x1f9c   :  { %2358 = vrot.lane.b32.xlu1 %v2356_v30, %s4991_s11 }
0x200e   :  { %v2359_v50 = vpop.permute.xlu1 %2358 }
0x200f   :  { %v2361_v15 = vadd.f32 %v2359_v50, %v2351_v27 }
0x2011   :  { %4798 = vtanh.f32 %v2361_v15 }
0x201e   :  { %v4799_v46 = vpop.eup %4798 }
0x201f   :  { %2364 = vrot.lane.b32.xlu0 %v4799_v46, %s4990_s1 }
0x2091   :  { %v2365_v47 = vpop.permute.xlu0 %2364 }
0x2092   :  { %v2367_v48 = vmul.f32 %v2365_v47, %v2349_v0 }
0x2094   :  { %2373 = vrot.lane.b32.xlu1 %v2367_v48, %s4991_s11 }
0x2106   :  { %v2374_v29 = vpop.permute.xlu1 %2373 }
0x2107   :  { %4576 = vmatmul.mubr.msk.f32.vlgmr.msra.gmra.mxu0 %vm349_vm9, %v2374_v29  ;;  %v2676_v29 = vadd.f32 %v5612_v24, %v5298_v56 }
0x2108   :  { %4590 = vmatpush3.msra.mxu0 %v5535_v60  ;;  %4597 = vmatprep.mubr.msk.f32.mxu0 %vm4992_vm10, %v4989_v1 }
0x2109   :  { %4591 = vmatprep.subr.mxu0 %v4989_v1  ;;  %v2677_v26 = vadd.f32 %v5575_v58, %v2676_v29 }
0x210a   :  { %4592 = vmatpush3.msra.mxu0 %v5538_v42 }
0x210b   :  { %4593 = vmatprep.subr.mxu0 %v4989_v1 }
0x210c   :  { %4594 = vmatpush3.msra.mxu0 %v5544_v43 }
0x210d   :  { %4595 = vmatprep.subr.mxu0 %v4989_v1 }
0x210e   :  { %4596 = vmatpush3.msra.mxu0 %v5548_v44 }
0x21c7   :  { %v2443_v52 = vpop.f32.mrf.mxu0 }
0x21c8   :  { %v2447_v40 = vadd.f32 %v2443_v52, %v2371_v25 }
0x21c9   :  { %v4577_v31 = vpop.f32.mrf.mxu0 }
0x21ca   :  { %4800 = vtanh.f32 %v2447_v40  ;;  %v2448_v55 = vmul.f32 0.5, %v2447_v40 }
0x21cc   :  { %4802 = vtanh.f32 %v2448_v55 }
0x21d7   :  { %v4801_v53 = vpop.eup %4800 }
0x21d8   :  { %2455 = vrot.lane.b32.xlu0 %v4801_v53, %s4990_s1 }
0x21d9   :  { %v4803_v28 = vpop.eup %4802 }
0x21da   :  { %v2450_v54 = vmul.f32 0.5, %v4803_v28 }
0x21dc   :  { %v2451_v33 = vadd.f32 0.5, %v2450_v54 }
0x21de   :  { %v2453_v11 = vmul.f32 %v2451_v33, %v2361_v15 }
0x224a   :  { %v2456_v51 = vpop.permute.xlu0 %2455 }
0x224b   :  { %v2458_v35 = vmul.f32 %v2456_v51, %v2451_v33 }
0x224d   :  { %2460 = vrot.lane.b32.xlu1 %v2458_v35, %s4991_s11 }
0x22bf   :  { %v2461_v14 = vpop.permute.xlu1 %2460 }
0x22c0   :  { %v2463_v41 = vadd.f32 %v2461_v14, %v2453_v11  ;;  %v5710_v11 = vld [vmem:[#allocation10 + $0x30] sm:$0xff]  ;;  %v5712_v14 = vld [vmem:[#allocation10 + $0x28] sm:$0xff] }
0x22c2   :  { %4804 = vtanh.f32 %v2463_v41 }
0x22cf   :  { %v4805_v36 = vpop.eup %4804 }
0x22d0   :  { %2466 = vrot.lane.b32.xlu0 %v4805_v36, %s4990_s1  ;;  %v5719_v36 = vld [vmem:[#allocation10 + $0x18] sm:$0xff] }
0x2342   :  { %v2467_v37 = vpop.permute.xlu0 %2466 }
0x2343   :  { %v2469_v38 = vmul.f32 %v2467_v37, %v2451_v33  ;;  %v5723_v37 = vld [vmem:[#allocation10 + $0x10] sm:$0xff] }
0x2345   :  { %2475 = vrot.lane.b32.xlu1 %v2469_v38, %s4991_s11  ;;  %v5727_v38 = vld [vmem:[#allocation10 + $0x8] sm:$0xff] }
0x23b7   :  { %v2476_v39 = vpop.permute.xlu1 %2475 }
0x23b8   :  { %4587 = vmatmul.mubr.msk.f32.vlgmr.msra.gmra.mxu1 %vm349_vm9, %v2476_v39  ;;  %v5731_v39 = vld [vmem:[#allocation10] sm:$0xff] }
0x23b9   :  { %4601 = vmatpush3.msra.mxu1 %v5535_v60  ;;  %4608 = vmatprep.mubr.msk.f32.mxu1 %vm4992_vm10, %v4989_v1  ;;  %v2473_v60 = vadd.f32 %v5575_v58, %v2472_v9  ;;  %v5708_v58 = vld [vmem:[#allocation10 + $0x38] sm:$0xff] }
0x23ba   :  { %4602 = vmatprep.subr.mxu1 %v4989_v1  ;;  %2829 = vmatprep.subr.mxu0 %v5708_v58 }
0x23bb   :  { %4603 = vmatpush3.msra.mxu1 %v5538_v42 }
0x23bc   :  { %4604 = vmatprep.subr.mxu1 %v4989_v1 }
0x23bd   :  { %4605 = vmatpush3.msra.mxu1 %v5544_v43 }
0x23be   :  { %4606 = vmatprep.subr.mxu1 %v4989_v1 }
0x23bf   :  { %4607 = vmatpush3.msra.mxu1 %v5548_v44 }
0x23c0   :  { %2926 = vmatprep.subr.mxu1 %v5708_v58 }
0x2478   :  { %v2545_v10 = vpop.f32.mrf.mxu1 }
0x2479   :  { %v2549_v12 = vadd.f32 %v2545_v10, %v2473_v60 }
0x247a   :  { %v4588_v57 = vpop.f32.mrf.mxu1 }
0x247b   :  { %4806 = vtanh.f32 %v2549_v12  ;;  %v2550_v42 = vmul.f32 0.5, %v2549_v12  ;;  %v2794_v57 = vshrl.u32 %v98_v7, 7 }
0x247d   :  { %4808 = vtanh.f32 %v2550_v42  ;;  %v2789_v42 = vld [vmem:[%s6037_s7] sm:$0x3]  ;;  %s4993_s7 = smov 48  }
0x2488   :  { %v4807_v16 = vpop.eup %4806 }
0x2489   :  { %2557 = vrot.lane.b32.xlu0 %v4807_v16, %s4990_s1  ;;  %v2795_v16 = vsub.s32 0, %v2794_v57 }
0x248a   :  { %v4809_v17 = vpop.eup %4808 }
0x248b   :  { %v2552_v43 = vmul.f32 0.5, %v4809_v17  ;;  %v5759_v17 = vrot.slane %v2789_v42, %v2795_v16 }
0x248d   :  { %v2553_v49 = vadd.f32 0.5, %v2552_v43 }
0x248f   :  { %v2555_v44 = vmul.f32 %v2553_v49, %v2463_v41  ;;  %v5715_v41 = vld [vmem:[#allocation10 + $0x20] sm:$0xff] }
0x24fb   :  { %v2558_v34 = vpop.permute.xlu0 %2557 }
0x24fc   :  { %v2560_v18 = vmul.f32 %v2558_v34, %v2553_v49 }
0x24fe   :  { %2562 = vrot.lane.b32.xlu1 %v2560_v18, %s4991_s11 }
0x2570   :  { %v2563_v13 = vpop.permute.xlu1 %2562 }
0x2571   :  { %v2565_v45 = vadd.f32 %v2563_v13, %v2555_v44 }
0x2573   :  { %4810 = vtanh.f32 %v2565_v45 }
0x2580   :  { %v4811_v19 = vpop.eup %4810 }
0x2581   :  { %2568 = vrot.lane.b32.xlu0 %v4811_v19, %s4990_s1 }
0x25f3   :  { %v2569_v32 = vpop.permute.xlu0 %2568 }
0x25f4   :  { %v2571_v5 = vmul.f32 %v2569_v32, %v2553_v49 }
0x25f6   :  { %2577 = vrot.lane.b32.xlu1 %v2571_v5, %s4991_s11 }
0x2668   :  { %v2578_v4 = vpop.permute.xlu1 %2577 }
0x2669   :  { %4598 = vmatmul.mubr.msk.f32.vlgmr.msra.gmra.mxu0 %vm349_vm9, %v2578_v4 }
0x266a   :  { %2869 = vmatprep.mubr.f32.mxu0 %v4989_v1  ;;  %2830 = vmatpush1.msra.mxu0 %v5710_v11 }
0x266b   :  { %2831 = vmatprep.subr.mxu0 %v5712_v14 }
0x266c   :  { %2832 = vmatpush1.msra.mxu0 %v5715_v41 }
0x266d   :  { %2833 = vmatprep.subr.mxu0 %v5719_v36 }
0x266e   :  { %2834 = vmatpush1.msra.mxu0 %v5723_v37 }
0x266f   :  { %2835 = vmatprep.subr.mxu0 %v5727_v38 }
0x2670   :  { %2836 = vmatpush1.msra.mxu0 %v5731_v39 }
0x2671   :  { %3121 = vmatprep.subr.mxu0 %v5708_v58 }
0x2729   :  { %v2647_v61 = vpop.f32.mrf.mxu0 }
0x272a   :  { %v2651_v2 = vadd.f32 %v2647_v61, %v2575_v59 }
0x272b   :  { %v4599_v63 = vpop.f32.mrf.mxu0 }
0x272c   :  { %4812 = vtanh.f32 %v2651_v2  ;;  %v2652_v23 = vmul.f32 0.5, %v2651_v2 }
0x272e   :  { %4814 = vtanh.f32 %v2652_v23 }
0x2739   :  { %v4813_v21 = vpop.eup %4812 }
0x273a   :  { %2659 = vrot.lane.b32.xlu0 %v4813_v21, %s4990_s1  ;;  %v2799_v21 = vsub.s32 1, %v2794_v57 }
0x273b   :  { %v4815_v3 = vpop.eup %4814 }
0x273c   :  { %v2654_v0 = vmul.f32 0.5, %v4815_v3  ;;  %v5773_v23 = vrot.slane %v2789_v42, %v2799_v21 }
0x273e   :  { %v2655_v62 = vadd.f32 0.5, %v2654_v0 }
0x2740   :  { %v2657_v50 = vmul.f32 %v2655_v62, %v2565_v45 }
0x27ac   :  { %v2660_v30 = vpop.permute.xlu0 %2659 }
0x27ad   :  { %v2662_v27 = vmul.f32 %v2660_v30, %v2655_v62 }
0x27af   :  { %2664 = vrot.lane.b32.xlu1 %v2662_v27, %s4991_s11 }
0x2821   :  { %v2665_v6 = vpop.permute.xlu1 %2664 }
0x2822   :  { %v2667_v22 = vadd.f32 %v2665_v6, %v2657_v50 }
0x2824   :  { %4816 = vtanh.f32 %v2667_v22 }
0x2831   :  { %v4817_v15 = vpop.eup %4816 }
0x2832   :  { %2670 = vrot.lane.b32.xlu0 %v4817_v15, %s4990_s1 }
0x28a4   :  { %v2671_v46 = vpop.permute.xlu0 %2670 }
0x28a5   :  { %v2673_v47 = vmul.f32 %v2671_v46, %v2655_v62 }
0x28a7   :  { %2679 = vrot.lane.b32.xlu1 %v2673_v47, %s4991_s11 }
0x2919   :  { %v2680_v48 = vpop.permute.xlu1 %2679 }
0x291a   :  { %4609 = vmatmul.mubr.msk.f32.vlgmr.msra.gmra.mxu1 %vm349_vm9, %v2680_v48 }
0x291b   :  { %2966 = vmatprep.mubr.f32.mxu1 %v4989_v1  ;;  %2927 = vmatpush1.msra.mxu1 %v5710_v11 }
0x291c   :  { %2928 = vmatprep.subr.mxu1 %v5712_v14 }
0x291d   :  { %2929 = vmatpush1.msra.mxu1 %v5715_v41 }
0x291e   :  { %2930 = vmatprep.subr.mxu1 %v5719_v36 }
0x291f   :  { %2931 = vmatpush1.msra.mxu1 %v5723_v37 }
0x2920   :  { %2932 = vmatprep.subr.mxu1 %v5727_v38 }
0x2921   :  { %2933 = vmatpush1.msra.mxu1 %v5731_v39 }
0x2922   :  { %4611 = vmatprep.subr.mxu1 %v4989_v1 }
0x29da   :  { %v2749_v25 = vpop.f32.mrf.mxu1 }
0x29db   :  { %v2753_v52 = vadd.f32 %v2749_v25, %v2677_v26  ;;  %v5783_v26 = vld [vmem:[#allocation11 + $0x8] sm:$0xff]  ;;  %v5787_v25 = vld [vmem:[#allocation11] sm:$0xff] }
0x29dc   :  { %v4610_v40 = vpop.f32.mrf.mxu1 }
0x29dd   :  { %4818 = vtanh.f32 %v2753_v52  ;;  %v2754_v53 = vmul.f32 0.5, %v2753_v52 }
0x29df   :  { %4820 = vtanh.f32 %v2754_v53 }
0x29ea   :  { %v4819_v31 = vpop.eup %4818 }
0x29eb   :  { %2761 = vrot.lane.b32.xlu0 %v4819_v31, %s4990_s1 }
0x29ec   :  { %v4821_v55 = vpop.eup %4820 }
0x29ed   :  { %v2756_v28 = vmul.f32 0.5, %v4821_v55 }
0x29ef   :  { %v2757_v54 = vadd.f32 0.5, %v2756_v28 }
0x29f1   :  { %v2759_v35 = vmul.f32 %v2757_v54, %v2667_v22 }
0x2a5d   :  { %v2762_v33 = vpop.permute.xlu0 %2761 }
0x2a5e   :  { %v2764_v51 = vmul.f32 %v2762_v33, %v2757_v54 }
0x2a60   :  { %2766 = vrot.lane.b32.xlu1 %v2764_v51, %s4991_s11 }
0x2ad2   :  { %v2767_v56 = vpop.permute.xlu1 %2766 }
0x2ad3   :  { %v5705_v24 = vadd.f32 %v2767_v56, %v2759_v35 }
0x2ad5   :  { %4822 = vtanh.f32 %v5705_v24 }
0x2ae2   :  { %v4823_v9 = vpop.eup %4822 }
0x2ae3   :  { %2772 = vrot.lane.b32.xlu0 %v4823_v9, %s4990_s1 }
0x2b55   :  { %v2773_v60 = vpop.permute.xlu0 %2772 }
0x2b56   :  { %v2775_v10 = vmul.f32 %v2773_v60, %v2757_v54 }
0x2b58   :  { %2777 = vrot.lane.b32.xlu1 %v2775_v10, %s4991_s11 }
0x2bca   :  { %v2778_v12 = vpop.permute.xlu1 %2777 }
0x2bcb   :  { %2780 = vst.msk [vmem:[#allocation13] sm:$0xff] %vm349_vm9, %v2778_v12  ;;  %4439 = vmatmul.mubr.msk.f32.vlgmr.msra.gmra.mxu0 %vm349_vm9, %v2778_v12 }
0x2bcc   :  { %3122 = vmatpush1.msra.mxu0 %v5710_v11  ;;  %3161 = vmatprep.mubr.f32.mxu0 %v4989_v1 }
0x2bcd   :  { %3123 = vmatprep.subr.mxu0 %v5712_v14 }
0x2bce   :  { %3124 = vmatpush1.msra.mxu0 %v5715_v41 }
0x2bcf   :  { %3125 = vmatprep.subr.mxu0 %v5719_v36 }
0x2bd0   :  { %3126 = vmatpush1.msra.mxu0 %v5723_v37 }
0x2bd1   :  { %3127 = vmatprep.subr.mxu0 %v5727_v38 }
0x2bd2   :  { %3128 = vmatpush1.msra.mxu0 %v5731_v39 }
0x2bd3   :  { %4625 = vmatprep.subr.mxu0 %v4989_v1 }
0x2c8b   :  { %v2871_v43 = vpop.f32.mrf.mxu0 }
0x2c8c   :  { %v2872_v49 = vadd.f32 %v2871_v43, %v5759_v17 }
0x2c8d   :  { %v2873_v34 = vpop.f32.mrf.mxu0 }
0x2c8e   :  { %4824 = vtanh.f32 %v2872_v49  ;;  %v2875_v44 = vmul.f32 0.5, %v2872_v49 }
0x2c90   :  { %4826 = vtanh.f32 %v2875_v44 }
0x2c9b   :  { %v4825_v18 = vpop.eup %4824 }
0x2c9c   :  { %2882 = vrot.lane.b32.xlu0 %v4825_v18, %s4990_s1 }
0x2c9d   :  { %v4827_v13 = vpop.eup %4826 }
0x2c9e   :  { %v2877_v45 = vmul.f32 0.5, %v4827_v13 }
0x2ca0   :  { %v2878_v7 = vadd.f32 0.5, %v2877_v45 }
0x2ca2   :  { %v2880_v5 = vmul.f32 %v2878_v7, %v5705_v24 }
0x2d0e   :  { %v2883_v19 = vpop.permute.xlu0 %2882 }
0x2d0f   :  { %v2885_v32 = vmul.f32 %v2883_v19, %v2878_v7 }
0x2d11   :  { %2887 = vrot.lane.b32.xlu1 %v2885_v32, %s4991_s11 }
0x2d83   :  { %v2888_v4 = vpop.permute.xlu1 %2887 }
0x2d84   :  { %v5765_v20 = vadd.f32 %v2888_v4, %v2880_v5 }
0x2d86   :  { %4828 = vtanh.f32 %v5765_v20 }
0x2d93   :  { %v4829_v59 = vpop.eup %4828 }
0x2d94   :  { %2893 = vrot.lane.b32.xlu0 %v4829_v59, %s4990_s1 }
0x2e06   :  { %v2894_v61 = vpop.permute.xlu0 %2893 }
0x2e07   :  { %v2896_v2 = vmul.f32 %v2894_v61, %v2878_v7 }
0x2e09   :  { %2898 = vrot.lane.b32.xlu1 %v2896_v2, %s4991_s11 }
0x2e7b   :  { %v2899_v63 = vpop.permute.xlu1 %2898 }
0x2e7c   :  { %4440 = vmatmul.mubr.msk.f32.vlgmr.msra.gmra.mxu1 %vm349_vm9, %v2899_v63 }
0x2e7d   :  { %4615 = vmatprep.mubr.msk.f32.mxu1 %vm4992_vm10, %v4989_v1  ;;  %4612 = vmatpush3.msra.mxu1 %v5783_v26 }
0x2e7e   :  { %4613 = vmatprep.subr.mxu1 %v4989_v1 }
0x2e7f   :  { %4614 = vmatpush3.msra.mxu1 %v5787_v25 }
0x2e80   :  { %4618 = vmatprep.subr.mxu1 %v4989_v1 }
0x2f3c   :  { %v2968_v3 = vpop.f32.mrf.mxu1 }
0x2f3d   :  { %v2969_v54 = vadd.f32 %v2968_v3, %v5759_v17 }
0x2f3e   :  { %v2970_v0 = vpop.f32.mrf.mxu1 }
0x2f3f   :  { %v5776_v62 = vadd.f32 %v2970_v0, %v5773_v23 }
0x2f41   :  { %v2973_v30 = vsel %vm152_vm0, %v5776_v62, -inf }
0x2f42   :  { %2974 = vmax.xlane.f32.xlu0 %v2973_v30 }
0x2fcb   :  { %v2975_v27 = vpop.xlane.xlu0 %2974 }
0x2fcc   :  { %vm2976_vm11 = vcmp.eq.f32.partialorder %v5776_v62, %v2975_v27 }
0x2fcd   :  { %v2977_v50 = vsel %vm2976_vm11, %v5091_v8, 16 }
0x2fce   :  { %v2978_v6 = vsel %vm152_vm0, %v2977_v50, 2147483647 }
0x2fcf   :  { %v2980_v22 = vshra.s32 %v2978_v6, 16  ;;  %v2979_v46 = vand.u32 65535, %v2978_v6 }
0x2fd1   :  { %v2982_v15 = vcvt.s32.f32 %v2980_v22  ;;  %v2981_v48 = vcvt.s32.f32 %v2979_v46 }
0x2fd3   :  { %2983 = vmin.xlane.f32.xlu1 %v2982_v15 }
0x305c   :  { %v2984_v47 = vpop.xlane.xlu1 %2983 }
0x305d   :  { %vm2985_vm12 = vcmp.eq.f32.partialorder %v2982_v15, %v2984_v47  ;;  %v2990_v52 = vcvt.f32.s32 %v2984_v47 }
0x305e   :  { %v2986_v29 = vsel %vm2985_vm12, %v2981_v48, inf }
0x305f   :  { %2987 = vmin.xlane.f32.xlu0 %v2986_v29  ;;  %v2991_v31 = vshll.u32 %v2990_v52, 16 }
0x30e8   :  { %v2988_v40 = vpop.xlane.xlu0 %2987 }
0x30e9   :  { %v2989_v53 = vcvt.f32.s32 %v2988_v40 }
0x30eb   :  { %v2992_v55 = vadd.s32 %v2991_v31, %v2989_v53 }
0x30ed   :  { %vm2993_vm13 = vcmp.eq.s32.totalorder %v5091_v8, %v2992_v55 }
0x30ee   :  { %v4441_v28 = vsel %vm2993_vm13, 1.0, %v4989_v1 }
0x30ef   :  { %4616 = vmatmul.mubr.msk.f32.vlgmr.msra.gmra.mxu1 %vm152_vm0, %v4441_v28 }
0x30f0   :  { %4619 = vmatpush3.msra.mxu1 %v5783_v26  ;;  %4622 = vmatprep.mubr.msk.f32.mxu1 %vm4992_vm10, %v4989_v1 }
0x30f1   :  { %4620 = vmatprep.subr.mxu1 %v4989_v1 }
0x30f2   :  { %4621 = vmatpush3.msra.mxu1 %v5787_v25 }
0x30f3   :  { %3316 = vmatprep.subr.mxu1 %v5708_v58 }
0x31af   :  { %v3065_v33 = vpop.f32.mrf.mxu1 }
0x31b0   :  { %v3069_v51 = vadd.f32 %v3065_v33, %v2969_v54 }
0x31b1   :  { %v4617_v35 = vpop.f32.mrf.mxu1 }
0x31b2   :  { %4830 = vtanh.f32 %v3069_v51  ;;  %v3070_v24 = vmul.f32 0.5, %v3069_v51 }
0x31b4   :  { %4832 = vtanh.f32 %v3070_v24 }
0x31bf   :  { %v4831_v56 = vpop.eup %4830 }
0x31c0   :  { %3077 = vrot.lane.b32.xlu0 %v4831_v56, %s4990_s1 }
0x31c1   :  { %v4833_v9 = vpop.eup %4832 }
0x31c2   :  { %v3072_v60 = vmul.f32 0.5, %v4833_v9 }
0x31c4   :  { %v3073_v10 = vadd.f32 0.5, %v3072_v60 }
0x31c6   :  { %v3075_v16 = vmul.f32 %v3073_v10, %v5765_v20 }
0x3232   :  { %v3078_v12 = vpop.permute.xlu0 %3077 }
0x3233   :  { %v3080_v57 = vmul.f32 %v3078_v12, %v3073_v10 }
0x3235   :  { %3082 = vrot.lane.b32.xlu1 %v3080_v57, %s4991_s11 }
0x32a7   :  { %v3083_v42 = vpop.permute.xlu1 %3082 }
0x32a8   :  { %v5804_v43 = vadd.f32 %v3083_v42, %v3075_v16 }
0x32aa   :  { %4834 = vtanh.f32 %v5804_v43 }
0x32b7   :  { %v4835_v49 = vpop.eup %4834 }
0x32b8   :  { %3088 = vrot.lane.b32.xlu1 %v4835_v49, %s4990_s1 }
0x332a   :  { %v3089_v34 = vpop.permute.xlu1 %3088 }
0x332b   :  { %v3091_v18 = vmul.f32 %v3089_v34, %v3073_v10 }
0x332d   :  { %3093 = vrot.lane.b32.xlu0 %v3091_v18, %s4991_s11 }
0x339f   :  { %v3094_v44 = vpop.permute.xlu0 %3093 }
0x33a0   :  { %4443 = vmatmul.mubr.msk.f32.vlgmr.msra.gmra.mxu0 %vm349_vm9, %v3094_v44 }
0x33a1   :  { %4626 = vmatpush3.msra.mxu0 %v5783_v26  ;;  %4629 = vmatprep.mubr.msk.f32.mxu0 %vm4992_vm10, %v4989_v1 }
0x33a2   :  { %4627 = vmatprep.subr.mxu0 %v4989_v1 }
0x33a3   :  { %4628 = vmatpush3.msra.mxu0 %v5787_v25 }
0x33a4   :  { %3511 = vmatprep.subr.mxu0 %v5708_v58 }
0x3460   :  { %v3163_v13 = vpop.f32.mrf.mxu0 }
0x3461   :  { %v3164_v22 = vadd.f32 %v3163_v13, %v5759_v17 }
0x3462   :  { %v3165_v45 = vpop.f32.mrf.mxu0 }
0x3463   :  { %v5817_v7 = vadd.f32 %v3165_v45, %v5773_v23 }
0x3465   :  { %v3168_v19 = vsel %vm152_vm0, %v5817_v7, -inf }
0x3466   :  { %3169 = vmax.xlane.f32.xlu1 %v3168_v19 }
0x34ef   :  { %v3170_v32 = vpop.xlane.xlu1 %3169 }
0x34f0   :  { %vm3171_vm14 = vcmp.eq.f32.partialorder %v5817_v7, %v3170_v32 }
0x34f1   :  { %v3172_v5 = vsel %vm3171_vm14, %v5091_v8, 16 }
0x34f2   :  { %v3173_v4 = vsel %vm152_vm0, %v3172_v5, 2147483647 }
0x34f3   :  { %v3175_v20 = vshra.s32 %v3173_v4, 16  ;;  %v3174_v61 = vand.u32 65535, %v3173_v4 }
0x34f5   :  { %v3177_v59 = vcvt.s32.f32 %v3175_v20  ;;  %v3176_v63 = vcvt.s32.f32 %v3174_v61 }
0x34f7   :  { %3178 = vmin.xlane.f32.xlu0 %v3177_v59 }
0x3580   :  { %v3179_v2 = vpop.xlane.xlu0 %3178 }
0x3581   :  { %vm3180_vm15 = vcmp.eq.f32.partialorder %v3177_v59, %v3179_v2  ;;  %v3185_v3 = vcvt.f32.s32 %v3179_v2 }
0x3582   :  { %v3181_v21 = vsel %vm3180_vm15, %v3176_v63, inf }
0x3583   :  { %3182 = vmin.xlane.f32.xlu0 %v3181_v21  ;;  %v3186_v30 = vshll.u32 %v3185_v3, 16 }
0x360c   :  { %v3183_v0 = vpop.xlane.xlu0 %3182 }
0x360d   :  { %v3184_v27 = vcvt.f32.s32 %v3183_v0 }
0x360f   :  { %v3187_v50 = vadd.s32 %v3186_v30, %v3184_v27 }
0x3611   :  { %vm3188_vm1 = vcmp.eq.s32.totalorder %v5091_v8, %v3187_v50 }
0x3612   :  { %v4444_v6 = vsel %vm3188_vm1, 1.0, %v4989_v1 }
0x3613   :  { %4623 = vmatmul.mubr.msk.f32.vlgmr.msra.gmra.mxu1 %vm152_vm0, %v4444_v6 }
0x3614   :  { %3317 = vmatpush1.msra.mxu1 %v5710_v11  ;;  %3356 = vmatprep.mubr.f32.mxu1 %v4989_v1 }
0x3615   :  { %3318 = vmatprep.subr.mxu1 %v5712_v14 }
0x3616   :  { %3319 = vmatpush1.msra.mxu1 %v5715_v41 }
0x3617   :  { %3320 = vmatprep.subr.mxu1 %v5719_v36 }
0x3618   :  { %3321 = vmatpush1.msra.mxu1 %v5723_v37 }
0x3619   :  { %3322 = vmatprep.subr.mxu1 %v5727_v38 }
0x361a   :  { %3323 = vmatpush1.msra.mxu1 %v5731_v39 }
0x361b   :  { %4632 = vmatprep.subr.mxu1 %v4989_v1 }
0x36d3   :  { %v3260_v15 = vpop.f32.mrf.mxu1 }
0x36d4   :  { %v3264_v46 = vadd.f32 %v3260_v15, %v3164_v22 }
0x36d5   :  { %v4624_v47 = vpop.f32.mrf.mxu1 }
0x36d6   :  { %4836 = vtanh.f32 %v3264_v46  ;;  %v3265_v29 = vmul.f32 0.5, %v3264_v46 }
0x36d8   :  { %4838 = vtanh.f32 %v3265_v29 }
0x36e3   :  { %v4837_v48 = vpop.eup %4836 }
0x36e4   :  { %3272 = vrot.lane.b32.xlu1 %v4837_v48, %s4990_s1 }
0x36e5   :  { %v4839_v52 = vpop.eup %4838 }
0x36e6   :  { %v3267_v40 = vmul.f32 0.5, %v4839_v52 }
0x36e8   :  { %v3268_v31 = vadd.f32 0.5, %v3267_v40 }
0x36ea   :  { %v3270_v28 = vmul.f32 %v3268_v31, %v5804_v43 }
0x3756   :  { %v3273_v53 = vpop.permute.xlu1 %3272 }
0x3757   :  { %v3275_v55 = vmul.f32 %v3273_v53, %v3268_v31 }
0x3759   :  { %3277 = vrot.lane.b32.xlu0 %v3275_v55, %s4991_s11 }
0x37cb   :  { %v3278_v54 = vpop.permute.xlu0 %3277 }
0x37cc   :  { %v5840_v33 = vadd.f32 %v3278_v54, %v3270_v28 }
0x37ce   :  { %4840 = vtanh.f32 %v5840_v33 }
0x37db   :  { %v4841_v51 = vpop.eup %4840 }
0x37dc   :  { %3283 = vrot.lane.b32.xlu1 %v4841_v51, %s4990_s1 }
0x384e   :  { %v3284_v35 = vpop.permute.xlu1 %3283 }
0x384f   :  { %v3286_v56 = vmul.f32 %v3284_v35, %v3268_v31 }
0x3851   :  { %3288 = vrot.lane.b32.xlu1 %v3286_v56, %s4991_s11 }
0x38c3   :  { %v3289_v24 = vpop.permute.xlu1 %3288 }
0x38c4   :  { %4446 = vmatmul.mubr.msk.f32.vlgmr.msra.gmra.mxu1 %vm349_vm9, %v3289_v24 }
0x38c5   :  { %4633 = vmatpush3.msra.mxu1 %v5783_v26  ;;  %4636 = vmatprep.mubr.msk.f32.mxu1 %vm4992_vm10, %v4989_v1 }
0x38c6   :  { %4634 = vmatprep.subr.mxu1 %v4989_v1 }
0x38c7   :  { %4635 = vmatpush3.msra.mxu1 %v5787_v25 }
0x38c8   :  { %3706 = vmatprep.subr.mxu1 %v5708_v58 }
0x3984   :  { %v3358_v9 = vpop.f32.mrf.mxu1 }
0x3985   :  { %v3359_v59 = vadd.f32 %v3358_v9, %v5759_v17 }
0x3986   :  { %v3360_v60 = vpop.f32.mrf.mxu1 }
0x3987   :  { %v5853_v10 = vadd.f32 %v3360_v60, %v5773_v23 }
0x3989   :  { %v3363_v12 = vsel %vm152_vm0, %v5853_v10, -inf }
0x398a   :  { %3364 = vmax.xlane.f32.xlu0 %v3363_v12 }
0x3a13   :  { %v3365_v57 = vpop.xlane.xlu0 %3364 }
0x3a14   :  { %vm3366_vm2 = vcmp.eq.f32.partialorder %v5853_v10, %v3365_v57 }
0x3a15   :  { %v3367_v16 = vsel %vm3366_vm2, %v5091_v8, 16 }
0x3a16   :  { %v3368_v42 = vsel %vm152_vm0, %v3367_v16, 2147483647 }
0x3a17   :  { %v3370_v43 = vshra.s32 %v3368_v42, 16  ;;  %v3369_v34 = vand.u32 65535, %v3368_v42 }
0x3a19   :  { %v3372_v49 = vcvt.s32.f32 %v3370_v43  ;;  %v3371_v44 = vcvt.s32.f32 %v3369_v34 }
0x3a1b   :  { %3373 = vmin.xlane.f32.xlu1 %v3372_v49 }
0x3aa4   :  { %v3374_v18 = vpop.xlane.xlu1 %3373 }
0x3aa5   :  { %vm3375_vm3 = vcmp.eq.f32.partialorder %v3372_v49, %v3374_v18  ;;  %v3380_v45 = vcvt.f32.s32 %v3374_v18 }
0x3aa6   :  { %v3376_v13 = vsel %vm3375_vm3, %v3371_v44, inf }
0x3aa7   :  { %3377 = vmin.xlane.f32.xlu0 %v3376_v13  ;;  %v3381_v32 = vshll.u32 %v3380_v45, 16 }
0x3b30   :  { %v3378_v19 = vpop.xlane.xlu0 %3377 }
0x3b31   :  { %v3379_v5 = vcvt.f32.s32 %v3378_v19 }
0x3b33   :  { %v3382_v4 = vadd.s32 %v3381_v32, %v3379_v5 }
0x3b35   :  { %vm3383_vm4 = vcmp.eq.s32.totalorder %v5091_v8, %v3382_v4 }
0x3b36   :  { %v4447_v20 = vsel %vm3383_vm4, 1.0, %v4989_v1 }
0x3b37   :  { %4630 = vmatmul.mubr.msk.f32.vlgmr.msra.gmra.mxu0 %vm152_vm0, %v4447_v20 }
0x3b38   :  { %3512 = vmatpush1.msra.mxu0 %v5710_v11  ;;  %3551 = vmatprep.mubr.f32.mxu0 %v4989_v1 }
0x3b39   :  { %3513 = vmatprep.subr.mxu0 %v5712_v14 }
0x3b3a   :  { %3514 = vmatpush1.msra.mxu0 %v5715_v41 }
0x3b3b   :  { %3515 = vmatprep.subr.mxu0 %v5719_v36 }
0x3b3c   :  { %3516 = vmatpush1.msra.mxu0 %v5723_v37 }
0x3b3d   :  { %3517 = vmatprep.subr.mxu0 %v5727_v38 }
0x3b3e   :  { %3518 = vmatpush1.msra.mxu0 %v5731_v39 }
0x3b3f   :  { %4639 = vmatprep.subr.mxu0 %v4989_v1 }
0x3bf7   :  { %v3455_v61 = vpop.f32.mrf.mxu0 }
0x3bf8   :  { %v3459_v2 = vadd.f32 %v3455_v61, %v3359_v59 }
0x3bf9   :  { %v4631_v63 = vpop.f32.mrf.mxu0 }
0x3bfa   :  { %4842 = vtanh.f32 %v3459_v2  ;;  %v3460_v3 = vmul.f32 0.5, %v3459_v2 }
0x3bfc   :  { %4844 = vtanh.f32 %v3460_v3 }
0x3c07   :  { %v4843_v21 = vpop.eup %4842 }
0x3c08   :  { %3467 = vrot.lane.b32.xlu0 %v4843_v21, %s4990_s1 }
0x3c09   :  { %v4845_v0 = vpop.eup %4844 }
0x3c0a   :  { %v3462_v30 = vmul.f32 0.5, %v4845_v0 }
0x3c0c   :  { %v3463_v27 = vadd.f32 0.5, %v3462_v30 }
0x3c0e   :  { %v3465_v22 = vmul.f32 %v3463_v27, %v5840_v33 }
0x3c7a   :  { %v3468_v50 = vpop.permute.xlu0 %3467 }
0x3c7b   :  { %v3470_v6 = vmul.f32 %v3468_v50, %v3463_v27 }
0x3c7d   :  { %3472 = vrot.lane.b32.xlu1 %v3470_v6, %s4991_s11 }
0x3cef   :  { %v3473_v15 = vpop.permute.xlu1 %3472 }
0x3cf0   :  { %v5876_v46 = vadd.f32 %v3473_v15, %v3465_v22 }
0x3cf2   :  { %4846 = vtanh.f32 %v5876_v46 }
0x3cff   :  { %v4847_v47 = vpop.eup %4846 }
0x3d00   :  { %3478 = vrot.lane.b32.xlu1 %v4847_v47, %s4990_s1 }
0x3d72   :  { %v3479_v48 = vpop.permute.xlu1 %3478 }
0x3d73   :  { %v3481_v29 = vmul.f32 %v3479_v48, %v3463_v27 }
0x3d75   :  { %3483 = vrot.lane.b32.xlu0 %v3481_v29, %s4991_s11 }
0x3de7   :  { %v3484_v52 = vpop.permute.xlu0 %3483 }
0x3de8   :  { %4449 = vmatmul.mubr.msk.f32.vlgmr.msra.gmra.mxu0 %vm349_vm9, %v3484_v52 }
0x3de9   :  { %4640 = vmatpush3.msra.mxu0 %v5783_v26  ;;  %4643 = vmatprep.mubr.msk.f32.mxu0 %vm4992_vm10, %v4989_v1 }
0x3dea   :  { %4641 = vmatprep.subr.mxu0 %v4989_v1 }
0x3deb   :  { %4642 = vmatpush3.msra.mxu0 %v5787_v25 }
0x3dec   :  { %3901 = vmatprep.subr.mxu0 %v5708_v58 }
0x3ea8   :  { %v3553_v40 = vpop.f32.mrf.mxu0 }
0x3ea9   :  { %v3554_v34 = vadd.f32 %v3553_v40, %v5759_v17 }
0x3eaa   :  { %v3555_v31 = vpop.f32.mrf.mxu0 }
0x3eab   :  { %v5889_v53 = vadd.f32 %v3555_v31, %v5773_v23 }
0x3ead   :  { %v3558_v55 = vsel %vm152_vm0, %v5889_v53, -inf }
0x3eae   :  { %3559 = vmax.xlane.f32.xlu1 %v3558_v55 }
0x3f37   :  { %v3560_v28 = vpop.xlane.xlu1 %3559 }
0x3f38   :  { %vm3561_vm5 = vcmp.eq.f32.partialorder %v5889_v53, %v3560_v28 }
0x3f39   :  { %v3562_v54 = vsel %vm3561_vm5, %v5091_v8, 16 }
0x3f3a   :  { %v3563_v33 = vsel %vm152_vm0, %v3562_v54, 2147483647 }
0x3f3b   :  { %v3565_v51 = vshra.s32 %v3563_v33, 16  ;;  %v3564_v56 = vand.u32 65535, %v3563_v33 }
0x3f3d   :  { %v3567_v35 = vcvt.s32.f32 %v3565_v51  ;;  %v3566_v9 = vcvt.s32.f32 %v3564_v56 }
0x3f3f   :  { %3568 = vmin.xlane.f32.xlu0 %v3567_v35 }
0x3fc8   :  { %v3569_v24 = vpop.xlane.xlu0 %3568 }
0x3fc9   :  { %vm3570_vm6 = vcmp.eq.f32.partialorder %v3567_v35, %v3569_v24  ;;  %v3575_v12 = vcvt.f32.s32 %v3569_v24 }
0x3fca   :  { %v3571_v60 = vsel %vm3570_vm6, %v3566_v9, inf }
0x3fcb   :  { %3572 = vmin.xlane.f32.xlu0 %v3571_v60  ;;  %v3576_v16 = vshll.u32 %v3575_v12, 16 }
0x4054   :  { %v3573_v57 = vpop.xlane.xlu0 %3572 }
0x4055   :  { %v3574_v42 = vcvt.f32.s32 %v3573_v57 }
0x4057   :  { %v3577_v43 = vadd.s32 %v3576_v16, %v3574_v42 }
0x4059   :  { %vm3578_vm7 = vcmp.eq.s32.totalorder %v5091_v8, %v3577_v43 }
0x405a   :  { %v4450_v49 = vsel %vm3578_vm7, 1.0, %v4989_v1 }
0x405b   :  { %4637 = vmatmul.mubr.msk.f32.vlgmr.msra.gmra.mxu1 %vm152_vm0, %v4450_v49 }
0x405c   :  { %3707 = vmatpush1.msra.mxu1 %v5710_v11  ;;  %3746 = vmatprep.mubr.f32.mxu1 %v4989_v1 }
0x405d   :  { %3708 = vmatprep.subr.mxu1 %v5712_v14 }
0x405e   :  { %3709 = vmatpush1.msra.mxu1 %v5715_v41 }
0x405f   :  { %3710 = vmatprep.subr.mxu1 %v5719_v36 }
0x4060   :  { %3711 = vmatpush1.msra.mxu1 %v5723_v37 }
0x4061   :  { %3712 = vmatprep.subr.mxu1 %v5727_v38 }
0x4062   :  { %3713 = vmatpush1.msra.mxu1 %v5731_v39 }
0x4063   :  { %4646 = vmatprep.subr.mxu1 %v4989_v1 }
0x411b   :  { %v3650_v18 = vpop.f32.mrf.mxu1 }
0x411c   :  { %v3654_v44 = vadd.f32 %v3650_v18, %v3554_v34 }
0x411d   :  { %v4638_v13 = vpop.f32.mrf.mxu1 }
0x411e   :  { %4848 = vtanh.f32 %v3654_v44  ;;  %v3655_v19 = vmul.f32 0.5, %v3654_v44 }
0x4120   :  { %4850 = vtanh.f32 %v3655_v19 }
0x412b   :  { %v4849_v45 = vpop.eup %4848 }
0x412c   :  { %3662 = vrot.lane.b32.xlu1 %v4849_v45, %s4990_s1 }
0x412d   :  { %v4851_v32 = vpop.eup %4850 }
0x412e   :  { %v3657_v5 = vmul.f32 0.5, %v4851_v32 }
0x4130   :  { %v3658_v4 = vadd.f32 0.5, %v3657_v5 }
0x4132   :  { %v3660_v61 = vmul.f32 %v3658_v4, %v5876_v46 }
0x419e   :  { %v3663_v20 = vpop.permute.xlu1 %3662 }
0x419f   :  { %v3665_v59 = vmul.f32 %v3663_v20, %v3658_v4 }
0x41a1   :  { %3667 = vrot.lane.b32.xlu0 %v3665_v59, %s4991_s11 }
0x4213   :  { %v3668_v2 = vpop.permute.xlu0 %3667 }
0x4214   :  { %v5912_v63 = vadd.f32 %v3668_v2, %v3660_v61 }
0x4216   :  { %4852 = vtanh.f32 %v5912_v63 }
0x4223   :  { %v4853_v21 = vpop.eup %4852 }
0x4224   :  { %3673 = vrot.lane.b32.xlu1 %v4853_v21, %s4990_s1 }
0x4296   :  { %v3674_v3 = vpop.permute.xlu1 %3673 }
0x4297   :  { %v3676_v0 = vmul.f32 %v3674_v3, %v3658_v4 }
0x4299   :  { %3678 = vrot.lane.b32.xlu1 %v3676_v0, %s4991_s11 }
0x430b   :  { %v3679_v30 = vpop.permute.xlu1 %3678 }
0x430c   :  { %4452 = vmatmul.mubr.msk.f32.vlgmr.msra.gmra.mxu1 %vm349_vm9, %v3679_v30 }
0x430d   :  { %4647 = vmatpush3.msra.mxu1 %v5783_v26  ;;  %4650 = vmatprep.mubr.msk.f32.mxu1 %vm4992_vm10, %v4989_v1 }
0x430e   :  { %4648 = vmatprep.subr.mxu1 %v4989_v1 }
0x430f   :  { %4649 = vmatpush3.msra.mxu1 %v5787_v25 }
0x4310   :  { %4096 = vmatprep.subr.mxu1 %v5708_v58 }
0x43cc   :  { %v3748_v27 = vpop.f32.mrf.mxu1 }
0x43cd   :  { %v3749_v24 = vadd.f32 %v3748_v27, %v5759_v17 }
0x43ce   :  { %v3750_v50 = vpop.f32.mrf.mxu1 }
0x43cf   :  { %v5925_v6 = vadd.f32 %v3750_v50, %v5773_v23 }
0x43d1   :  { %v3753_v22 = vsel %vm152_vm0, %v5925_v6, -inf }
0x43d2   :  { %3754 = vmax.xlane.f32.xlu0 %v3753_v22 }
0x445b   :  { %v3755_v15 = vpop.xlane.xlu0 %3754 }
0x445c   :  { %vm3756_vm8 = vcmp.eq.f32.partialorder %v5925_v6, %v3755_v15 }
0x445d   :  { %v3757_v46 = vsel %vm3756_vm8, %v5091_v8, 16 }
0x445e   :  { %v3758_v47 = vsel %vm152_vm0, %v3757_v46, 2147483647 }
0x445f   :  { %v3760_v48 = vshra.s32 %v3758_v47, 16  ;;  %v3759_v52 = vand.u32 65535, %v3758_v47 }
0x4461   :  { %v3762_v29 = vcvt.s32.f32 %v3760_v48  ;;  %v3761_v31 = vcvt.s32.f32 %v3759_v52 }
0x4463   :  { %3763 = vmin.xlane.f32.xlu1 %v3762_v29 }
0x44ec   :  { %v3764_v40 = vpop.xlane.xlu1 %3763 }
0x44ed   :  { %vm3765_vm11 = vcmp.eq.f32.partialorder %v3762_v29, %v3764_v40  ;;  %v3770_v28 = vcvt.f32.s32 %v3764_v40 }
0x44ee   :  { %v3766_v55 = vsel %vm3765_vm11, %v3761_v31, inf }
0x44ef   :  { %3767 = vmin.xlane.f32.xlu0 %v3766_v55  ;;  %v3771_v33 = vshll.u32 %v3770_v28, 16 }
0x4578   :  { %v3768_v54 = vpop.xlane.xlu0 %3767 }
0x4579   :  { %v3769_v51 = vcvt.f32.s32 %v3768_v54 }
0x457b   :  { %v3772_v35 = vadd.s32 %v3771_v33, %v3769_v51 }
0x457d   :  { %vm3773_vm12 = vcmp.eq.s32.totalorder %v5091_v8, %v3772_v35 }
0x457e   :  { %v4453_v56 = vsel %vm3773_vm12, 1.0, %v4989_v1 }
0x457f   :  { %4644 = vmatmul.mubr.msk.f32.vlgmr.msra.gmra.mxu0 %vm152_vm0, %v4453_v56 }
0x4580   :  { %3902 = vmatpush1.msra.mxu0 %v5710_v11  ;;  %3941 = vmatprep.mubr.f32.mxu0 %v4989_v1 }
0x4581   :  { %3903 = vmatprep.subr.mxu0 %v5712_v14 }
0x4582   :  { %3904 = vmatpush1.msra.mxu0 %v5715_v41 }
0x4583   :  { %3905 = vmatprep.subr.mxu0 %v5719_v36 }
0x4584   :  { %3906 = vmatpush1.msra.mxu0 %v5723_v37 }
0x4585   :  { %3907 = vmatprep.subr.mxu0 %v5727_v38 }
0x4586   :  { %3908 = vmatpush1.msra.mxu0 %v5731_v39 }
0x4587   :  { %4653 = vmatprep.subr.mxu0 %v4989_v1 }
0x463f   :  { %v3845_v9 = vpop.f32.mrf.mxu0 }
0x4640   :  { %v3849_v60 = vadd.f32 %v3845_v9, %v3749_v24 }
0x4641   :  { %v4645_v12 = vpop.f32.mrf.mxu0 }
0x4642   :  { %4854 = vtanh.f32 %v3849_v60  ;;  %v3850_v16 = vmul.f32 0.5, %v3849_v60 }
0x4644   :  { %4856 = vtanh.f32 %v3850_v16 }
0x464f   :  { %v4855_v57 = vpop.eup %4854 }
0x4650   :  { %3857 = vrot.lane.b32.xlu0 %v4855_v57, %s4990_s1 }
0x4651   :  { %v4857_v42 = vpop.eup %4856 }
0x4652   :  { %v3852_v43 = vmul.f32 0.5, %v4857_v42 }
0x4654   :  { %v3853_v49 = vadd.f32 0.5, %v3852_v43 }
0x4656   :  { %v3855_v44 = vmul.f32 %v3853_v49, %v5912_v63 }
0x46c2   :  { %v3858_v34 = vpop.permute.xlu0 %3857 }
0x46c3   :  { %v3860_v18 = vmul.f32 %v3858_v34, %v3853_v49 }
0x46c5   :  { %3862 = vrot.lane.b32.xlu1 %v3860_v18, %s4991_s11 }
0x4737   :  { %v3863_v13 = vpop.permute.xlu1 %3862 }
0x4738   :  { %v5948_v45 = vadd.f32 %v3863_v13, %v3855_v44 }
0x473a   :  { %4858 = vtanh.f32 %v5948_v45 }
0x4747   :  { %v4859_v19 = vpop.eup %4858 }
0x4748   :  { %3868 = vrot.lane.b32.xlu1 %v4859_v19, %s4990_s1 }
0x47ba   :  { %v3869_v32 = vpop.permute.xlu1 %3868 }
0x47bb   :  { %v3871_v5 = vmul.f32 %v3869_v32, %v3853_v49 }
0x47bd   :  { %3873 = vrot.lane.b32.xlu0 %v3871_v5, %s4991_s11 }
0x482f   :  { %v3874_v4 = vpop.permute.xlu0 %3873 }
0x4830   :  { %4455 = vmatmul.mubr.msk.f32.vlgmr.msra.gmra.mxu0 %vm349_vm9, %v3874_v4 }
0x4831   :  { %4654 = vmatpush3.msra.mxu0 %v5783_v26  ;;  %4657 = vmatprep.mubr.msk.f32.mxu0 %vm4992_vm10, %v4989_v1 }
0x4832   :  { %4655 = vmatprep.subr.mxu0 %v4989_v1 }
0x4833   :  { %4656 = vmatpush3.msra.mxu0 %v5787_v25 }
0x4834   :  { %4291 = vmatprep.subr.mxu0 %v5708_v58 }
0x48f0   :  { %v3943_v20 = vpop.f32.mrf.mxu0 }
0x48f1   :  { %v3944_v29 = vadd.f32 %v3943_v20, %v5759_v17 }
0x48f2   :  { %v3945_v59 = vpop.f32.mrf.mxu0 }
0x48f3   :  { %v5961_v61 = vadd.f32 %v3945_v59, %v5773_v23 }
0x48f5   :  { %v3948_v2 = vsel %vm152_vm0, %v5961_v61, -inf }
0x48f6   :  { %3949 = vmax.xlane.f32.xlu1 %v3948_v2 }
0x497f   :  { %v3950_v63 = vpop.xlane.xlu1 %3949 }
0x4980   :  { %vm3951_vm13 = vcmp.eq.f32.partialorder %v5961_v61, %v3950_v63 }
0x4981   :  { %v3952_v26 = vsel %vm3951_vm13, %v5091_v8, 16 }
0x4982   :  { %v3953_v21 = vsel %vm152_vm0, %v3952_v26, 2147483647 }
0x4983   :  { %v3955_v3 = vshra.s32 %v3953_v21, 16  ;;  %v3954_v58 = vand.u32 65535, %v3953_v21 }
0x4985   :  { %v3957_v25 = vcvt.s32.f32 %v3955_v3  ;;  %v3956_v30 = vcvt.s32.f32 %v3954_v58 }
0x4987   :  { %3958 = vmin.xlane.f32.xlu0 %v3957_v25 }
0x4a10   :  { %v3959_v0 = vpop.xlane.xlu0 %3958 }
0x4a11   :  { %vm3960_vm10 = vcmp.eq.f32.partialorder %v3957_v25, %v3959_v0  ;;  %v3965_v50 = vcvt.f32.s32 %v3959_v0 }
0x4a12   :  { %v3961_v27 = vsel %vm3960_vm10, %v3956_v30, inf }
0x4a13   :  { %3962 = vmin.xlane.f32.xlu0 %v3961_v27  ;;  %v3966_v15 = vshll.u32 %v3965_v50, 16 }
0x4a9c   :  { %v3963_v22 = vpop.xlane.xlu0 %3962 }
0x4a9d   :  { %v3964_v46 = vcvt.f32.s32 %v3963_v22 }
0x4a9f   :  { %v3967_v47 = vadd.s32 %v3966_v15, %v3964_v46 }
0x4aa1   :  { %vm3968_vm14 = vcmp.eq.s32.totalorder %v5091_v8, %v3967_v47 }
0x4aa2   :  { %v4456_v48 = vsel %vm3968_vm14, 1.0, %v4989_v1 }
0x4aa3   :  { %4651 = vmatmul.mubr.msk.f32.vlgmr.msra.gmra.mxu1 %vm152_vm0, %v4456_v48 }
0x4aa4   :  { %4097 = vmatpush1.msra.mxu1 %v5710_v11  ;;  %4136 = vmatprep.mubr.f32.mxu1 %v4989_v1 }
0x4aa5   :  { %4098 = vmatprep.subr.mxu1 %v5712_v14 }
0x4aa6   :  { %4099 = vmatpush1.msra.mxu1 %v5715_v41 }
0x4aa7   :  { %4100 = vmatprep.subr.mxu1 %v5719_v36 }
0x4aa8   :  { %4101 = vmatpush1.msra.mxu1 %v5723_v37 }
0x4aa9   :  { %4102 = vmatprep.subr.mxu1 %v5727_v38 }
0x4aaa   :  { %4103 = vmatpush1.msra.mxu1 %v5731_v39 }
0x4b63   :  { %v4040_v52 = vpop.f32.mrf.mxu1 }
0x4b64   :  { %v4044_v40 = vadd.f32 %v4040_v52, %v3944_v29 }
0x4b65   :  { %v4652_v31 = vpop.f32.mrf.mxu1 }
0x4b66   :  { %4860 = vtanh.f32 %v4044_v40  ;;  %v4045_v28 = vmul.f32 0.5, %v4044_v40 }
0x4b68   :  { %4862 = vtanh.f32 %v4045_v28 }
0x4b73   :  { %v4861_v55 = vpop.eup %4860 }
0x4b74   :  { %4052 = vrot.lane.b32.xlu1 %v4861_v55, %s4990_s1 }
0x4b75   :  { %v4863_v54 = vpop.eup %4862 }
0x4b76   :  { %v4047_v33 = vmul.f32 0.5, %v4863_v54 }
0x4b78   :  { %v4048_v51 = vadd.f32 0.5, %v4047_v33 }
0x4b7a   :  { %v4050_v24 = vmul.f32 %v4048_v51, %v5948_v45 }
0x4be6   :  { %v4053_v35 = vpop.permute.xlu1 %4052 }
0x4be7   :  { %v4055_v56 = vmul.f32 %v4053_v35, %v4048_v51 }
0x4be9   :  { %4057 = vrot.lane.b32.xlu0 %v4055_v56, %s4991_s11 }
0x4c5b   :  { %v4058_v9 = vpop.permute.xlu0 %4057 }
0x4c5c   :  { %v4060_v60 = vadd.f32 %v4058_v9, %v4050_v24 }
0x4c5e   :  { %4864 = vtanh.f32 %v4060_v60 }
0x4c6b   :  { %v4865_v12 = vpop.eup %4864 }
0x4c6c   :  { %4063 = vrot.lane.b32.xlu1 %v4865_v12, %s4990_s1 }
0x4cde   :  { %v4064_v57 = vpop.permute.xlu1 %4063 }
0x4cdf   :  { %v4066_v16 = vmul.f32 %v4064_v57, %v4048_v51 }
0x4ce1   :  { %4068 = vrot.lane.b32.xlu1 %v4066_v16, %s4991_s11 }
0x4d53   :  { %v4069_v42 = vpop.permute.xlu1 %4068 }
0x4d54   :  { %4458 = vmatmul.mubr.msk.f32.vlgmr.msra.gmra.mxu1 %vm349_vm9, %v4069_v42 }
0x4e14   :  { %v4138_v43 = vpop.f32.mrf.mxu1 }
0x4e16   :  { %v4140_v49 = vpop.f32.mrf.mxu1 }
0x4e17   :  { %v5987_v34 = vadd.f32 %v4140_v49, %v5773_v23 }
0x4e19   :  { %v4143_v18 = vsel %vm152_vm0, %v5987_v34, -inf }
0x4e1a   :  { %4144 = vmax.xlane.f32.xlu0 %v4143_v18 }
0x4ea3   :  { %v4145_v44 = vpop.xlane.xlu0 %4144 }
0x4ea4   :  { %vm4146_vm15 = vcmp.eq.f32.partialorder %v5987_v34, %v4145_v44 }
0x4ea5   :  { %v4147_v13 = vsel %vm4146_vm15, %v5091_v8, 16 }
0x4ea6   :  { %v4148_v45 = vsel %vm152_vm0, %v4147_v13, 2147483647 }
0x4ea7   :  { %v4150_v19 = vshra.s32 %v4148_v45, 16  ;;  %v4149_v5 = vand.u32 65535, %v4148_v45 }
0x4ea9   :  { %v4152_v32 = vcvt.s32.f32 %v4150_v19  ;;  %v4151_v20 = vcvt.s32.f32 %v4149_v5 }
0x4eab   :  { %4153 = vmin.xlane.f32.xlu1 %v4152_v32 }
0x4f34   :  { %v4154_v4 = vpop.xlane.xlu1 %4153 }
0x4f35   :  { %vm4155_vm1 = vcmp.eq.f32.partialorder %v4152_v32, %v4154_v4  ;;  %v4160_v2 = vcvt.f32.s32 %v4154_v4 }
0x4f36   :  { %v4156_v59 = vsel %vm4155_vm1, %v4151_v20, inf }
0x4f37   :  { %4157 = vmin.xlane.f32.xlu0 %v4156_v59  ;;  %v4161_v26 = vshll.u32 %v4160_v2, 16 }
0x4fc0   :  { %v4158_v63 = vpop.xlane.xlu0 %4157 }
0x4fc1   :  { %v4159_v21 = vcvt.f32.s32 %v4158_v63 }
0x4fc3   :  { %v4162_v3 = vadd.s32 %v4161_v26, %v4159_v21 }
0x4fc5   :  { %vm4163_vm2 = vcmp.eq.s32.totalorder %v5091_v8, %v4162_v3  ;;  %v4139_v8 = vadd.f32 %v4138_v43, %v5759_v17 }
0x4fc6   :  { %v4459_v25 = vsel %vm4163_vm2, 1.0, %v4989_v1 }
0x4fc7   :  { %4658 = vmatmul.mubr.msk.f32.vlgmr.msra.gmra.mxu0 %vm152_vm0, %v4459_v25 }
0x4fc8   :  { %4292 = vmatpush1.msra.mxu0 %v5710_v11  ;;  %4331 = vmatprep.mubr.f32.mxu0 %v4989_v1 }
0x4fc9   :  { %4293 = vmatprep.subr.mxu0 %v5712_v14 }
0x4fca   :  { %4294 = vmatpush1.msra.mxu0 %v5715_v41 }
0x4fcb   :  { %4295 = vmatprep.subr.mxu0 %v5719_v36 }
0x4fcc   :  { %4296 = vmatpush1.msra.mxu0 %v5723_v37 }
0x4fcd   :  { %4297 = vmatprep.subr.mxu0 %v5727_v38 }
0x4fce   :  { %4298 = vmatpush1.msra.mxu0 %v5731_v39 }
0x5087   :  { %v4235_v58 = vpop.f32.mrf.mxu0 }
0x5088   :  { %v4239_v0 = vadd.f32 %v4235_v58, %v4139_v8 }
0x5089   :  { %v4659_v30 = vpop.f32.mrf.mxu0 }
0x508a   :  { %4866 = vtanh.f32 %v4239_v0  ;;  %v4240_v1 = vmul.f32 0.5, %v4239_v0 }
0x508c   :  { %4868 = vtanh.f32 %v4240_v1 }
0x5097   :  { %v4867_v11 = vpop.eup %4866 }
0x5098   :  { %4247 = vrot.lane.b32.xlu0 %v4867_v11, %s4990_s1 }
0x5099   :  { %v4869_v14 = vpop.eup %4868 }
0x509a   :  { %v4242_v41 = vmul.f32 0.5, %v4869_v14 }
0x509c   :  { %v4243_v36 = vadd.f32 0.5, %v4242_v41 }
0x509e   :  { %v4245_v38 = vmul.f32 %v4243_v36, %v4060_v60 }
0x510a   :  { %v4248_v27 = vpop.permute.xlu0 %4247 }
0x510b   :  { %v4250_v37 = vmul.f32 %v4248_v27, %v4243_v36 }
0x510d   :  { %4252 = vrot.lane.b32.xlu1 %v4250_v37, %s4991_s11 }
0x517f   :  { %v4253_v39 = vpop.permute.xlu1 %4252 }
0x5180   :  { %v4255_v50 = vadd.f32 %v4253_v39, %v4245_v38 }
0x5182   :  { %4870 = vtanh.f32 %v4255_v50 }
0x518f   :  { %v4871_v17 = vpop.eup %4870 }
0x5190   :  { %4258 = vrot.lane.b32.xlu1 %v4871_v17, %s4990_s1 }
0x5194   :  { %4338 = vrot.lane.b32.xlu1 %v5817_v7, %s4985_s24  ;;  %s4996_s24 = smov [#allocation13]  }
0x5195   :  { %s4386_s14 = sshll.u32 %s4996_s24, 4  ;;  %s4387_s14 = int_to_ptr.vmem [resolvable:$true] %s4386_s14 }
0x5196   :  { %s4952_s6 = scalar_lea.vmem %s4387_s14, 128  ;;  %p4957_p7 = scmp.lt.s32.totalorder %s4387_s14, %s4387_s14 }
0x5197   :  { %p4953_p6 = scmp.ne.s32.totalorder %s4387_s14, %s4952_s6  ;;  %p4958_p8 = scmp.lt.s32.totalorder %s4952_s6, %s4952_s6 }
0x5198   :  { %4346 = vrot.lane.b32.xlu1 %v5889_v53, %s4993_s7 }
0x5199   :  { %p4959_p9 = por %p4958_p8, %p4957_p7 }
0x519b   :  { %p4960_p10 = pnand %p4959_p9, %p4953_p6 }
0x519c   :  { %4354 = vrot.lane.b32.xlu1 %v5961_v61, %s4994_s13 }
0x5202   :  { %v4259_v22 = vpop.permute.xlu1 %4258 }
0x5203   :  { %v4261_v15 = vmul.f32 %v4259_v22, %v4243_v36 }
0x5205   :  { %4263 = vrot.lane.b32.xlu0 %v4261_v15, %s4991_s11 }
0x5209   :  { %4342 = vrot.lane.b32.xlu0 %v5853_v10, %s4991_s11 }
0x520d   :  { %4350 = vrot.lane.b32.xlu0 %v5925_v6, %s4990_s1 }
0x5211   :  { %4358 = vrot.lane.b32.xlu0 %v5987_v34, %s4995_s3 }
0x5277   :  { %v4264_v7 = vpop.permute.xlu0 %4263 }
0x5278   :  { %4461 = vmatmul.mubr.msk.f32.vlgmr.msra.gmra.mxu0 %vm349_vm9, %v4264_v7 }
0x5279   :  { %4963 = shalt.err (!%p4960_p10)
}
0x527a   :  { %4389 = dma.vmem_to_hbm [thread:$0]  %s4387_s14, 128, %s6040_s10, [#allocation7]   ;;  %v4339_v61 = vpop.permute.xlu1 %4338  ;;  %vm4367_vm3 = vcmask 392192   ;;  %vm4369_vm4 = vcmask 523264   ;;  %vm4371_vm5 = vcmask 654336   ;;  %vm4373_vm6 = vcmask 785408  }
0x527b   :  { %s4997_s1 = smov 112   ;;  %v4343_v46 = vpop.permute.xlu0 %4342  ;;  %v4365_v48 = vsel %vm152_vm0, %v5776_v62, %v4339_v61  ;;  %vm4375_vm7 = vcmask 916480  }
0x527c   :  { %v4366_v52 = vsel %vm349_vm9, %v4365_v48, %v4343_v46 }
0x527e   :  { %v4347_v47 = vpop.permute.xlu1 %4346 }
0x527f   :  { %v4351_v29 = vpop.permute.xlu0 %4350  ;;  %v4368_v40 = vsel %vm4367_vm3, %v4366_v52, %v4347_v47 }
0x5280   :  { %v4370_v55 = vsel %vm4369_vm4, %v4368_v40, %v4351_v29 }
0x5282   :  { %v4355_v31 = vpop.permute.xlu1 %4354 }
0x5283   :  { %v4359_v28 = vpop.permute.xlu0 %4358 }
0x5338   :  { %v4333_v10 = vpop.f32.mrf.mxu0 }
0x533a   :  { %v4334_v53 = vpop.f32.mrf.mxu0 }
0x533b   :  { %v4335_v6 = vadd.f32 %v4334_v53, %v5773_v23  ;;  %v4372_v23 = vsel %vm4371_vm5, %v4370_v55, %v4355_v31 }
0x533c   :  { %v4374_v54 = vsel %vm4373_vm6, %v4372_v23, %v4359_v28 }
0x533d   :  { %4362 = vrot.lane.b32.xlu1 %v4335_v6, %s4997_s1 }
0x53af   :  { %v4363_v33 = vpop.permute.xlu1 %4362 }
0x53b0   :  { %v4376_v51 = vsel %vm4375_vm7, %v4374_v54, %v4363_v33 }
0x53b1   :  { %4377 = vst [vmem:[%s6039_s9] sm:$0xff] %v4376_v51 }
0x53b2   :  { %4978 = dma.done.wait [#allocation7], 128  }
0x53b3   :  { %4979 = vsyncadd [#allocation7], 4294967168 }
0x53b4   :  { %4395 = vsyncpa [#allocation6], 1 }
0x53b5   :  { %4396 = vsyncpa [#allocation9], 1 }
0x53b6   :  { %4397 = vsyncpa [#allocation12], 1 }
0x53b7   :  { %4398 = vsyncpa [#allocation7], 1 }

</bundles_post_ra>
